<compile_context>
chip_gen: v6e
topology: v6e:2x2x1
jax: 0.10.0
libtpu: 0.0.40
codegen_flags: <defaults>
</compile_context>

<pallas_src>
import functools

import jax
import jax.numpy as jnp
from jax import lax
from jax.experimental import pallas as pl
from jax.experimental.pallas import tpu as pltpu

EPS = 1e-5      # nn.BatchNorm2d default eps
LANE = 128      # TPU lane width
SUBLANE = 8     # TPU sublane width


def _rup(x, m=LANE):
    return ((x + m - 1) // m) * m


def _pad_to(a, axis, size):
    pad = size - a.shape[axis]
    if pad <= 0:
        return a
    widths = [(0, 0)] * a.ndim
    widths[axis] = (0, pad)
    return jnp.pad(a, widths)


def _pick_block_batch(n, h, w):
    """Batch images per grid step so M per matmul is >= ~256 rows."""
    target = 256
    if h * w >= target:
        return 1
    want = min(n, max(1, target // (h * w)))
    for b in range(want, 0, -1):
        if n % b == 0:
            return b
    return 1


def _bottleneck_kernel(x_ref, w1_ref, b1_ref, w2_ref, b2_ref, w3_ref, b3_ref,
                       out_ref, h1pad_ref, *, h, w, b_blk, row_chunk):
    cp = w1_ref.shape[1]
    m = h * w
    wp = h1pad_ref.shape[1]
    sdt = h1pad_ref.dtype

    # ---- zero only the scratch HALO (interior fully overwritten per image).
    # Done every grid step (cheap, aligned stores) so it stays correct when the
    # "parallel" grid axis is sharded across v7x's two TensorCores.
    zrow = jnp.zeros((1, wp, cp), sdt)
    h1pad_ref[0:1, :, :] = zrow                       # top halo row
    h1pad_ref[h + 1:h + 2, :, :] = zrow               # bottom halo row
    zband = jnp.zeros((h + 2, SUBLANE, cp), sdt)
    h1pad_ref[:, 0:SUBLANE, :] = zband                # covers left halo col 0
    h1pad_ref[:, wp - SUBLANE:wp, :] = zband          # covers right halo col w+1

    b1 = b1_ref[...]                                  # (1, Cp)   f32
    b2 = b2_ref[...]
    b3 = b3_ref[...]

    for b in range(b_blk):
        x2d = x_ref[b].reshape(m, x_ref.shape[-1])    # (M, Cin_p) bf16

        # ---- conv1 (1x1, BN1 scale folded into w1) + bias + relu ----
        h1 = jnp.dot(x2d, w1_ref[...], preferred_element_type=jnp.float32)
        h1 = jnp.maximum(h1 + b1, 0.0)                # (M, Cp) f32

        # Single write of relu(h1) into the spatially padded scratch interior.
        h1pad_ref[1:1 + h, 1:1 + w, :] = h1.reshape(h, w, cp).astype(sdt)

        # ---- conv2 (3x3, BN2 folded) + conv3 (1x1, BN3 folded) + residual,
        #      fused per spatial row-chunk so the f32 accumulator stays small.
        for r0 in range(0, h, row_chunk):
            rc = min(row_chunk, h - r0)
            mc = rc * w

            acc = None
            for k in range(9):
                ky, kx = k // 3, k % 3
                win = h1pad_ref[ky + r0:ky + r0 + rc, kx:kx + w, :]
                p = jnp.dot(win.reshape(mc, cp), w2_ref[k],
                            preferred_element_type=jnp.float32)
                acc = p if acc is None else acc + p
            h2c = jnp.maximum(acc + b2, 0.0).astype(jnp.bfloat16)   # (mc, Cp)

            h3c = jnp.dot(h2c, w3_ref[...], preferred_element_type=jnp.float32)
            resid = x2d[r0 * w:r0 * w + mc, :].astype(jnp.float32)
            outc = jnp.maximum(h3c + b3 + resid, 0.0)               # f32
            out_ref[b, r0:r0 + rc, :, :] = (
                outc.reshape(rc, w, out_ref.shape[-1]).astype(out_ref.dtype))


def bottleneck_forward_nhwc(x_nhwc, params):
    n, h, w, cin = x_nhwc.shape
    w1, w2, w3 = params["w1"], params["w2"], params["w3"]   # BN-scale folded
    c = w1.shape[1]
    cout = w3.shape[1]
    assert cin == cout, "downsample=None requires in_channels == channels*expansion"
    # TODO(synk): stride != 1 and the downsample branch are not implemented.

    cin_p = _rup(cin)
    c_p = _rup(c)
    cout_p = _rup(cout)                 # == cin_p since cin == cout
    wp = _rup(w + 2, SUBLANE)           # scratch sublane dim, 8-aligned

    # bf16 activations over HBM; lane-dense channel padding only when needed.
    xp = x_nhwc.astype(jnp.bfloat16)
    if cin_p != cin:
        xp = _pad_to(xp, 3, cin_p)
    w1p = _pad_to(_pad_to(w1, 0, cin_p), 1, c_p).astype(jnp.bfloat16)
    w2p = _pad_to(_pad_to(w2, 1, c_p), 2, c_p).astype(jnp.bfloat16)
    w3p = _pad_to(_pad_to(w3, 0, c_p), 1, cout_p).astype(jnp.bfloat16)
    b1p = _pad_to(params["b1"].reshape(1, -1).astype(jnp.float32), 1, c_p)
    b2p = _pad_to(params["b2"].reshape(1, -1).astype(jnp.float32), 1, c_p)
    b3p = _pad_to(params["b3"].reshape(1, -1).astype(jnp.float32), 1, cout_p)

    b_blk = _pick_block_batch(n, h, w)            # keep grid even / >=2 for v7x
    grid_n = n // b_blk
    row_chunk = max(1, min(h, 256 // max(w, 1)))  # ~256 rows of M per chunk

    weight_elems = cin_p * c_p + 9 * c_p * c_p + c_p * cout_p
    cost = pl.CostEstimate(
        flops=2 * n * h * w * weight_elems,
        transcendentals=0,
        bytes_accessed=(n * h * w * (cin_p + cout_p) * 2      # bf16 activations
                        + weight_elems * 2
                        + (2 * c_p + cout_p) * 4))

    # Per-step VMEM estimate (double-buffered blocks + scratch + live values).
    m_img = h * w
    est_vmem = (2 * b_blk * m_img * (cin_p + cout_p) * 2      # in/out blocks, bf16
                + 2 * weight_elems * 2                        # weights, bf16
                + (h + 2) * wp * c_p * 2                      # padded scratch
                + m_img * c_p * 4                             # h1 (f32)
                + m_img * cin_p * 2                           # x value (bf16)
                + 4 * row_chunk * w * c_p * 4)                # chunk temporaries
    cp_kwargs = dict(dimension_semantics=("parallel",))
    if est_vmem > 24 * 1024 * 1024:
        # v7x has only 64 MiB VMEM per TC; stay well under it.
        cp_kwargs["vmem_limit_bytes"] = min(int(est_vmem * 3 // 2),
                                            48 * 1024 * 1024)

    out_p = pl.pallas_call(
        functools.partial(_bottleneck_kernel, h=h, w=w,
                          b_blk=b_blk, row_chunk=row_chunk),
        out_shape=jax.ShapeDtypeStruct((n, h, w, cout_p), jnp.bfloat16),
        grid_spec=pltpu.PrefetchScalarGridSpec(
            num_scalar_prefetch=0,
            grid=(grid_n,),
            in_specs=[
                pl.BlockSpec((b_blk, h, w, cin_p), lambda i: (i, 0, 0, 0)),
                pl.BlockSpec((cin_p, c_p), lambda i: (0, 0)),
                pl.BlockSpec((1, c_p), lambda i: (0, 0)),
                pl.BlockSpec((9, c_p, c_p), lambda i: (0, 0, 0)),
                pl.BlockSpec((1, c_p), lambda i: (0, 0)),
                pl.BlockSpec((c_p, cout_p), lambda i: (0, 0)),
                pl.BlockSpec((1, cout_p), lambda i: (0, 0)),
            ],
            out_specs=pl.BlockSpec((b_blk, h, w, cout_p), lambda i: (i, 0, 0, 0)),
            scratch_shapes=[pltpu.VMEM((h + 2, wp, c_p), jnp.bfloat16)],
        ),
        compiler_params=pltpu.CompilerParams(**cp_kwargs),
        cost_estimate=cost,
    )(xp, w1p, b1p, w2p, b2p, w3p, b3p)

    if cout_p != cout:
        out_p = out_p[..., :cout]
    return out_p


def bottleneck_forward(x_nchw, params):
    # TODO(synk): in a full ResNet keep activations NHWC (and bf16) between
    # blocks so these two HBM transpose passes disappear.
    x_nhwc = jnp.transpose(x_nchw.astype(jnp.bfloat16), (0, 2, 3, 1))
    y_nhwc = bottleneck_forward_nhwc(x_nhwc, params)
    return jnp.transpose(y_nhwc, (0, 3, 1, 2))


def make_params(key, in_channels, channels):
    """Deterministic synthetic parameters matching Bottleneck.__init__ shapes."""
    expansion = 4
    cout = channels * expansion
    ks = jax.random.split(key, 15)

    # PyTorch conv weight layouts (OIHW), bias=False everywhere.
    wt1 = 0.1 * jax.random.normal(ks[0], (channels, in_channels, 1, 1), jnp.float32)
    wt2 = 0.1 * jax.random.normal(ks[1], (channels, channels, 3, 3), jnp.float32)
    wt3 = 0.1 * jax.random.normal(ks[2], (cout, channels, 1, 1), jnp.float32)

    def bn(kg, kb, km, kv, nf):
        gamma = 1.0 + 0.1 * jax.random.normal(kg, (nf,), jnp.float32)
        beta = 0.1 * jax.random.normal(kb, (nf,), jnp.float32)
        rmean = 0.1 * jax.random.normal(km, (nf,), jnp.float32)
        rvar = 1.0 + 0.1 * jnp.abs(jax.random.normal(kv, (nf,), jnp.float32))
        scale = gamma / jnp.sqrt(rvar + EPS)
        bias = beta - rmean * scale
        return scale, bias

    # TODO(synk): BN is folded using running statistics (eval mode); training-mode
    # batch statistics are not computed in-kernel.
    s1, b1 = bn(ks[3], ks[4], ks[5], ks[6], channels)
    s2, b2 = bn(ks[7], ks[8], ks[9], ks[10], channels)
    s3, b3 = bn(ks[11], ks[12], ks[13], ks[14], cout)

    # Kernel-layout (Cin, Cout) matmul matrices with the BN scale folded in.
    w1 = jnp.transpose(wt1[:, :, 0, 0], (1, 0)) * s1[None, :]
    w2 = (jnp.transpose(wt2, (2, 3, 1, 0)).reshape(9, channels, channels)
          * s2[None, None, :])
    w3 = jnp.transpose(wt3[:, :, 0, 0], (1, 0)) * s3[None, :]

    return dict(
        w1=w1, w2=w2, w3=w3, b1=b1, b2=b2, b3=b3,
        s1=s1, s2=s2, s3=s3,          # unfolded (for the reference)
        wt1=wt1, wt2=wt2, wt3=wt3,    # torch-layout copies (for the reference)
    )


def reference_forward(x, p):
    """Pure-JAX (lax.conv) reference in NCHW f32, for correctness checking."""
    dn = ("NCHW", "OIHW", "NCHW")

    def bn_apply(y, s, b):
        return y * s.reshape(1, -1, 1, 1) + b.reshape(1, -1, 1, 1)

    y = lax.conv_general_dilated(x, p["wt1"], (1, 1), "VALID", dimension_numbers=dn)
    y = jnp.maximum(bn_apply(y, p["s1"], p["b1"]), 0.0)
    y = lax.conv_general_dilated(y, p["wt2"], (1, 1), ((1, 1), (1, 1)),
                                 dimension_numbers=dn)
    y = jnp.maximum(bn_apply(y, p["s2"], p["b2"]), 0.0)
    y = lax.conv_general_dilated(y, p["wt3"], (1, 1), "VALID", dimension_numbers=dn)
    y = bn_apply(y, p["s3"], p["b3"])
    return jnp.maximum(y + x, 0.0)


if __name__ == "__main__":
    key = jax.random.PRNGKey(0)
    k_x, k_p = jax.random.split(key)

    channels = 4
    in_channels = channels * 4          # == channels * expansion (downsample=None)
    N, H, W = 2, 16, 16

    x = jax.random.normal(k_x, (N, in_channels, H, W), jnp.float32)
    params = make_params(k_p, in_channels, channels)

    out = jax.block_until_ready(bottleneck_forward(x, params))

    ref = reference_forward(x, params)
    assert out.shape == ref.shape == (N, in_channels, H, W)
    # bf16 activations over HBM + bf16 MXU operands (f32 accumulation) ->
    # loosened tolerance vs the full-f32 reference.
    out_f32 = out.astype(jnp.float32)
    err = jnp.max(jnp.abs(out_f32 - ref))
    assert jnp.allclose(out_f32, ref, atol=3e-2, rtol=3e-2), f"max abs err = {err}"

    print("KERNEL_OK")
</pallas_src>

<mosaic_0001>
module attributes {stable_mosaic.version = 11 : i64} {
  func.func @_bottleneck_kernel(%arg0: i32, %arg1: memref<1x16x16x128xbf16, #tpu.memory_space<vmem>>, %arg2: memref<128x128xbf16, #tpu.memory_space<vmem>>, %arg3: memref<1x128xf32, #tpu.memory_space<vmem>>, %arg4: memref<9x128x128xbf16, #tpu.memory_space<vmem>>, %arg5: memref<1x128xf32, #tpu.memory_space<vmem>>, %arg6: memref<128x128xbf16, #tpu.memory_space<vmem>>, %arg7: memref<1x128xf32, #tpu.memory_space<vmem>>, %arg8: memref<1x16x16x128xbf16, #tpu.memory_space<vmem>>, %arg9: memref<18x24x128xbf16, #tpu.memory_space<vmem>>) attributes {dimension_semantics = [#tpu.dimension_semantics<parallel>], iteration_bounds = array<i64: 2>, scalar_prefetch = 0 : i64, scratch_operands = 1 : i64, tpu.core_type = #tpu.core_type<tc>, window_params = [{transform_indices = @transform_0, window_bounds = array<i64: 1, 16, 16, 128>}, {pipeline_mode = #tpu.pipeline_mode<synchronous>, transform_indices = @transform_1, window_bounds = array<i64: 128, 128>}, {pipeline_mode = #tpu.pipeline_mode<synchronous>, transform_indices = @transform_2, window_bounds = array<i64: 1, 128>}, {pipeline_mode = #tpu.pipeline_mode<synchronous>, transform_indices = @transform_3, window_bounds = array<i64: 9, 128, 128>}, {pipeline_mode = #tpu.pipeline_mode<synchronous>, transform_indices = @transform_4, window_bounds = array<i64: 1, 128>}, {pipeline_mode = #tpu.pipeline_mode<synchronous>, transform_indices = @transform_5, window_bounds = array<i64: 128, 128>}, {pipeline_mode = #tpu.pipeline_mode<synchronous>, transform_indices = @transform_6, window_bounds = array<i64: 1, 128>}, {transform_indices = @transform_7, window_bounds = array<i64: 1, 16, 16, 128>}]} {
    %cst = arith.constant 0.000000e+00 : bf16
    %0 = vector.broadcast %cst : bf16 to vector<1x24x128xbf16>
    %c0 = arith.constant 0 : index
    %c0_0 = arith.constant 0 : index
    %c0_1 = arith.constant 0 : index
    %1 = vector.load %arg9[%c0, %c0_0, %c0_1] : memref<18x24x128xbf16, #tpu.memory_space<vmem>>, vector<1x24x128xbf16>
    tpu.vector_store %arg9[%c0, %c0_0, %c0_1], %0 {strides = array<i32>} : memref<18x24x128xbf16, #tpu.memory_space<vmem>>, vector<1x24x128xbf16>,
    %c17 = arith.constant 17 : index
    %c0_2 = arith.constant 0 : index
    %c0_3 = arith.constant 0 : index
    %2 = vector.load %arg9[%c17, %c0_2, %c0_3] : memref<18x24x128xbf16, #tpu.memory_space<vmem>>, vector<1x24x128xbf16>
    tpu.vector_store %arg9[%c17, %c0_2, %c0_3], %0 {strides = array<i32>} : memref<18x24x128xbf16, #tpu.memory_space<vmem>>, vector<1x24x128xbf16>,
    %cst_4 = arith.constant 0.000000e+00 : bf16
    %3 = vector.broadcast %cst_4 : bf16 to vector<18x8x128xbf16>
    %c0_5 = arith.constant 0 : index
    %c0_6 = arith.constant 0 : index
    %c0_7 = arith.constant 0 : index
    %4 = vector.load %arg9[%c0_5, %c0_6, %c0_7] : memref<18x24x128xbf16, #tpu.memory_space<vmem>>, vector<18x8x128xbf16>
    tpu.vector_store %arg9[%c0_5, %c0_6, %c0_7], %3 {strides = array<i32>} : memref<18x24x128xbf16, #tpu.memory_space<vmem>>, vector<18x8x128xbf16>,
    %c0_8 = arith.constant 0 : index
    %c16 = arith.constant 16 : index
    %c0_9 = arith.constant 0 : index
    %5 = vector.load %arg9[%c0_8, %c16, %c0_9] : memref<18x24x128xbf16, #tpu.memory_space<vmem>>, vector<18x8x128xbf16>
    tpu.vector_store %arg9[%c0_8, %c16, %c0_9], %3 {strides = array<i32>} : memref<18x24x128xbf16, #tpu.memory_space<vmem>>, vector<18x8x128xbf16>,
    %c0_10 = arith.constant 0 : index
    %c0_11 = arith.constant 0 : index
    %6 = vector.load %arg3[%c0_10, %c0_11] : memref<1x128xf32, #tpu.memory_space<vmem>>, vector<1x128xf32>
    %c0_12 = arith.constant 0 : index
    %c0_13 = arith.constant 0 : index
    %7 = vector.load %arg5[%c0_12, %c0_13] : memref<1x128xf32, #tpu.memory_space<vmem>>, vector<1x128xf32>
    %c0_14 = arith.constant 0 : index
    %c0_15 = arith.constant 0 : index
    %8 = vector.load %arg7[%c0_14, %c0_15] : memref<1x128xf32, #tpu.memory_space<vmem>>, vector<1x128xf32>
    %c0_16 = arith.constant 0 : index
    %c0_17 = arith.constant 0 : index
    %c0_18 = arith.constant 0 : index
    %c0_19 = arith.constant 0 : index
    %9 = vector.load %arg1[%c0_16, %c0_17, %c0_18, %c0_19] : memref<1x16x16x128xbf16, #tpu.memory_space<vmem>>, vector<1x16x16x128xbf16>
    %10 = vector.shape_cast %9 : vector<1x16x16x128xbf16> to vector<16x16x128xbf16>
    %11 = vector.shape_cast %10 : vector<16x16x128xbf16> to vector<256x128xbf16>
    %c0_20 = arith.constant 0 : index
    %c0_21 = arith.constant 0 : index
    %12 = vector.load %arg2[%c0_20, %c0_21] : memref<128x128xbf16, #tpu.memory_space<vmem>>, vector<128x128xbf16>
    %cst_22 = arith.constant dense<0.000000e+00> : vector<256x128xf32>
    %13 = tpu.matmul %11, %12, %cst_22 {dimension_numbers = #tpu.dot_dimension_numbers<[1], [0], [0], [1], [0, 0, 1, 1], [], []>} : vector<256x128xbf16>, vector<128x128xbf16>, vector<256x128xf32> -> vector<256x128xf32>
    %14 = vector.broadcast %6 : vector<1x128xf32> to vector<256x128xf32>
    %15 = arith.addf %13, %14 : vector<256x128xf32>
    %cst_23 = arith.constant 0.000000e+00 : f32
    %16 = vector.broadcast %cst_23 : f32 to vector<256x128xf32>
    %17 = arith.maximumf %15, %16 : vector<256x128xf32>
    %18 = vector.shape_cast %17 : vector<256x128xf32> to vector<16x16x128xf32>
    %19 = arith.truncf %18 : vector<16x16x128xf32> to vector<16x16x128xbf16>
    %c1 = arith.constant 1 : index
    %c1_24 = arith.constant 1 : index
    %c0_25 = arith.constant 0 : index
    %20 = vector.load %arg9[%c1, %c1_24, %c0_25] : memref<18x24x128xbf16, #tpu.memory_space<vmem>>, vector<16x16x128xbf16>
    tpu.vector_store %arg9[%c1, %c1_24, %c0_25], %19 {strides = array<i32>} : memref<18x24x128xbf16, #tpu.memory_space<vmem>>, vector<16x16x128xbf16>,
    %c0_26 = arith.constant 0 : index
    %c0_27 = arith.constant 0 : index
    %c0_28 = arith.constant 0 : index
    %21 = vector.load %arg9[%c0_26, %c0_27, %c0_28] : memref<18x24x128xbf16, #tpu.memory_space<vmem>>, vector<16x16x128xbf16>
    %22 = vector.shape_cast %21 : vector<16x16x128xbf16> to vector<256x128xbf16>
    %c0_29 = arith.constant 0 : index
    %c0_30 = arith.constant 0 : index
    %c0_31 = arith.constant 0 : index
    %23 = vector.load %arg4[%c0_29, %c0_30, %c0_31] : memref<9x128x128xbf16, #tpu.memory_space<vmem>>, vector<1x128x128xbf16>
    %24 = vector.shape_cast %23 : vector<1x128x128xbf16> to vector<128x128xbf16>
    %cst_32 = arith.constant dense<0.000000e+00> : vector<256x128xf32>
    %25 = tpu.matmul %22, %24, %cst_32 {dimension_numbers = #tpu.dot_dimension_numbers<[1], [0], [0], [1], [0, 0, 1, 1], [], []>} : vector<256x128xbf16>, vector<128x128xbf16>, vector<256x128xf32> -> vector<256x128xf32>
    %c0_33 = arith.constant 0 : index
    %c1_34 = arith.constant 1 : index
    %c0_35 = arith.constant 0 : index
    %26 = vector.load %arg9[%c0_33, %c1_34, %c0_35] : memref<18x24x128xbf16, #tpu.memory_space<vmem>>, vector<16x16x128xbf16>
    %27 = vector.shape_cast %26 : vector<16x16x128xbf16> to vector<256x128xbf16>
    %c1_36 = arith.constant 1 : index
    %c0_37 = arith.constant 0 : index
    %c0_38 = arith.constant 0 : index
    %28 = vector.load %arg4[%c1_36, %c0_37, %c0_38] : memref<9x128x128xbf16, #tpu.memory_space<vmem>>, vector<1x128x128xbf16>
    %29 = vector.shape_cast %28 : vector<1x128x128xbf16> to vector<128x128xbf16>
    %cst_39 = arith.constant dense<0.000000e+00> : vector<256x128xf32>
    %30 = tpu.matmul %27, %29, %cst_39 {dimension_numbers = #tpu.dot_dimension_numbers<[1], [0], [0], [1], [0, 0, 1, 1], [], []>} : vector<256x128xbf16>, vector<128x128xbf16>, vector<256x128xf32> -> vector<256x128xf32>
    %31 = arith.addf %25, %30 : vector<256x128xf32>
    %c0_40 = arith.constant 0 : index
    %c2 = arith.constant 2 : index
    %c0_41 = arith.constant 0 : index
    %32 = vector.load %arg9[%c0_40, %c2, %c0_41] : memref<18x24x128xbf16, #tpu.memory_space<vmem>>, vector<16x16x128xbf16>
    %33 = vector.shape_cast %32 : vector<16x16x128xbf16> to vector<256x128xbf16>
    %c2_42 = arith.constant 2 : index
    %c0_43 = arith.constant 0 : index
    %c0_44 = arith.constant 0 : index
    %34 = vector.load %arg4[%c2_42, %c0_43, %c0_44] : memref<9x128x128xbf16, #tpu.memory_space<vmem>>, vector<1x128x128xbf16>
    %35 = vector.shape_cast %34 : vector<1x128x128xbf16> to vector<128x128xbf16>
    %cst_45 = arith.constant dense<0.000000e+00> : vector<256x128xf32>
    %36 = tpu.matmul %33, %35, %cst_45 {dimension_numbers = #tpu.dot_dimension_numbers<[1], [0], [0], [1], [0, 0, 1, 1], [], []>} : vector<256x128xbf16>, vector<128x128xbf16>, vector<256x128xf32> -> vector<256x128xf32>
    %37 = arith.addf %31, %36 : vector<256x128xf32>
    %c1_46 = arith.constant 1 : index
    %c0_47 = arith.constant 0 : index
    %c0_48 = arith.constant 0 : index
    %38 = vector.load %arg9[%c1_46, %c0_47, %c0_48] : memref<18x24x128xbf16, #tpu.memory_space<vmem>>, vector<16x16x128xbf16>
    %39 = vector.shape_cast %38 : vector<16x16x128xbf16> to vector<256x128xbf16>
    %c3 = arith.constant 3 : index
    %c0_49 = arith.constant 0 : index
    %c0_50 = arith.constant 0 : index
    %40 = vector.load %arg4[%c3, %c0_49, %c0_50] : memref<9x128x128xbf16, #tpu.memory_space<vmem>>, vector<1x128x128xbf16>
    %41 = vector.shape_cast %40 : vector<1x128x128xbf16> to vector<128x128xbf16>
    %cst_51 = arith.constant dense<0.000000e+00> : vector<256x128xf32>
    %42 = tpu.matmul %39, %41, %cst_51 {dimension_numbers = #tpu.dot_dimension_numbers<[1], [0], [0], [1], [0, 0, 1, 1], [], []>} : vector<256x128xbf16>, vector<128x128xbf16>, vector<256x128xf32> -> vector<256x128xf32>
    %43 = arith.addf %37, %42 : vector<256x128xf32>
    %c1_52 = arith.constant 1 : index
    %c1_53 = arith.constant 1 : index
    %c0_54 = arith.constant 0 : index
    %44 = vector.load %arg9[%c1_52, %c1_53, %c0_54] : memref<18x24x128xbf16, #tpu.memory_space<vmem>>, vector<16x16x128xbf16>
    %45 = vector.shape_cast %44 : vector<16x16x128xbf16> to vector<256x128xbf16>
    %c4 = arith.constant 4 : index
    %c0_55 = arith.constant 0 : index
    %c0_56 = arith.constant 0 : index
    %46 = vector.load %arg4[%c4, %c0_55, %c0_56] : memref<9x128x128xbf16, #tpu.memory_space<vmem>>, vector<1x128x128xbf16>
    %47 = vector.shape_cast %46 : vector<1x128x128xbf16> to vector<128x128xbf16>
    %cst_57 = arith.constant dense<0.000000e+00> : vector<256x128xf32>
    %48 = tpu.matmul %45, %47, %cst_57 {dimension_numbers = #tpu.dot_dimension_numbers<[1], [0], [0], [1], [0, 0, 1, 1], [], []>} : vector<256x128xbf16>, vector<128x128xbf16>, vector<256x128xf32> -> vector<256x128xf32>
    %49 = arith.addf %43, %48 : vector<256x128xf32>
    %c1_58 = arith.constant 1 : index
    %c2_59 = arith.constant 2 : index
    %c0_60 = arith.constant 0 : index
    %50 = vector.load %arg9[%c1_58, %c2_59, %c0_60] : memref<18x24x128xbf16, #tpu.memory_space<vmem>>, vector<16x16x128xbf16>
    %51 = vector.shape_cast %50 : vector<16x16x128xbf16> to vector<256x128xbf16>
    %c5 = arith.constant 5 : index
    %c0_61 = arith.constant 0 : index
    %c0_62 = arith.constant 0 : index
    %52 = vector.load %arg4[%c5, %c0_61, %c0_62] : memref<9x128x128xbf16, #tpu.memory_space<vmem>>, vector<1x128x128xbf16>
    %53 = vector.shape_cast %52 : vector<1x128x128xbf16> to vector<128x128xbf16>
    %cst_63 = arith.constant dense<0.000000e+00> : vector<256x128xf32>
    %54 = tpu.matmul %51, %53, %cst_63 {dimension_numbers = #tpu.dot_dimension_numbers<[1], [0], [0], [1], [0, 0, 1, 1], [], []>} : vector<256x128xbf16>, vector<128x128xbf16>, vector<256x128xf32> -> vector<256x128xf32>
    %55 = arith.addf %49, %54 : vector<256x128xf32>
    %c2_64 = arith.constant 2 : index
    %c0_65 = arith.constant 0 : index
    %c0_66 = arith.constant 0 : index
    %56 = vector.load %arg9[%c2_64, %c0_65, %c0_66] : memref<18x24x128xbf16, #tpu.memory_space<vmem>>, vector<16x16x128xbf16>
    %57 = vector.shape_cast %56 : vector<16x16x128xbf16> to vector<256x128xbf16>
    %c6 = arith.constant 6 : index
    %c0_67 = arith.constant 0 : index
    %c0_68 = arith.constant 0 : index
    %58 = vector.load %arg4[%c6, %c0_67, %c0_68] : memref<9x128x128xbf16, #tpu.memory_space<vmem>>, vector<1x128x128xbf16>
    %59 = vector.shape_cast %58 : vector<1x128x128xbf16> to vector<128x128xbf16>
    %cst_69 = arith.constant dense<0.000000e+00> : vector<256x128xf32>
    %60 = tpu.matmul %57, %59, %cst_69 {dimension_numbers = #tpu.dot_dimension_numbers<[1], [0], [0], [1], [0, 0, 1, 1], [], []>} : vector<256x128xbf16>, vector<128x128xbf16>, vector<256x128xf32> -> vector<256x128xf32>
    %61 = arith.addf %55, %60 : vector<256x128xf32>
    %c2_70 = arith.constant 2 : index
    %c1_71 = arith.constant 1 : index
    %c0_72 = arith.constant 0 : index
    %62 = vector.load %arg9[%c2_70, %c1_71, %c0_72] : memref<18x24x128xbf16, #tpu.memory_space<vmem>>, vector<16x16x128xbf16>
    %63 = vector.shape_cast %62 : vector<16x16x128xbf16> to vector<256x128xbf16>
    %c7 = arith.constant 7 : index
    %c0_73 = arith.constant 0 : index
    %c0_74 = arith.constant 0 : index
    %64 = vector.load %arg4[%c7, %c0_73, %c0_74] : memref<9x128x128xbf16, #tpu.memory_space<vmem>>, vector<1x128x128xbf16>
    %65 = vector.shape_cast %64 : vector<1x128x128xbf16> to vector<128x128xbf16>
    %cst_75 = arith.constant dense<0.000000e+00> : vector<256x128xf32>
    %66 = tpu.matmul %63, %65, %cst_75 {dimension_numbers = #tpu.dot_dimension_numbers<[1], [0], [0], [1], [0, 0, 1, 1], [], []>} : vector<256x128xbf16>, vector<128x128xbf16>, vector<256x128xf32> -> vector<256x128xf32>
    %67 = arith.addf %61, %66 : vector<256x128xf32>
    %c2_76 = arith.constant 2 : index
    %c2_77 = arith.constant 2 : index
    %c0_78 = arith.constant 0 : index
    %68 = vector.load %arg9[%c2_76, %c2_77, %c0_78] : memref<18x24x128xbf16, #tpu.memory_space<vmem>>, vector<16x16x128xbf16>
    %69 = vector.shape_cast %68 : vector<16x16x128xbf16> to vector<256x128xbf16>
    %c8 = arith.constant 8 : index
    %c0_79 = arith.constant 0 : index
    %c0_80 = arith.constant 0 : index
    %70 = vector.load %arg4[%c8, %c0_79, %c0_80] : memref<9x128x128xbf16, #tpu.memory_space<vmem>>, vector<1x128x128xbf16>
    %71 = vector.shape_cast %70 : vector<1x128x128xbf16> to vector<128x128xbf16>
    %cst_81 = arith.constant dense<0.000000e+00> : vector<256x128xf32>
    %72 = tpu.matmul %69, %71, %cst_81 {dimension_numbers = #tpu.dot_dimension_numbers<[1], [0], [0], [1], [0, 0, 1, 1], [], []>} : vector<256x128xbf16>, vector<128x128xbf16>, vector<256x128xf32> -> vector<256x128xf32>
    %73 = arith.addf %67, %72 : vector<256x128xf32>
    %74 = vector.broadcast %7 : vector<1x128xf32> to vector<256x128xf32>
    %75 = arith.addf %73, %74 : vector<256x128xf32>
    %cst_82 = arith.constant 0.000000e+00 : f32
    %76 = vector.broadcast %cst_82 : f32 to vector<256x128xf32>
    %77 = arith.maximumf %75, %76 : vector<256x128xf32>
    %78 = arith.truncf %77 : vector<256x128xf32> to vector<256x128xbf16>
    %c0_83 = arith.constant 0 : index
    %c0_84 = arith.constant 0 : index
    %79 = vector.load %arg6[%c0_83, %c0_84] : memref<128x128xbf16, #tpu.memory_space<vmem>>, vector<128x128xbf16>
    %cst_85 = arith.constant dense<0.000000e+00> : vector<256x128xf32>
    %80 = tpu.matmul %78, %79, %cst_85 {dimension_numbers = #tpu.dot_dimension_numbers<[1], [0], [0], [1], [0, 0, 1, 1], [], []>} : vector<256x128xbf16>, vector<128x128xbf16>, vector<256x128xf32> -> vector<256x128xf32>
    %81 = arith.extf %11 : vector<256x128xbf16> to vector<256x128xf32>
    %82 = vector.broadcast %8 : vector<1x128xf32> to vector<256x128xf32>
    %83 = arith.addf %80, %82 : vector<256x128xf32>
    %84 = arith.addf %83, %81 : vector<256x128xf32>
    %cst_86 = arith.constant 0.000000e+00 : f32
    %85 = vector.broadcast %cst_86 : f32 to vector<256x128xf32>
    %86 = arith.maximumf %84, %85 : vector<256x128xf32>
    %87 = vector.shape_cast %86 : vector<256x128xf32> to vector<16x16x128xf32>
    %88 = arith.truncf %87 : vector<16x16x128xf32> to vector<16x16x128xbf16>
    %c0_87 = arith.constant 0 : index
    %c0_88 = arith.constant 0 : index
    %c0_89 = arith.constant 0 : index
    %c0_90 = arith.constant 0 : index
    %89 = vector.load %arg8[%c0_87, %c0_88, %c0_89, %c0_90] : memref<1x16x16x128xbf16, #tpu.memory_space<vmem>>, vector<1x16x16x128xbf16>
    %90 = vector.shape_cast %89 : vector<1x16x16x128xbf16> to vector<16x16x128xbf16>
    %91 = vector.shape_cast %88 : vector<16x16x128xbf16> to vector<1x16x16x128xbf16>
    tpu.vector_store %arg8[%c0_87, %c0_88, %c0_89, %c0_90], %91 {strides = array<i32>} : memref<1x16x16x128xbf16, #tpu.memory_space<vmem>>, vector<1x16x16x128xbf16>,
    return
  }
  func.func @transform_0(%arg0: i32) -> (i32, i32, i32, i32) {
    %c0_i32 = arith.constant 0 : i32
    %c0_i32_0 = arith.constant 0 : i32
    %c0_i32_1 = arith.constant 0 : i32
    %c0_i32_2 = arith.constant 0 : i32
    return %arg0, %c0_i32, %c0_i32_0, %c0_i32_1 : i32, i32, i32, i32
  }
  func.func @transform_1(%arg0: i32) -> (i32, i32) {
    %c0_i32 = arith.constant 0 : i32
    %c0_i32_0 = arith.constant 0 : i32
    %c0_i32_1 = arith.constant 0 : i32
    return %c0_i32, %c0_i32_0 : i32, i32
  }
  func.func @transform_2(%arg0: i32) -> (i32, i32) {
    %c0_i32 = arith.constant 0 : i32
    %c0_i32_0 = arith.constant 0 : i32
    %c0_i32_1 = arith.constant 0 : i32
    return %c0_i32, %c0_i32_0 : i32, i32
  }
  func.func @transform_3(%arg0: i32) -> (i32, i32, i32) {
    %c0_i32 = arith.constant 0 : i32
    %c0_i32_0 = arith.constant 0 : i32
    %c0_i32_1 = arith.constant 0 : i32
    %c0_i32_2 = arith.constant 0 : i32
    return %c0_i32, %c0_i32_0, %c0_i32_1 : i32, i32, i32
  }
  func.func @transform_4(%arg0: i32) -> (i32, i32) {
    %c0_i32 = arith.constant 0 : i32
    %c0_i32_0 = arith.constant 0 : i32
    %c0_i32_1 = arith.constant 0 : i32
    return %c0_i32, %c0_i32_0 : i32, i32
  }
  func.func @transform_5(%arg0: i32) -> (i32, i32) {
    %c0_i32 = arith.constant 0 : i32
    %c0_i32_0 = arith.constant 0 : i32
    %c0_i32_1 = arith.constant 0 : i32
    return %c0_i32, %c0_i32_0 : i32, i32
  }
  func.func @transform_6(%arg0: i32) -> (i32, i32) {
    %c0_i32 = arith.constant 0 : i32
    %c0_i32_0 = arith.constant 0 : i32
    %c0_i32_1 = arith.constant 0 : i32
    return %c0_i32, %c0_i32_0 : i32, i32
  }
  func.func @transform_7(%arg0: i32) -> (i32, i32, i32, i32) {
    %c0_i32 = arith.constant 0 : i32
    %c0_i32_0 = arith.constant 0 : i32
    %c0_i32_1 = arith.constant 0 : i32
    %c0_i32_2 = arith.constant 0 : i32
    return %arg0, %c0_i32, %c0_i32_0, %c0_i32_1 : i32, i32, i32, i32
  }
}

</mosaic_0001>

<bundles_post_ra>
// kernel: tpu_custom_call.1
= control target key start
LH: loop header
LB: loop body
LE: loop exit
PB: predicated region body
PF: predicated region fallthrough
CT: control target
= control target key end

     0   :  { %s11223_s0 = inlined_call_operand.hbm [shape: bf16[2,16,16,128], index: 0, kind: input, shape index: {}]   ;;  %s11224_s1 = inlined_call_operand.hbm [shape: bf16[128,128], index: 1, kind: input, shape index: {}]   ;;  %s11225_s2 = inlined_call_operand.vmem [shape: f32[1,128], index: 2, kind: input, shape index: {}]   ;;  %s11226_s3 = inlined_call_operand.hbm [shape: bf16[9,128,128], index: 3, kind: input, shape index: {}]   ;;  %s11227_s4 = inlined_call_operand.vmem [shape: f32[1,128], index: 4, kind: input, shape index: {}]   ;;  %s11228_s5 = inlined_call_operand.hbm [shape: bf16[128,128], index: 5, kind: input, shape index: {}]   ;;  %s11229_s6 = inlined_call_operand.vmem [shape: f32[1,128], index: 6, kind: input, shape index: {}]   ;;  %s11230_s7 = inlined_call_operand.hbm [shape: bf16[2,16,16,128], index: 7, kind: output, shape index: {}]  }
   0x1   :  { %11245 = sst [smem:[#allocation49_spill]] %s11224_s1 }
   0x2   :  { %12 = vsyncpa [#allocation4], 0 }
   0x3   :  { %14 = vsyncpa [#allocation4 + $0x1], 0 }
   0x4   :  { %15 = vsyncpa [#allocation7], 0 }
   0x5   :  { %16 = vsyncpa [#allocation10], 0 }
   0x6   :  { %17 = vsyncpa [#allocation5], 0 }
   0x7   :  { %19 = vsyncpa [#allocation5 + $0x1], 0  ;;  %s8669_s24 = smov 0   ;;  %s8671_s25 = smov 0  }
   0x8   :  { %s8673_s26 = smov 0   ;;  %s8675_s27 = smov 0  }
   0x9 LB: > { %s8690_s28 = sadd.s32 4294967295, %s8617_s27   ;;  %s6813_s29 = sadd.s32 4294967294, %s8617_s27   ;;  %s8617_s27 = sphi %s8675_s27, %s11405_s27   ;;  %s8613_s26 = sphi %s8673_s26, %s11404_s26   ;;  %s8609_s25 = sphi %s8671_s25, %s11403_s25   ;;  %s8605_s24 = sphi %s8669_s24, %s11402_s24  }
   0xa   : > { %p45_p0 = scmp.ne.s32.totalorder %s8609_s25, %s8605_s24  ;;  %p11231_p1 = scmp.eq.s32.totalorder %s8690_s28, 0 }
   0xb   : > { %p195_p2 = scmp.eq.s32.totalorder %s8690_s28, 1  ;;  %p201_p3 = scmp.eq.s32.totalorder %s6813_s29, 1 }
   0xc   : > { %p8699_p4 = por %p11231_p1, %p45_p0  ;;  %p6814_p5 = scmp.ge.s32.totalorder %s8617_s27, 1 }
   0xd   : > { %p8704_p6 = por %p201_p3, %p45_p0  ;;  %p208_p7 = scmp.lt.s32.totalorder %s8617_s27, 3 }
   0xe   : > { %s11246_s30 = scalar_select %p8699_p4, 1, 0 }
   0xf   : > { %s11247_s8 = scalar_select %p8704_p6, 1, 0 }
  0x10   : > { %p8709_p8 = pnand %p6814_p5, %p208_p7  ;;  %s8619_s10 = smov [#allocation6]  }
  0x11   : > { %s220_s11 = sshll.u32 %s8619_s10, 4  ;;  %s8620_s13 = smov [#allocation8]   ;;  %s221_s11 = int_to_ptr.vmem [resolvable:$true] %s220_s11 }
  0x12   : > { %s11248_s9 = scalar_select %p8709_p8, 1, 0 }
  0x13   : > { %p8181_p9 = pneg %p8709_p8  ;;  %s236_s14 = sshll.u32 %s8620_s13, 4  ;;  %s237_s14 = int_to_ptr.vmem [resolvable:$true] %s236_s14 }
  0x14   : > { %s8621_s15 = smov [#allocation9]   ;;  %s8450_s17 = scalar_lea.vmem %s221_s11, 1024 }
  0x15   : > { %p8718_p11 = pnand %p8181_p9, %p11231_p1  ;;  %s252_s16 = sshll.u32 %s8621_s15, 4  ;;  %s253_s16 = int_to_ptr.vmem [resolvable:$true] %s252_s16 }
  0x16   : > { %p8451_p13 = scmp.ne.s32.totalorder %s221_s11, %s8450_s17  ;;  %p8458_p5 = scmp.lt.s32.totalorder %s221_s11, %s221_s11 }
  0x17   : > { %p8441_p12 = pneg %p8718_p11  ;;  %p8459_p7 = scmp.lt.s32.totalorder %s8450_s17, %s8450_s17 }
  0x19   : > { %p8453_p0 = pnand %p8451_p13, %p8441_p12  ;;  %p8460_p9 = por %p8459_p7, %p8458_p5 }
  0x1b   : > { %p8454_p3 = pneg %p8453_p0 }
  0x1d   : > { %p8461_p10 = pnand %p8460_p9, %p8454_p3 }
  0x1f   : > { %8464 = shalt.err (!%p8461_p10)
}
  0x20   : > { %s11232_s18 = smov 64   ;;  %s11233_s19 = smov 4  }
  0x21   : > { %s11250_s1 = sld [smem:[#allocation49_spill]]  ;;  %s8476_s22 = scalar_lea.vmem %s237_s14, 9216 }
  0x22   : > { %p8477_p13 = scmp.ne.s32.totalorder %s237_s14, %s8476_s22  ;;  %p8484_p3 = scmp.lt.s32.totalorder %s237_s14, %s237_s14 }
  0x23   : > { %p8485_p10 = scmp.lt.s32.totalorder %s8476_s22, %s8476_s22 }
  0x24   : > { %p8479_p0 = pnand %p8477_p13, %p8441_p12 }
  0x25   : > { %p8486_p7 = por %p8485_p10, %p8484_p3 }
  0x26   : > { %p8480_p5 = pneg %p8479_p0 }
  0x27   : > { %8184 = dma.hbm_to_vmem [thread:$0]  (!%p8718_p11), %s11250_s1, 1024, %s221_s11, [#allocation7], %s11232_s18, %s11232_s18, %s11233_s19  }
  0x28   : > { %p8487_p9 = pnand %p8486_p7, %p8480_p5 }
  0x2a   : > { %8490 = shalt.err (!%p8487_p9)
}
  0x2b   : > { %8187 = dma.hbm_to_vmem [thread:$0]  (!%p8718_p11), %s11226_s3, 9216, %s237_s14, [#allocation7], %s11232_s18, %s11232_s18, %s11233_s19  }
  0x2c   : > { %s8502_s10 = scalar_lea.vmem %s253_s16, 1024  ;;  %p8510_p3 = scmp.lt.s32.totalorder %s253_s16, %s253_s16 }
  0x2d   : > { %p8503_p1 = scmp.ne.s32.totalorder %s253_s16, %s8502_s10  ;;  %p8511_p5 = scmp.lt.s32.totalorder %s8502_s10, %s8502_s10 }
  0x2f   : > { %p8505_p13 = pnand %p8503_p1, %p8441_p12  ;;  %p8512_p10 = por %p8511_p5, %p8510_p3 }
  0x31   : > { %p8506_p0 = pneg %p8505_p13 }
  0x33   : > { %p8513_p7 = pnand %p8512_p10, %p8506_p0 }
  0x35   : > { %8516 = shalt.err (!%p8513_p7)
}
  0x36   : > { %8190 = dma.hbm_to_vmem [thread:$0]  (!%p8718_p11), %s11228_s5, 1024, %s253_s16, [#allocation10], %s11232_s18, %s11232_s18, %s11233_s19  }
  0x37   : > { %s8758_s14 = sadd.s32 1, %s8617_s27   ;;  %s32_s15 = sadd.s32 1, %s8613_s26 }
  0x38   : > { %s29_s12 = ssub.s32 %s8617_s27, %s8758_s14  ;;  %p39_p12 = scmp.ne.s32.totalorder %s8613_s26, %s8609_s25 }
  0x39   : > { %p30_p1 = scmp.eq.s32.totalorder %s29_s12, 0  ;;  %p40_p9 = scmp.eq.s32.totalorder %s8617_s27, 0 }
  0x3a   : > { %p8202_p13 = scmp.lt.s32.totalorder %s8617_s27, 2  ;;  %p8772_p3 = por %p195_p2, %p39_p12 }
  0x3b   : > { %s8768_s17 = scalar_select %p30_p1, %s8613_s26, %s32_s15  }
  0x3c   : > { %p41_p0 = por %p40_p9, %p39_p12  ;;  %s269_s21 = sand.u32 1, %s8613_s26  }
  0x3d   : > { %s11251_s20 = scalar_select %p8772_p3, 1, 0 }
  0x3e   : > { %s7196_s22 = sshll.u32 %s8617_s27, 11  ;;  %s6819_s16 = sshll.u32 %s269_s21, 7 }
  0x3f   : > { %s8781_s10 = scalar_lea.hbm %s11223_s0, %s7196_s22  ;;  %s273_s11 = scalar_lea.vmem [#allocation3], %s6819_s16 }
  0x40   : > { %s280_s13 = sshll.u32 %s273_s11, 4  ;;  %p8783_p11 = pnand %p8202_p13, %p41_p0  ;;  %s8787_s13 = int_to_ptr.vmem [resolvable:$true] %s280_s13 }
  0x41   : > { %s8789_s15 = scalar_lea.sflag [#allocation4], %s269_s21  ;;  %s8517_s18 = scalar_lea.hbm %s8781_s10, 2048 }
  0x42   : > { %p8518_p2 = scmp.ne.s32.totalorder %s8781_s10, %s8517_s18  ;;  %p8519_p5 = pneg %p8783_p11 }
  0x43   : > { %s8522_s16 = scalar_lea.hbm %s11223_s0, 4096  ;;  %p8523_p1 = scmp.lt.s32.totalorder %s8781_s10, %s11223_s0 }
  0x44   : > { %p8520_p10 = pnand %p8519_p5, %p8518_p2  ;;  %p8524_p12 = scmp.lt.s32.totalorder %s8522_s16, %s8517_s18 }
  0x46   : > { %p8521_p7 = pneg %p8520_p10  ;;  %p8525_p9 = por %p8524_p12, %p8523_p1 }
  0x48   : > { %p8526_p13 = pnand %p8525_p9, %p8521_p7 }
  0x4a   : > { %8529 = shalt.err (!%p8526_p13)
}
  0x4b   : > { %s8530_s21 = scalar_lea.vmem %s8787_s13, 2048  ;;  %s8624_s19 = smov [#allocation3]  }
  0x4c   : > { %p8531_p0 = scmp.ne.s32.totalorder %s8787_s13, %s8530_s21  ;;  %s8535_s1 = sshll.u32 %s8624_s19, 4  ;;  %s8536_s1 = int_to_ptr.vmem [resolvable:$false] %s8535_s1 }
  0x4d   : > { %s8537_s22 = scalar_lea.vmem %s8536_s1, 4096  ;;  %p8538_p10 = scmp.lt.s32.totalorder %s8787_s13, %s8536_s1 }
  0x4e   : > { %p8533_p6 = pnand %p8531_p0, %p8519_p5  ;;  %p8539_p3 = scmp.lt.s32.totalorder %s8537_s22, %s8530_s21 }
  0x50   : > { %p8534_p2 = pneg %p8533_p6  ;;  %p8540_p4 = por %p8539_p3, %p8538_p10 }
  0x52   : > { %p8541_p8 = pnand %p8540_p4, %p8534_p2 }
  0x54   : > { %8544 = shalt.err (!%p8541_p8)
}
  0x55   : > { %s11253_s18 = smov 4   ;;  %s11254_s23 = smov 64  }
  0x56   : > { %8194 = dma.hbm_to_vmem [thread:$0]  (!%p8783_p11), %s8781_s10, 2048, %s8787_s13, %s8789_s15, %s11254_s23, %s11254_s23, %s11253_s18  }
  0x57   : > { %p11255_p6 = scmp.ne.s32.totalorder %s11248_s9, 0 }
  0x59   : > { %292 = sbr.rel (%p11255_p6) target bundleno = 1172 (0x494), region = 48 }
  0x5e   : > { %s8816_s19 = sand.u32 1, %s8609_s25   ;;  %p11256_p4 = scmp.ne.s32.totalorder %s11246_s30, 0 }
  0x5f   : > { %s6823_s1 = sshll.u32 %s8816_s19, 7  ;;  %s295_s16 = scalar_lea.sflag [#allocation4], %s8816_s19 }
  0x60   : > { %s8822_s12 = scalar_lea.vmem [#allocation3], %s6823_s1 }
  0x61   : > { %8588 = dma.done.wait (%p11256_p4), %s295_s16, 2048  }
  0x62   : > { %8590 = vsyncadd (%p11256_p4), %s295_s16, 4294965248  ;;  %p11257_p8 = scmp.eq.s32.totalorder %s8690_s28, 0 }
  0x64   : > { %8592 = dma.done.wait (%p11257_p8), [#allocation7], 10240   ;;  %p11258_p3 = pmov %p11257_p8 }
  0x66   : > { %8594 = vsyncadd (%p11258_p3), [#allocation7], 4294957056  ;;  %p11259_p11 = pmov %p11258_p3 }
  0x67   : > { %p11260_p5 = pmov %p11258_p3 }
  0x68   : > { %8596 = dma.done.wait (%p11259_p11), [#allocation10], 1024  }
  0x69   : > { %8598 = vsyncadd (%p11260_p5), [#allocation10], 4294966272  ;;  %v8625_v0 = vmov 0   ;;  %v8247_v1 = vld [vmem:[#allocation6 + $0x38] sm:$0xff]   ;;  %v8248_v2 = vld [vmem:[#allocation6 + $0x30] sm:$0xff]   ;;  %vm1199_vm3 = vcmask 1043456  }
  0x6a   : > { %351 = vst [vmem:[#allocation2 + $0x18] sm:$0xf] %v8625_v0  ;;  %342 = vst [vmem:[#allocation2] sm:$0xf] %v8625_v0  ;;  %7621 = vmatprep.subr.bf16.mxu0 %v8247_v1  ;;  %8149 = vmatprep.subr.bf16.mxu1 %v8247_v1  ;;  %v8249_v3 = vld [vmem:[#allocation6 + $0x28] sm:$0xff]   ;;  %v8250_v4 = vld [vmem:[#allocation6 + $0x20] sm:$0xff]  }
  0x6b   : > { %343 = vst [vmem:[#allocation2 + $0x4] sm:$0xf] %v8625_v0  ;;  %344 = vst [vmem:[#allocation2 + $0x8] sm:$0xf] %v8625_v0  ;;  %7622 = vmatpush3.bf16.msra.mxu0 %v8247_v1  ;;  %8157 = vmatpush3.bf16.msra.mxu1 %v8247_v1  ;;  %v388_v5 = vld [vmem:[%s8822_s12] sm:$0xff]   ;;  %v8251_v7 = vld [vmem:[#allocation6 + $0x18] sm:$0xff]  }
  0x6c   : > { %346 = vst [vmem:[#allocation2 + $0xcc] sm:$0xf] %v8625_v0  ;;  %347 = vst [vmem:[#allocation2 + $0xd0] sm:$0xf] %v8625_v0  ;;  %7623 = vmatprep.subr.bf16.mxu0 %v8248_v2  ;;  %8150 = vmatprep.subr.bf16.mxu1 %v8248_v2  ;;  %v404_v6 = vld [vmem:[%s8822_s12 + $0x40] sm:$0xff]   ;;  %v8252_v8 = vld [vmem:[#allocation6 + $0x10] sm:$0xff]  }
  0x6d   : > { %348 = vst [vmem:[#allocation2 + $0xd4] sm:$0xf] %v8625_v0  ;;  %350 = vst [vmem:[#allocation2 + $0xc] sm:$0xf] %v8625_v0  ;;  %7637 = vmatprep.mubr.bf16.mxu0 %v388_v5  ;;  %7653 = vmatprep.mubr.bf16.mxu1 %v404_v6  ;;  %v8253_v9 = vld [vmem:[#allocation6 + $0x8] sm:$0xff]   ;;  %v8254_v10 = vld [vmem:[#allocation6] sm:$0xff]  }
  0x6e   : > { %352 = vst [vmem:[#allocation2 + $0x24] sm:$0xf] %v8625_v0  ;;  %353 = vst [vmem:[#allocation2 + $0x30] sm:$0xf] %v8625_v0  ;;  %v390_v11 = vld [vmem:[%s8822_s12 + $0x8] sm:$0xff]   ;;  %v392_v13 = vld [vmem:[%s8822_s12 + $0x10] sm:$0xff]  }
  0x6f   : > { %354 = vst [vmem:[#allocation2 + $0x3c] sm:$0xf] %v8625_v0  ;;  %355 = vst [vmem:[#allocation2 + $0x48] sm:$0xf] %v8625_v0  ;;  %7624 = vmatpush3.bf16.msra.mxu0 %v8248_v2  ;;  %8158 = vmatpush3.bf16.msra.mxu1 %v8248_v2  ;;  %v406_v12 = vld [vmem:[%s8822_s12 + $0x48] sm:$0xff]   ;;  %v408_v14 = vld [vmem:[%s8822_s12 + $0x50] sm:$0xff]  }
  0x70   : > { %356 = vst [vmem:[#allocation2 + $0x54] sm:$0xf] %v8625_v0  ;;  %357 = vst [vmem:[#allocation2 + $0x60] sm:$0xf] %v8625_v0  ;;  %7625 = vmatprep.subr.bf16.mxu0 %v8249_v3  ;;  %8151 = vmatprep.subr.bf16.mxu1 %v8249_v3  ;;  %v8271_v15 = vld [vmem:[#allocation8 + $0x38] sm:$0xff]   ;;  %v396_v18 = vld [vmem:[%s8822_s12 + $0x20] sm:$0xff]  }
  0x71   : > { %358 = vst [vmem:[#allocation2 + $0x6c] sm:$0xf] %v8625_v0  ;;  %359 = vst [vmem:[#allocation2 + $0x78] sm:$0xf] %v8625_v0  ;;  %v394_v16 = vld [vmem:[%s8822_s12 + $0x18] sm:$0xff]   ;;  %v412_v19 = vld [vmem:[%s8822_s12 + $0x60] sm:$0xff]  }
  0x72   : > { %360 = vst [vmem:[#allocation2 + $0x84] sm:$0xf] %v8625_v0  ;;  %361 = vst [vmem:[#allocation2 + $0x90] sm:$0xf] %v8625_v0  ;;  %v410_v17 = vld [vmem:[%s8822_s12 + $0x58] sm:$0xff]   ;;  %v398_v20 = vld [vmem:[%s8822_s12 + $0x28] sm:$0xff]  }
  0x73   : > { %362 = vst [vmem:[#allocation2 + $0x9c] sm:$0xf] %v8625_v0  ;;  %363 = vst [vmem:[#allocation2 + $0xa8] sm:$0xf] %v8625_v0  ;;  %7626 = vmatpush3.bf16.msra.mxu0 %v8249_v3  ;;  %8159 = vmatpush3.bf16.msra.mxu1 %v8249_v3  ;;  %v414_v21 = vld [vmem:[%s8822_s12 + $0x68] sm:$0xff]   ;;  %v400_v22 = vld [vmem:[%s8822_s12 + $0x30] sm:$0xff]  }
  0x74   : > { %364 = vst [vmem:[#allocation2 + $0xb4] sm:$0xf] %v8625_v0  ;;  %365 = vst [vmem:[#allocation2 + $0xc0] sm:$0xf] %v8625_v0  ;;  %7627 = vmatprep.subr.bf16.mxu0 %v8250_v4  ;;  %8152 = vmatprep.subr.bf16.mxu1 %v8250_v4  ;;  %v416_v23 = vld [vmem:[%s8822_s12 + $0x70] sm:$0xff]   ;;  %v402_v24 = vld [vmem:[%s8822_s12 + $0x38] sm:$0xff]  }
  0x75   : > { %368 = vst [vmem:[#allocation2 + $0x14] sm:$0xf] %v8625_v0  ;;  %369 = vst [vmem:[#allocation2 + $0x20] sm:$0xf] %v8625_v0  ;;  %v418_v25 = vld [vmem:[%s8822_s12 + $0x78] sm:$0xff]   ;;  %v8272_v26 = vld [vmem:[#allocation8 + $0x30] sm:$0xff]  }
  0x76   : > { %370 = vst [vmem:[#allocation2 + $0x2c] sm:$0xf] %v8625_v0  ;;  %371 = vst [vmem:[#allocation2 + $0x38] sm:$0xf] %v8625_v0  ;;  %v8274_v27 = vld [vmem:[#allocation8 + $0x28] sm:$0xff]   ;;  %v8273_v28 = vld [vmem:[#allocation8 + $0x78] sm:$0xff]  }
  0x77   : > { %372 = vst [vmem:[#allocation2 + $0x44] sm:$0xf] %v8625_v0  ;;  %373 = vst [vmem:[#allocation2 + $0x50] sm:$0xf] %v8625_v0  ;;  %7628 = vmatpush3.bf16.msra.mxu0 %v8250_v4  ;;  %8160 = vmatpush3.bf16.msra.mxu1 %v8250_v4  ;;  %v8276_v29 = vld [vmem:[#allocation8 + $0x20] sm:$0xff]   ;;  %v8275_v30 = vld [vmem:[#allocation8 + $0x70] sm:$0xff]  }
  0x78   : > { %374 = vst [vmem:[#allocation2 + $0x5c] sm:$0xf] %v8625_v0  ;;  %375 = vst [vmem:[#allocation2 + $0x68] sm:$0xf] %v8625_v0  ;;  %7629 = vmatprep.subr.bf16.mxu0 %v8251_v7  ;;  %8153 = vmatprep.subr.bf16.mxu1 %v8251_v7  ;;  %v8278_v31 = vld [vmem:[#allocation8 + $0x18] sm:$0xff]   ;;  %v8277_v32 = vld [vmem:[#allocation8 + $0x68] sm:$0xff]  }
  0x79   : > { %376 = vst [vmem:[#allocation2 + $0x74] sm:$0xf] %v8625_v0  ;;  %377 = vst [vmem:[#allocation2 + $0x80] sm:$0xf] %v8625_v0  ;;  %v8280_v33 = vld [vmem:[#allocation8 + $0x10] sm:$0xff]   ;;  %v8279_v34 = vld [vmem:[#allocation8 + $0x60] sm:$0xff]  }
  0x7a   : > { %378 = vst [vmem:[#allocation2 + $0x8c] sm:$0xf] %v8625_v0  ;;  %379 = vst [vmem:[#allocation2 + $0x98] sm:$0xf] %v8625_v0  ;;  %v8282_v35 = vld [vmem:[#allocation8 + $0x8] sm:$0xff]   ;;  %v8281_v36 = vld [vmem:[#allocation8 + $0x58] sm:$0xff]  }
  0x7b   : > { %380 = vst [vmem:[#allocation2 + $0xa4] sm:$0xf] %v8625_v0  ;;  %381 = vst [vmem:[#allocation2 + $0xb0] sm:$0xf] %v8625_v0  ;;  %7630 = vmatpush3.bf16.msra.mxu0 %v8251_v7  ;;  %8161 = vmatpush3.bf16.msra.mxu1 %v8251_v7  ;;  %v8284_v37 = vld [vmem:[#allocation8] sm:$0xff]   ;;  %v8283_v38 = vld [vmem:[#allocation8 + $0x50] sm:$0xff]  }
  0x7c   : > { %382 = vst [vmem:[#allocation2 + $0xbc] sm:$0xf] %v8625_v0  ;;  %383 = vst [vmem:[#allocation2 + $0xc8] sm:$0xf] %v8625_v0  ;;  %7631 = vmatprep.subr.bf16.mxu0 %v8252_v8  ;;  %8154 = vmatprep.subr.bf16.mxu1 %v8252_v8  ;;  %v1317_v40 = vld [vmem:[#allocation2 + $0x4] sm:$0xf] }
  0x7d   : > { %349 = vst [vmem:[#allocation2] sm:$0xf] %v8625_v0  ;;  %366 = vst [vmem:[#allocation2 + $0xcc] sm:$0xf] %v8625_v0  ;;  %v8286_v42 = vld [vmem:[#allocation8 + $0x48] sm:$0xff]   ;;  %v1397_v45 = vshrl.u32 %v1317_v40, 16 }
  0x7e   : > { %367 = vst [vmem:[#allocation2 + $0x8] sm:$0xf] %v8625_v0  ;;  %384 = vst [vmem:[#allocation2 + $0xd4] sm:$0xf] %v8625_v0  ;;  %v1393_v48 = vshll.u32 %v1317_v40, 16  ;;  %v8289_v55 = vld [vmem:[#allocation8 + $0x40] sm:$0xff]  }
  0x7f   : > { %7632 = vmatpush3.bf16.msra.mxu0 %v8252_v8  ;;  %8162 = vmatpush3.bf16.msra.mxu1 %v8252_v8  ;;  %v1399_v50 = vrot.slane %v1397_v45, 4  ;;  %vm1380_vm0 = vsmask.f32 3328  ;;  %vm1381_vm1 = vsmask.f32 7440  ;;  %v8860_v63 = vld [vmem:[#allocation8 + $0xb8] sm:$0xff]  }
  0x80   : > { %7633 = vmatprep.subr.bf16.mxu0 %v8253_v9  ;;  %8155 = vmatprep.subr.bf16.mxu1 %v8253_v9  ;;  %v1395_v49 = vrot.slane %v1393_v48, 5  ;;  %vm8852_vm2 = vmor %vm1380_vm0, %vm1381_vm1  ;;  %v8863_v0 = vld [vmem:[#allocation8 + $0xf8] sm:$0xff]   ;;  %v8869_v1 = vld [vmem:[%s11225_s2] ss:$0 sm:$0xff]  ;;  %vm1200_vm4 = vsmask.f32 7938 }
  0x81   : > { %vm875_vm5 = vsmask.f32 256  ;;  %vm876_vm6 = vsmask.f32 4368  ;;  %vm1206_vm7 = vcmask 1040384   ;;  %vm8888_vm8 = vmand %vm1199_vm3, %vm1200_vm4  ;;  %vm2410_vm11 = vcmask 1042432  }
  0x82   : > { %v1400_v53 = vor.u32 %v1399_v50, %v1395_v49  ;;  %v1202_v45 = vld [vmem:[#allocation2 + $0xc] sm:$0xf]  ;;  %vm8901_vm9 = vmor %vm875_vm5, %vm876_vm6  ;;  %vm2411_vm12 = vcmask 1046532   ;;  %s11117_s22 = scalar_lea.vmem [#allocation11], %s6823_s1  ;;  %s7261_s18 = sshll.u32 %s8690_s28, 11 }
  0x83   : > { %7634 = vmatpush3.bf16.msra.mxu0 %v8253_v9  ;;  %8163 = vmatpush3.bf16.msra.mxu1 %v8253_v9  ;;  %vm8907_vm10 = vmand %vm1206_vm7, %vm875_vm5  ;;  %s6711_s23 = sshll.u32 %s11117_s22, 4  ;;  %s6698_s30 = scalar_lea.sflag [#allocation5], %s8816_s19  ;;  %s11178_s23 = int_to_ptr.vmem [resolvable:$true] %s6711_s23 }
  0x84   : > { %7635 = vmatprep.subr.bf16.mxu0 %v8254_v10  ;;  %8156 = vmatprep.subr.bf16.mxu1 %v8254_v10  ;;  %v1316_v39 = vld [vmem:[#allocation2] sm:$0xf]  ;;  %v1401_v57 = vrot.slane %v1400_v53, 4  ;;  %vm9355_vm13 = vmor %vm2410_vm11, %vm2411_vm12  ;;  %s8545_s9 = scalar_lea.vmem %s11178_s23, 2048  ;;  %p11399_p1 = scmp.ne.s32.totalorder %s11251_s20, 0 }
  0x85   : > { %v6909_v41 = vcombine.low %v1316_v39, %v1317_v40  ;;  %v1384_v43 = vshrl.u32 %v1316_v39, 16  ;;  %v1387_v44 = vshll.u32 %v1316_v39, 16  ;;  %v1364_v51 = vld [vmem:[#allocation2 + $0x8] sm:$0x1]  ;;  %p8546_p7 = scmp.ne.s32.totalorder %s11178_s23, %s8545_s9  ;;  %s8626_s28 = smov [#allocation11]  }
  0x86   : > { %v1403_v54 = vshll.u32 %v1364_v51, 16  ;;  %s8549_s10 = sshll.u32 %s8626_s28, 4  ;;  %s8550_s10 = int_to_ptr.vmem [resolvable:$false] %s8549_s10 }
  0x87   : > { %7636 = vmatpush3.bf16.msra.mxu0 %v8254_v10  ;;  %8164 = vmatpush3.bf16.msra.mxu1 %v8254_v10  ;;  %v1386_v46 = vrot.slane %v1384_v43, 4  ;;  %v1389_v47 = vrot.slane %v1387_v44, 5  ;;  %p8547_p12 = pnand %p8546_p7, %p11399_p1  ;;  %s8551_s13 = scalar_lea.vmem %s8550_s10, 4096 }
  0x88   : > { %7717 = vmatprep.subr.bf16.mxu0 %v8271_v15  ;;  %7669 = vmatprep.subr.bf16.mxu1 %v8273_v28  ;;  %v1405_v58 = vrot.slane %v1403_v54, 5  ;;  %p8552_p13 = scmp.lt.s32.totalorder %s11178_s23, %s8550_s10  ;;  %p8553_p0 = scmp.lt.s32.totalorder %s8551_s13, %s8545_s9 }
  0x89   : > { %v1390_v52 = vor.u32 %v1389_v47, %v1386_v46  ;;  %p8548_p9 = pneg %p8547_p12 }
  0x8a   : > { %7638 = vmatmul.mubr.bf16.vlgmr.msra.gmra.mxu0 %v390_v11  ;;  %7654 = vmatmul.mubr.bf16.vlgmr.msra.gmra.mxu1 %v406_v12  ;;  %v1406_v61 = vsel %vm8852_vm2, %v1401_v57, %v1405_v58  ;;  %v1215_v57 = vld [vmem:[#allocation2 + $0x20] sm:$0x1]  ;;  %p8554_p2 = por %p8553_p0, %p8552_p13 }
  0x8b   : > { %7641 = vmatprep.mubr.bf16.mxu0 %v392_v13  ;;  %7657 = vmatprep.mubr.bf16.mxu1 %v408_v14  ;;  %v1391_v56 = vrot.slane %v1390_v52, 4 }
  0x8c   : > { %7718 = vmatpush3.bf16.msra.mxu0 %v8271_v15  ;;  %7670 = vmatpush3.bf16.msra.mxu1 %v8273_v28  ;;  %p8555_p10 = pnand %p8554_p2, %p8548_p9 }
  0x8d   : > { %7719 = vmatprep.subr.bf16.mxu0 %v8272_v26  ;;  %7671 = vmatprep.subr.bf16.mxu1 %v8275_v30  ;;  %v1396_v60 = vsel %vm8852_vm2, %v1391_v56, %v1395_v49 }
  0x8e   : > { %v6885_v62 = vcombine.low %v1396_v60, %v1406_v61 }
  0x90   : > { %7720 = vmatpush3.bf16.msra.mxu0 %v8272_v26  ;;  %7672 = vmatpush3.bf16.msra.mxu1 %v8275_v30 }
  0x91   : > { %7721 = vmatprep.subr.bf16.mxu0 %v8274_v27  ;;  %7673 = vmatprep.subr.bf16.mxu1 %v8277_v32 }
  0x92   : > { %7642 = vmatmul.mubr.bf16.gmra.mxu0 %v394_v16  ;;  %7658 = vmatmul.mubr.bf16.gmra.mxu1 %v410_v17 }
  0x93   : > { %7645 = vmatprep.mubr.bf16.mxu0 %v396_v18  ;;  %7661 = vmatprep.mubr.bf16.mxu1 %v412_v19 }
  0x94   : > { %7722 = vmatpush3.bf16.msra.mxu0 %v8274_v27  ;;  %7674 = vmatpush3.bf16.msra.mxu1 %v8277_v32 }
  0x95   : > { %7723 = vmatprep.subr.bf16.mxu0 %v8276_v29  ;;  %7675 = vmatprep.subr.bf16.mxu1 %v8279_v34 }
  0x98   : > { %7724 = vmatpush3.bf16.msra.mxu0 %v8276_v29  ;;  %7676 = vmatpush3.bf16.msra.mxu1 %v8279_v34 }
  0x99   : > { %7725 = vmatprep.subr.bf16.mxu0 %v8278_v31  ;;  %7677 = vmatprep.subr.bf16.mxu1 %v8281_v36 }
  0x9a   : > { %7646 = vmatmul.mubr.bf16.gmra.mxu0 %v398_v20  ;;  %7662 = vmatmul.mubr.bf16.gmra.mxu1 %v414_v21 }
  0x9b   : > { %7649 = vmatprep.mubr.bf16.mxu0 %v400_v22  ;;  %7665 = vmatprep.mubr.bf16.mxu1 %v416_v23 }
  0x9c   : > { %7726 = vmatpush3.bf16.msra.mxu0 %v8278_v31  ;;  %7678 = vmatpush3.bf16.msra.mxu1 %v8281_v36 }
  0x9d   : > { %7727 = vmatprep.subr.bf16.mxu0 %v8280_v33  ;;  %7679 = vmatprep.subr.bf16.mxu1 %v8283_v38 }
  0xa0   : > { %7728 = vmatpush3.bf16.msra.mxu0 %v8280_v33  ;;  %7680 = vmatpush3.bf16.msra.mxu1 %v8283_v38 }
  0xa1   : > { %7729 = vmatprep.subr.bf16.mxu0 %v8282_v35  ;;  %7681 = vmatprep.subr.bf16.mxu1 %v8286_v42 }
  0xa2   : > { %7650 = vmatmul.mubr.bf16.gmra.mxu0 %v402_v24  ;;  %7666 = vmatmul.mubr.bf16.gmra.mxu1 %v418_v25 }
  0xa3   : > { %7733 = vmatprep.mubr.bf16.mxu0 %v6909_v41  ;;  %7685 = vmatprep.mubr.bf16.mxu1 %v6885_v62 }
  0xa4   : > { %7730 = vmatpush3.bf16.msra.mxu0 %v8282_v35  ;;  %7682 = vmatpush3.bf16.msra.mxu1 %v8286_v42  ;;  %v1211_v35 = vld [vmem:[#allocation2 + $0x18] sm:$0xf] }
  0xa5   : > { %7731 = vmatprep.subr.bf16.mxu0 %v8284_v37  ;;  %7683 = vmatprep.subr.bf16.mxu1 %v8289_v55 }
  0xa8   : > { %7732 = vmatpush3.bf16.msra.mxu0 %v8284_v37  ;;  %7684 = vmatpush3.bf16.msra.mxu1 %v8289_v55 }
  0xa9   : > { %7765 = vmatprep.subr.bf16.mxu1 %v8860_v63  ;;  %7813 = vmatprep.subr.bf16.mxu0 %v8863_v0 }
 0x14a   : > { %v7639_v2 = vpop.f32.mrf.mxu0  ;;  %v7655_v3 = vpop.f32.mrf.mxu1 }
 0x14b   : > { %v629_v4 = vadd.f32 %v7639_v2, %v8869_v1  ;;  %v693_v5 = vadd.f32 %v7655_v3, %v8869_v1 }
 0x14c   : > { %v620_v6 = vpop.f32.mrf.mxu0  ;;  %v684_v7 = vpop.f32.mrf.mxu1 }
 0x14d   : > { %v749_v8 = vmax.f32 %v629_v4, 0.0  ;;  %v621_v9 = vadd.f32 %v8869_v1, %v620_v6  ;;  %v765_v10 = vmax.f32 %v693_v5, 0.0  ;;  %v685_v11 = vadd.f32 %v8869_v1, %v684_v7 }
 0x14e   : > { %v7640_v12 = vpop.f32.mrf.mxu0  ;;  %v7656_v17 = vpop.f32.mrf.mxu1 }
 0x14f   : > { %v7199_v13 = vpack.c.bf16 %v749_v8, %v749_v8  ;;  %v747_v14 = vmax.f32 %v621_v9, 0.0  ;;  %v632_v15 = vadd.f32 %v7640_v12, %v8869_v1  ;;  %v8876_v16 = vpack.c.bf16 %v765_v10, %v765_v10 }
 0x150   : > { %v623_v18 = vpop.f32.mrf.mxu0  ;;  %v763_v19 = vmax.f32 %v685_v11, 0.0  ;;  %v8879_v20 = vadd.f32 %v7656_v17, %v8869_v1 }
 0x151   : > { %v896_v21 = vshrl.u32 %v7199_v13, 16  ;;  %v899_v22 = vshll.u32 %v7199_v13, 16  ;;  %v7197_v23 = vpack.c.bf16 %v747_v14, %v747_v14  ;;  %v750_v24 = vmax.f32 %v632_v15, 0.0  ;;  %v1208_v14 = vld [vmem:[#allocation2 + $0x14] sm:$0x1] }
 0x152   : > { %v624_v25 = vadd.f32 %v8869_v1, %v623_v18  ;;  %v7643_v26 = vpop.f32.mrf.mxu0  ;;  %v1032_v27 = vshrl.u32 %v8876_v16, 16  ;;  %v1035_v28 = vshll.u32 %v8876_v16, 16  ;;  %v8884_v29 = vpack.c.bf16 %v763_v19, %v763_v19 }
 0x153   : > { %v898_v30 = vrot.slane %v896_v21, 7  ;;  %v879_v31 = vshrl.u32 %v7197_v23, 16  ;;  %v882_v32 = vshll.u32 %v7197_v23, 16  ;;  %v7200_v33 = vpack.c.bf16 %v750_v24, %v750_v24  ;;  %v1225_v24 = vld [vmem:[#allocation2 + $0x30] sm:$0xf] }
 0x154   : > { %v748_v36 = vmax.f32 %v624_v25, 0.0  ;;  %v645_v37 = vadd.f32 %v7643_v26, %v8869_v1  ;;  %v636_v38 = vpop.f32.mrf.mxu0  ;;  %v8893_v39 = vrot.slane %v1032_v27, 7  ;;  %v1015_v40 = vshrl.u32 %v8884_v29, 16 }
 0x155   : > { %v901_v41 = vor.u32 %v899_v22, %v898_v30  ;;  %v902_v42 = vrot.slane %v898_v30, 4  ;;  %v881_v43 = vrot.slane %v879_v31, 7  ;;  %v904_v44 = vshrl.u32 %v7200_v33, 16 }
 0x156   : > { %v907_v46 = vshll.u32 %v7200_v33, 16  ;;  %v7198_v47 = vpack.c.bf16 %v748_v36, %v748_v36  ;;  %v753_v48 = vmax.f32 %v645_v37, 0.0  ;;  %v637_v49 = vadd.f32 %v8869_v1, %v636_v38  ;;  %v7644_v50 = vpop.f32.mrf.mxu0 }
 0x157   : > { %v1212_v51 = vsel %vm8888_vm8, %v901_v41, %v1211_v35  ;;  %v884_v52 = vor.u32 %v882_v32, %v881_v43  ;;  %v885_v53 = vrot.slane %v881_v43, 4  ;;  %v906_v55 = vrot.slane %v904_v44, 7  ;;  %v1218_v44 = vld [vmem:[#allocation2 + $0x24] sm:$0xf] }
 0x158   : > { %1213 = vst [vmem:[#allocation2 + $0x18] sm:$0xf] %v1212_v51  ;;  %v887_v58 = vshrl.u32 %v7198_v47, 16  ;;  %v890_v60 = vshll.u32 %v7198_v47, 16  ;;  %v7203_v61 = vpack.c.bf16 %v753_v48, %v753_v48  ;;  %v751_v62 = vmax.f32 %v637_v49, 0.0  ;;  %v639_v2 = vpop.f32.mrf.mxu0 }
 0x159   : > { %v1203_v3 = vsel %vm8888_vm8, %v884_v52, %v1202_v45  ;;  %v909_v4 = vor.u32 %v907_v46, %v906_v55  ;;  %v911_v5 = vrot.slane %v906_v55, 4  ;;  %v648_v6 = vadd.f32 %v7644_v50, %v8869_v1  ;;  %v1229_v52 = vld [vmem:[#allocation2 + $0x38] sm:$0x1] }
 0x15a   : > { %1204 = vst [vmem:[#allocation2 + $0xc] sm:$0xf] %v1203_v3  ;;  %v889_v7 = vrot.slane %v887_v58, 7  ;;  %v930_v8 = vshrl.u32 %v7203_v61, 16  ;;  %v933_v9 = vshll.u32 %v7203_v61, 16  ;;  %v7201_v10 = vpack.c.bf16 %v751_v62, %v751_v62  ;;  %v7647_v11 = vpop.f32.mrf.mxu0 }
 0x15b   : > { %v910_v12 = vsel %vm8901_vm9, %v902_v42, %v909_v4  ;;  %v1216_v13 = vsel %vm8907_vm10, %v911_v5, %v1215_v57  ;;  %v754_v15 = vmax.f32 %v648_v6, 0.0  ;;  %v640_v17 = vadd.f32 %v8869_v1, %v639_v2  ;;  %v1222_v5 = vld [vmem:[#allocation2 + $0x2c] sm:$0x1] }
 0x15c   : > { %1214 = vst [vmem:[#allocation2 + $0x1c] sm:$0xf] %v910_v12  ;;  %1217 = vst [vmem:[#allocation2 + $0x20] sm:$0x1] %v1216_v13  ;;  %v892_v18 = vor.u32 %v890_v60, %v889_v7  ;;  %v894_v19 = vrot.slane %v889_v7, 4  ;;  %v932_v21 = vrot.slane %v930_v8, 7  ;;  %v652_v23 = vpop.f32.mrf.mxu0  ;;  %v661_v30 = vadd.f32 %v7647_v11, %v8869_v1 }
 0x15d   : > { %v913_v22 = vshrl.u32 %v7201_v10, 16  ;;  %v916_v25 = vshll.u32 %v7201_v10, 16  ;;  %v7204_v26 = vpack.c.bf16 %v754_v15, %v754_v15  ;;  %v752_v27 = vmax.f32 %v640_v17, 0.0 }
 0x15e   : > { %v893_v31 = vsel %vm8901_vm9, %v885_v53, %v892_v18  ;;  %v1209_v32 = vsel %vm8907_vm10, %v894_v19, %v1208_v14  ;;  %v935_v33 = vor.u32 %v933_v9, %v932_v21  ;;  %v936_v35 = vrot.slane %v932_v21, 4  ;;  %v7648_v36 = vpop.f32.mrf.mxu0  ;;  %v1267_v19 = vld [vmem:[#allocation2 + $0x78] sm:$0xf] }
 0x15f   : > { %1205 = vst [vmem:[#allocation2 + $0x10] sm:$0xf] %v893_v31  ;;  %1210 = vst [vmem:[#allocation2 + $0x14] sm:$0x1] %v1209_v32  ;;  %v915_v37 = vrot.slane %v913_v22, 7  ;;  %v938_v38 = vshrl.u32 %v7204_v26, 16  ;;  %v7202_v42 = vpack.c.bf16 %v752_v27, %v752_v27  ;;  %v653_v46 = vadd.f32 %v8869_v1, %v652_v23 }
 0x160   : > { %v941_v41 = vshll.u32 %v7204_v26, 16  ;;  %v1226_v43 = vsel %vm8888_vm8, %v935_v33, %v1225_v24  ;;  %v757_v45 = vmax.f32 %v661_v30, 0.0  ;;  %v664_v47 = vadd.f32 %v7648_v36, %v8869_v1  ;;  %v655_v48 = vpop.f32.mrf.mxu0  ;;  %v1239_v23 = vld [vmem:[#allocation2 + $0x48] sm:$0xf]  ;;  %v1232_v33 = vld [vmem:[#allocation2 + $0x3c] sm:$0xf] }
 0x161   : > { %1227 = vst [vmem:[#allocation2 + $0x30] sm:$0xf] %v1226_v43  ;;  %v918_v49 = vor.u32 %v916_v25, %v915_v37  ;;  %v919_v50 = vrot.slane %v915_v37, 4  ;;  %v940_v51 = vrot.slane %v938_v38, 7  ;;  %v921_v53 = vshrl.u32 %v7202_v42, 16 }
 0x162   : > { %v924_v55 = vshll.u32 %v7202_v42, 16  ;;  %v7207_v57 = vpack.c.bf16 %v757_v45, %v757_v45  ;;  %v755_v58 = vmax.f32 %v653_v46, 0.0  ;;  %v758_v60 = vmax.f32 %v664_v47, 0.0  ;;  %v7651_v4 = vpop.f32.mrf.mxu0  ;;  %v1243_v43 = vld [vmem:[#allocation2 + $0x50] sm:$0x1] }
 0x163   : > { %v1219_v61 = vsel %vm8888_vm8, %v918_v49, %v1218_v44  ;;  %v943_v62 = vor.u32 %v941_v41, %v940_v51  ;;  %v945_v2 = vrot.slane %v940_v51, 4  ;;  %v923_v3 = vrot.slane %v921_v53, 7  ;;  %v1260_v51 = vld [vmem:[#allocation2 + $0x6c] sm:$0xf] }
 0x164   : > { %1220 = vst [vmem:[#allocation2 + $0x24] sm:$0xf] %v1219_v61  ;;  %v964_v6 = vshrl.u32 %v7207_v57, 16  ;;  %v967_v7 = vshll.u32 %v7207_v57, 16  ;;  %v7205_v8 = vpack.c.bf16 %v755_v58, %v755_v58  ;;  %v7208_v9 = vpack.c.bf16 %v758_v60, %v758_v60  ;;  %v668_v26 = vpop.f32.mrf.mxu0 }
 0x165   : > { %v944_v10 = vsel %vm8901_vm9, %v936_v35, %v943_v62  ;;  %v1230_v11 = vsel %vm8907_vm10, %v945_v2, %v1229_v52  ;;  %v926_v12 = vor.u32 %v924_v55, %v923_v3  ;;  %v928_v13 = vrot.slane %v923_v3, 4 }
 0x166   : > { %1228 = vst [vmem:[#allocation2 + $0x34] sm:$0xf] %v944_v10  ;;  %1231 = vst [vmem:[#allocation2 + $0x38] sm:$0x1] %v1230_v11  ;;  %v966_v14 = vrot.slane %v964_v6, 7  ;;  %v947_v15 = vshrl.u32 %v7205_v8, 16  ;;  %v1037_v25 = vor.u32 %v1035_v28, %v8893_v39  ;;  %v656_v37 = vadd.f32 %v8869_v1, %v655_v48  ;;  %v687_v48 = vpop.f32.mrf.mxu1 }
 0x167   : > { %v950_v17 = vshll.u32 %v7205_v8, 16  ;;  %v972_v18 = vshrl.u32 %v7208_v9, 16  ;;  %v927_v21 = vsel %vm8901_vm9, %v919_v50, %v926_v12  ;;  %v1223_v22 = vsel %vm8907_vm10, %v928_v13, %v1222_v5  ;;  %v1236_v12 = vld [vmem:[#allocation2 + $0x44] sm:$0x1] }
 0x168   : > { %v975_v24 = vshll.u32 %v7208_v9, 16  ;;  %1221 = vst [vmem:[#allocation2 + $0x28] sm:$0xf] %v927_v21  ;;  %1224 = vst [vmem:[#allocation2 + $0x2c] sm:$0x1] %v1223_v22  ;;  %v969_v27 = vor.u32 %v967_v7, %v966_v14  ;;  %v970_v30 = vrot.slane %v966_v14, 4  ;;  %v1268_v36 = vsel %vm8888_vm8, %v1037_v25, %v1267_v19  ;;  %v7659_v10 = vpop.f32.mrf.mxu1 }
 0x169   : > { %v8941_v31 = vrot.slane %v947_v15, 7  ;;  %v974_v32 = vrot.slane %v972_v18, 7  ;;  %v1038_v35 = vrot.slane %v8893_v39, 4  ;;  %v8949_v16 = vrot.slane %v1015_v40, 7  ;;  %1269 = vst [vmem:[#allocation2 + $0x78] sm:$0xf] %v1268_v36  ;;  %v7652_v40 = vpop.f32.mrf.mxu0 }
 0x16a   : > { %v1240_v28 = vsel %vm8888_vm8, %v969_v27, %v1239_v23  ;;  %v756_v45 = vmax.f32 %v656_v37, 0.0  ;;  %v1018_v46 = vshll.u32 %v8884_v29, 16  ;;  %v677_v52 = vadd.f32 %v7651_v4, %v8869_v1  ;;  %v1271_v21 = vld [vmem:[#allocation2 + $0x80] sm:$0x1] }
 0x16b   : > { %v952_v38 = vor.u32 %v950_v17, %v8941_v31  ;;  %v953_v41 = vrot.slane %v8941_v31, 4  ;;  %v977_v42 = vor.u32 %v975_v24, %v974_v32  ;;  %1241 = vst [vmem:[#allocation2 + $0x48] sm:$0xf] %v1240_v28  ;;  %v979_v44 = vrot.slane %v974_v32, 4  ;;  %v1253_v28 = vld [vmem:[#allocation2 + $0x60] sm:$0xf] }
 0x16c   : > { %v1021_v47 = vrot.slane %v8949_v16, 4  ;;  %v766_v53 = vmax.f32 %v8879_v20, 0.0  ;;  %v7206_v55 = vpack.c.bf16 %v756_v45, %v756_v45  ;;  %v1020_v57 = vor.u32 %v1018_v46, %v8949_v16 }
 0x16d   : > { %v1233_v49 = vsel %vm8888_vm8, %v952_v38, %v1232_v33  ;;  %v978_v50 = vsel %vm8901_vm9, %v970_v30, %v977_v42  ;;  %v1244_v29 = vsel %vm8907_vm10, %v979_v44, %v1243_v43  ;;  %v669_v58 = vadd.f32 %v8869_v1, %v668_v26  ;;  %v700_v33 = vpop.f32.mrf.mxu1  ;;  %v1246_v42 = vld [vmem:[#allocation2 + $0x54] sm:$0xf]  ;;  %v671_v44 = vpop.f32.mrf.mxu0 }
 0x16e   : > { %1234 = vst [vmem:[#allocation2 + $0x3c] sm:$0xf] %v1233_v49  ;;  %1242 = vst [vmem:[#allocation2 + $0x4c] sm:$0xf] %v978_v50  ;;  %v761_v60 = vmax.f32 %v677_v52, 0.0  ;;  %v7216_v61 = vpack.c.bf16 %v766_v53, %v766_v53  ;;  %v688_v62 = vadd.f32 %v8869_v1, %v687_v48  ;;  %v680_v2 = vadd.f32 %v7652_v40, %v8869_v1 }
 0x16f   : > { %1245 = vst [vmem:[#allocation2 + $0x50] sm:$0x1] %v1244_v29  ;;  %v955_v3 = vshrl.u32 %v7206_v55, 16  ;;  %v958_v4 = vshll.u32 %v7206_v55, 16  ;;  %v1261_v20 = vsel %vm8888_vm8, %v1020_v57, %v1260_v51  ;;  %v759_v5 = vmax.f32 %v669_v58, 0.0  ;;  %v8994_v57 = vpop.f32.mrf.mxu1 }
 0x170   : > { %1262 = vst [vmem:[#allocation2 + $0x6c] sm:$0xf] %v1261_v20  ;;  %v7211_v6 = vpack.c.bf16 %v761_v60, %v761_v60  ;;  %v1040_v7 = vshrl.u32 %v7216_v61, 16  ;;  %v1043_v8 = vshll.u32 %v7216_v61, 16  ;;  %v764_v9 = vmax.f32 %v688_v62, 0.0 }
 0x171   : > { %v957_v11 = vrot.slane %v955_v3, 7  ;;  %v7209_v13 = vpack.c.bf16 %v759_v5, %v759_v5  ;;  %v762_v14 = vmax.f32 %v680_v2, 0.0  ;;  %v709_v15 = vadd.f32 %v7659_v10, %v8869_v1  ;;  %v1264_v51 = vld [vmem:[#allocation2 + $0x74] sm:$0x1]  ;;  %v1318_v55 = vld [vmem:[#allocation2 + $0xc] sm:$0xf] }
 0x172   : > { %v998_v17 = vshrl.u32 %v7211_v6, 16  ;;  %v1001_v18 = vshll.u32 %v7211_v6, 16  ;;  %v1042_v19 = vrot.slane %v1040_v7, 7  ;;  %v7214_v22 = vpack.c.bf16 %v764_v9, %v764_v9  ;;  %v1257_v9 = vld [vmem:[#allocation2 + $0x68] sm:$0x1] }
 0x173   : > { %v960_v23 = vor.u32 %v958_v4, %v957_v11  ;;  %v962_v24 = vrot.slane %v957_v11, 4  ;;  %v981_v25 = vshrl.u32 %v7209_v13, 16  ;;  %v984_v26 = vshll.u32 %v7209_v13, 16 }
 0x174   : > { %v8972_v27 = vrot.slane %v998_v17, 7  ;;  %v1045_v30 = vor.u32 %v1043_v8, %v1042_v19  ;;  %v1047_v31 = vrot.slane %v1042_v19, 4  ;;  %v1023_v32 = vshrl.u32 %v7214_v22, 16 }
 0x175   : > { %v961_v36 = vsel %vm8901_vm9, %v953_v41, %v960_v23  ;;  %v1237_v37 = vsel %vm8907_vm10, %v962_v24, %v1236_v12  ;;  %v8978_v38 = vrot.slane %v981_v25, 7  ;;  %v1026_v43 = vshll.u32 %v7214_v22, 16  ;;  %v9008_v25 = vld [vmem:[#allocation2 + $0x10] sm:$0xf] }
 0x176   : > { %1235 = vst [vmem:[#allocation2 + $0x40] sm:$0xf] %v961_v36  ;;  %1238 = vst [vmem:[#allocation2 + $0x44] sm:$0x1] %v1237_v37  ;;  %v1003_v45 = vor.u32 %v1001_v18, %v8972_v27  ;;  %v1004_v46 = vrot.slane %v8972_v27, 4  ;;  %v1046_v41 = vsel %vm8901_vm9, %v1038_v35, %v1045_v30  ;;  %v1272_v48 = vsel %vm8907_vm10, %v1047_v31, %v1271_v21 }
 0x177   : > { %1270 = vst [vmem:[#allocation2 + $0x7c] sm:$0xf] %v1046_v41  ;;  %1273 = vst [vmem:[#allocation2 + $0x80] sm:$0x1] %v1272_v48  ;;  %v986_v40 = vor.u32 %v984_v26, %v8978_v38  ;;  %v987_v49 = vrot.slane %v8978_v38, 4  ;;  %v1025_v50 = vrot.slane %v1023_v32, 7  ;;  %v7212_v52 = vpack.c.bf16 %v762_v14, %v762_v14  ;;  %v703_v14 = vpop.f32.mrf.mxu1 }
 0x178   : > { %v1254_v53 = vsel %vm8888_vm8, %v1003_v45, %v1253_v28  ;;  %v769_v29 = vmax.f32 %v709_v15, 0.0  ;;  %v672_v39 = vadd.f32 %v8869_v1, %v671_v44  ;;  %v701_v35 = vadd.f32 %v8869_v1, %v700_v33  ;;  %v1281_v18 = vld [vmem:[#allocation2 + $0x90] sm:$0xf]  ;;  %v1250_v30 = vld [vmem:[#allocation2 + $0x5c] sm:$0x1] }
 0x179   : > { %1255 = vst [vmem:[#allocation2 + $0x60] sm:$0xf] %v1254_v53  ;;  %v1247_v58 = vsel %vm8888_vm8, %v986_v40, %v1246_v42  ;;  %v1028_v60 = vor.u32 %v1026_v43, %v1025_v50  ;;  %v1030_v61 = vrot.slane %v1025_v50, 4  ;;  %v1006_v62 = vshrl.u32 %v7212_v52, 16  ;;  %v1274_v32 = vld [vmem:[#allocation2 + $0x84] sm:$0xf]  ;;  %v7663_v44 = vpop.f32.mrf.mxu1 }
 0x17a   : > { %1248 = vst [vmem:[#allocation2 + $0x54] sm:$0xf] %v1247_v58  ;;  %v1009_v2 = vshll.u32 %v7212_v52, 16  ;;  %v7219_v3 = vpack.c.bf16 %v769_v29, %v769_v29  ;;  %v760_v4 = vmax.f32 %v672_v39, 0.0  ;;  %v767_v20 = vmax.f32 %v701_v35, 0.0  ;;  %v8303_v50 = vld [vmem:[#allocation8 + $0xf0] sm:$0xff]  }
 0x17b   : > { %v1029_v5 = vsel %vm8901_vm9, %v1021_v47, %v1028_v60  ;;  %v1265_v6 = vsel %vm8907_vm10, %v1030_v61, %v1264_v51  ;;  %v1008_v7 = vrot.slane %v1006_v62, 7  ;;  %v1408_v8 = vshrl.u32 %v1318_v55, 16  ;;  %v1320_v47 = vld [vmem:[#allocation2 + $0x18] sm:$0xf]  ;;  %v9018_v43 = vld [vmem:[#allocation2 + $0x1c] sm:$0xf] }
 0x17c   : > { %1263 = vst [vmem:[#allocation2 + $0x70] sm:$0xf] %v1029_v5  ;;  %1266 = vst [vmem:[#allocation2 + $0x74] sm:$0x1] %v1265_v6  ;;  %v1066_v10 = vshrl.u32 %v7219_v3, 16  ;;  %v1069_v11 = vshll.u32 %v7219_v3, 16  ;;  %v7210_v12 = vpack.c.bf16 %v760_v4, %v760_v4  ;;  %v7217_v13 = vpack.c.bf16 %v767_v20, %v767_v20  ;;  %v716_v4 = vpop.f32.mrf.mxu1 }
 0x17d   : > { %v1011_v15 = vor.u32 %v1009_v2, %v1008_v7  ;;  %v1013_v17 = vrot.slane %v1008_v7, 4  ;;  %v9004_v16 = vrot.slane %v1408_v8, 4  ;;  %v1411_v19 = vshll.u32 %v1318_v55, 16  ;;  %v1322_v40 = vld [vmem:[#allocation2 + $0x24] sm:$0xf] }
 0x17e   : > { %v9006_v21 = vrot.slane %v1066_v10, 7  ;;  %v989_v22 = vshrl.u32 %v7210_v12, 16  ;;  %v992_v23 = vshll.u32 %v7210_v12, 16  ;;  %v1049_v24 = vshrl.u32 %v7217_v13, 16  ;;  %v9031_v60 = vld [vmem:[#allocation2 + $0x28] sm:$0xf] }
 0x17f   : > { %v1012_v26 = vsel %vm8901_vm9, %v1004_v46, %v1011_v15  ;;  %v1258_v27 = vsel %vm8907_vm10, %v1013_v17, %v1257_v9  ;;  %v1052_v31 = vshll.u32 %v7217_v13, 16  ;;  %v1413_v33 = vrot.slane %v1411_v19, 5  ;;  %v8306_v6 = vld [vmem:[#allocation8 + $0xe8] sm:$0xff]  }
 0x180   : > { %1256 = vst [vmem:[#allocation2 + $0x64] sm:$0xf] %v1012_v26  ;;  %1259 = vst [vmem:[#allocation2 + $0x68] sm:$0x1] %v1258_v27  ;;  %v1071_v36 = vor.u32 %v1069_v11, %v9006_v21  ;;  %v1072_v37 = vrot.slane %v9006_v21, 4  ;;  %v991_v28 = vrot.slane %v989_v22, 7  ;;  %v6910_v46 = vcombine.low %v1318_v55, %v9008_v25 }
 0x181   : > { %v9016_v42 = vrot.slane %v1049_v24, 7  ;;  %v1421_v45 = vshrl.u32 %v9008_v25, 16  ;;  %v1432_v41 = vshrl.u32 %v1320_v47, 16  ;;  %v1435_v48 = vshll.u32 %v1320_v47, 16  ;;  %v8308_v24 = vld [vmem:[#allocation8 + $0xe0] sm:$0xff]  }
 0x182   : > { %v1282_v51 = vsel %vm8888_vm8, %v1071_v36, %v1281_v18  ;;  %v994_v52 = vor.u32 %v992_v23, %v991_v28  ;;  %v996_v53 = vrot.slane %v991_v28, 4  ;;  %7734 = vmatmul.mubr.bf16.vlgmr.msra.gmra.mxu0 %v6910_v46  ;;  %v1445_v55 = vshrl.u32 %v9018_v43, 16  ;;  %v7664_v36 = vpop.f32.mrf.mxu1  ;;  %v1278_v46 = vld [vmem:[#allocation2 + $0x8c] sm:$0x1] }
 0x183   : > { %v1054_v29 = vor.u32 %v1052_v31, %v9016_v42  ;;  %1283 = vst [vmem:[#allocation2 + $0x90] sm:$0xf] %v1282_v51  ;;  %v1055_v39 = vrot.slane %v9016_v42, 4  ;;  %v9026_v35 = vrot.slane %v1432_v41, 4  ;;  %v9028_v58 = vrot.slane %v1435_v48, 5  ;;  %7814 = vmatpush3.bf16.msra.mxu0 %v8863_v0 }
 0x184   : > { %v995_v61 = vsel %vm8901_vm9, %v987_v49, %v994_v52  ;;  %v1251_v62 = vsel %vm8907_vm10, %v996_v53, %v1250_v30  ;;  %v6911_v3 = vcombine.low %v1320_v47, %v9018_v43  ;;  %v712_v38 = vadd.f32 %v8994_v57, %v8869_v1  ;;  %7815 = vmatprep.subr.bf16.mxu0 %v8303_v50  ;;  %v1365_v57 = vld [vmem:[#allocation2 + $0x14] sm:$0x1]  ;;  %v1295_v53 = vld [vmem:[#allocation2 + $0xa8] sm:$0xf] }
 0x185   : > { %v1275_v2 = vsel %vm8888_vm8, %v1054_v29, %v1274_v32  ;;  %1249 = vst [vmem:[#allocation2 + $0x58] sm:$0xf] %v995_v61  ;;  %1252 = vst [vmem:[#allocation2 + $0x5c] sm:$0x1] %v1251_v62  ;;  %v704_v20 = vadd.f32 %v8869_v1, %v703_v14  ;;  %v725_v49 = vadd.f32 %v7663_v44, %v8869_v1  ;;  %v1456_v7 = vshrl.u32 %v1322_v40, 16  ;;  %v8311_v61 = vld [vmem:[#allocation8 + $0xd8] sm:$0xff]  }
 0x186   : > { %1276 = vst [vmem:[#allocation2 + $0x84] sm:$0xf] %v1275_v2  ;;  %v717_v5 = vadd.f32 %v8869_v1, %v716_v4  ;;  %7737 = vmatprep.mubr.bf16.mxu0 %v6911_v3  ;;  %v1459_v8 = vshll.u32 %v1322_v40, 16  ;;  %v1469_v9 = vshrl.u32 %v9031_v60, 16  ;;  %v6912_v0 = vcombine.low %v1322_v40, %v9031_v60  ;;  %v9060_v32 = vld [vmem:[#allocation2 + $0x30] sm:$0xf] }
 0x187   : > { %v770_v10 = vmax.f32 %v712_v38, 0.0  ;;  %v768_v11 = vmax.f32 %v704_v20, 0.0  ;;  %v773_v12 = vmax.f32 %v725_v49, 0.0  ;;  %v9050_v15 = vrot.slane %v1456_v7, 4  ;;  %7816 = vmatpush3.bf16.msra.mxu0 %v8303_v50  ;;  %v1285_v44 = vld [vmem:[#allocation2 + $0x98] sm:$0x1]  ;;  %v719_v38 = vpop.f32.mrf.mxu1 }
 0x188   : > { %v771_v13 = vmax.f32 %v717_v5, 0.0  ;;  %v9052_v14 = vrot.slane %v1459_v8, 5  ;;  %v1414_v17 = vor.u32 %v1413_v33, %v9004_v16  ;;  %v1417_v18 = vshll.u32 %v9008_v25, 16  ;;  %7817 = vmatprep.subr.bf16.mxu0 %v8306_v6  ;;  %v1288_v7 = vld [vmem:[#allocation2 + $0x9c] sm:$0xf] }
 0x189   : > { %v7220_v19 = vpack.c.bf16 %v770_v10, %v770_v10  ;;  %v7218_v47 = vpack.c.bf16 %v768_v11, %v768_v11  ;;  %v7223_v22 = vpack.c.bf16 %v773_v12, %v773_v12  ;;  %v1423_v30 = vrot.slane %v1421_v45, 4  ;;  %v9076_v12 = vld [vmem:[#allocation2 + $0x34] sm:$0xf] }
 0x18a   : > { %v7221_v23 = vpack.c.bf16 %v771_v13, %v771_v13  ;;  %v9056_v26 = vrot.slane %v1414_v17, 4  ;;  %v9058_v27 = vrot.slane %v1417_v18, 5  ;;  %v1427_v31 = vshll.u32 %v1365_v57, 16  ;;  %7738 = vmatmul.mubr.bf16.gmra.mxu0 %v6912_v0 }
 0x18b   : > { %v1074_v28 = vshrl.u32 %v7220_v19, 16  ;;  %v1077_v16 = vshll.u32 %v7220_v19, 16  ;;  %v1057_v33 = vshrl.u32 %v7218_v47, 16  ;;  %v1060_v25 = vshll.u32 %v7218_v47, 16  ;;  %7818 = vmatpush3.bf16.msra.mxu0 %v8306_v6  ;;  %v8313_v19 = vld [vmem:[#allocation8 + $0xd0] sm:$0xff]  }
 0x18c   : > { %v1100_v41 = vshrl.u32 %v7223_v22, 16  ;;  %v1103_v48 = vshll.u32 %v7223_v22, 16  ;;  %v1083_v40 = vshrl.u32 %v7221_v23, 16  ;;  %v1086_v50 = vshll.u32 %v7221_v23, 16  ;;  %7819 = vmatprep.subr.bf16.mxu0 %v8308_v24  ;;  %v9096_v22 = vld [vmem:[#allocation2 + $0x20] sm:$0x1] }
 0x18d   : > { %v1076_v51 = vrot.slane %v1074_v28, 7  ;;  %v1059_v52 = vrot.slane %v1057_v33, 7  ;;  %v1420_v45 = vsel %vm8852_vm2, %v9056_v26, %v9058_v27  ;;  %v1424_v29 = vor.u32 %v1423_v30, %v9058_v27  ;;  %v9110_v33 = vld [vmem:[#allocation2 + $0x3c] sm:$0xf] }
 0x18e   : > { %v9067_v62 = vrot.slane %v1100_v41, 7  ;;  %v9069_v2 = vrot.slane %v1083_v40, 7  ;;  %v1429_v3 = vrot.slane %v1427_v31, 5  ;;  %v1480_v4 = vshrl.u32 %v9060_v32, 16  ;;  %v8316_v41 = vld [vmem:[#allocation8 + $0xc8] sm:$0xff]  }
 0x18f   : > { %v1079_v20 = vor.u32 %v1077_v16, %v1076_v51  ;;  %v1081_v49 = vrot.slane %v1076_v51, 4  ;;  %v1062_v5 = vor.u32 %v1060_v25, %v1059_v52  ;;  %v1064_v6 = vrot.slane %v1059_v52, 4  ;;  %7820 = vmatpush3.bf16.msra.mxu0 %v8308_v24 }
 0x190   : > { %v1105_v8 = vor.u32 %v1103_v48, %v9067_v62  ;;  %v1106_v0 = vrot.slane %v9067_v62, 4  ;;  %v1088_v10 = vor.u32 %v1086_v50, %v9069_v2  ;;  %v1089_v11 = vrot.slane %v9069_v2, 4  ;;  %7821 = vmatprep.subr.bf16.mxu0 %v8311_v61 }
 0x191   : > { %v1080_v13 = vsel %vm8901_vm9, %v1072_v37, %v1079_v20  ;;  %v1286_v57 = vsel %vm8907_vm10, %v1081_v49, %v1285_v44  ;;  %v1063_v17 = vsel %vm8901_vm9, %v1055_v39, %v1062_v5  ;;  %v1279_v18 = vsel %vm8907_vm10, %v1064_v6, %v1278_v46  ;;  %v7667_v39 = vpop.f32.mrf.mxu1  ;;  %v8294_v46 = vld [vmem:[#allocation8 + $0xb0] sm:$0xff]  }
 0x192   : > { %1284 = vst [vmem:[#allocation2 + $0x94] sm:$0xf] %v1080_v13  ;;  %1287 = vst [vmem:[#allocation2 + $0x98] sm:$0x1] %v1286_v57  ;;  %v1296_v21 = vsel %vm8888_vm8, %v1105_v8, %v1295_v53  ;;  %v1289_v37 = vsel %vm8888_vm8, %v1088_v10, %v1288_v7  ;;  %v1425_v47 = vrot.slane %v1424_v29, 4  ;;  %v9094_v42 = vrot.slane %v1480_v4, 4 }
 0x193   : > { %1277 = vst [vmem:[#allocation2 + $0x88] sm:$0xf] %v1063_v17  ;;  %1280 = vst [vmem:[#allocation2 + $0x8c] sm:$0x1] %v1279_v18  ;;  %v1483_v23 = vshll.u32 %v9060_v32, 16  ;;  %v1493_v24 = vshrl.u32 %v9076_v12, 16  ;;  %v6913_v26 = vcombine.low %v9060_v32, %v9076_v12  ;;  %v728_v27 = vadd.f32 %v7664_v36, %v8869_v1  ;;  %7822 = vmatpush3.bf16.msra.mxu0 %v8311_v61 }
 0x194   : > { %1297 = vst [vmem:[#allocation2 + $0xa8] sm:$0xf] %v1296_v21  ;;  %1290 = vst [vmem:[#allocation2 + $0x9c] sm:$0xf] %v1289_v37  ;;  %v1430_v30 = vsel %vm8852_vm2, %v1425_v47, %v1429_v3  ;;  %v1438_v31 = vor.u32 %v9028_v58, %v9026_v35  ;;  %v1441_v28 = vshll.u32 %v9018_v43, 16  ;;  %v1447_v16 = vrot.slane %v1445_v55, 4  ;;  %7823 = vmatprep.subr.bf16.mxu0 %v8313_v19  ;;  %v732_v55 = vpop.f32.mrf.mxu1 }
 0x195   : > { %v6886_v25 = vcombine.low %v1420_v45, %v1430_v30  ;;  %v9112_v44 = vrot.slane %v1483_v23, 5  ;;  %7741 = vmatprep.mubr.bf16.mxu0 %v6913_v26  ;;  %v774_v32 = vmax.f32 %v728_v27, 0.0  ;;  %v1451_v36 = vshll.u32 %v9096_v22, 16  ;;  %v9122_v3 = vld [vmem:[#allocation2 + $0x40] sm:$0xf]  ;;  %v8318_v8 = vld [vmem:[#allocation8 + $0xc0] sm:$0xff]  }
 0x196   : > { %v1439_v48 = vrot.slane %v1438_v31, 4  ;;  %v1443_v35 = vrot.slane %v1441_v28, 5  ;;  %v720_v58 = vadd.f32 %v8869_v1, %v719_v38  ;;  %v741_v43 = vadd.f32 %v7667_v39, %v8869_v1  ;;  %v1299_v13 = vld [vmem:[#allocation2 + $0xb0] sm:$0x1]  ;;  %v8300_v39 = vld [vmem:[#allocation8 + $0xa0] sm:$0xff]  }
 0x197   : > { %7686 = vmatmul.mubr.bf16.vlgmr.msra.gmra.mxu1 %v6886_v25  ;;  %v7224_v40 = vpack.c.bf16 %v774_v32, %v774_v32  ;;  %v1453_v50 = vrot.slane %v1451_v36, 5  ;;  %v733_v51 = vadd.f32 %v8869_v1, %v732_v55  ;;  %v1504_v52 = vshrl.u32 %v9110_v33, 16  ;;  %7824 = vmatpush3.bf16.msra.mxu0 %v8313_v19  ;;  %v8297_v1 = vld [vmem:[#allocation8 + $0xa8] sm:$0xff]   ;;  %v9132_v23 = vld [vmem:[#allocation8 + $0x178] sm:$0xff]  }
 0x198   : > { %7766 = vmatpush3.bf16.msra.mxu1 %v8860_v63  ;;  %v1444_v53 = vsel %vm8852_vm2, %v1439_v48, %v1443_v35  ;;  %v1448_v45 = vor.u32 %v1447_v16, %v1443_v35  ;;  %v772_v29 = vmax.f32 %v720_v58, 0.0  ;;  %v777_v61 = vmax.f32 %v741_v43, 0.0  ;;  %7825 = vmatprep.subr.bf16.mxu0 %v8316_v41  ;;  %v1292_v31 = vld [vmem:[#allocation2 + $0xa4] sm:$0x1]  ;;  %v1309_v16 = vld [vmem:[#allocation2 + $0xc0] sm:$0xf] }
 0x199   : > { %v1108_v4 = vshrl.u32 %v7224_v40, 16  ;;  %v1111_v38 = vshll.u32 %v7224_v40, 16  ;;  %v775_v20 = vmax.f32 %v733_v51, 0.0  ;;  %v9124_v49 = vrot.slane %v1504_v52, 4  ;;  %7767 = vmatprep.subr.bf16.mxu1 %v8294_v46  ;;  %v9136_v48 = vld [vmem:[#allocation2 + $0x2c] sm:$0x1]  ;;  %v7668_v51 = vpop.f32.mrf.mxu1 }
 0x19a   : > { %v1449_v5 = vrot.slane %v1448_v45, 4  ;;  %v7222_v6 = vpack.c.bf16 %v772_v29, %v772_v29  ;;  %v7227_v63 = vpack.c.bf16 %v777_v61, %v777_v61  ;;  %v1507_v7 = vshll.u32 %v9110_v33, 16 }
 0x19b   : > { %v1110_v10 = vrot.slane %v1108_v4, 7  ;;  %v7225_v57 = vpack.c.bf16 %v775_v20, %v775_v20  ;;  %v1517_v17 = vshrl.u32 %v9122_v3, 16  ;;  %v6914_v18 = vcombine.low %v9110_v33, %v9122_v3  ;;  %7826 = vmatpush3.bf16.msra.mxu0 %v8316_v41 }
 0x19c   : > { %v1454_v19 = vsel %vm8852_vm2, %v1449_v5, %v1453_v50  ;;  %v1091_v21 = vshrl.u32 %v7222_v6, 16  ;;  %v1094_v37 = vshll.u32 %v7222_v6, 16  ;;  %v1134_v47 = vshrl.u32 %v7227_v63, 16  ;;  %7768 = vmatpush3.bf16.msra.mxu1 %v8294_v46  ;;  %7827 = vmatprep.subr.bf16.mxu0 %v8318_v8  ;;  %v1328_v50 = vld [vmem:[#allocation2 + $0x48] sm:$0xf] }
 0x19d   : > { %v1113_v26 = vor.u32 %v1111_v38, %v1110_v10  ;;  %v1115_v27 = vrot.slane %v1110_v10, 4  ;;  %v6887_v30 = vcombine.low %v1444_v53, %v1454_v19  ;;  %v1137_v28 = vshll.u32 %v7227_v63, 16  ;;  %7742 = vmatmul.mubr.bf16.gmra.mxu0 %v6914_v18  ;;  %7769 = vmatprep.subr.bf16.mxu1 %v8297_v1  ;;  %v1302_v38 = vld [vmem:[#allocation2 + $0xb4] sm:$0xf] }
 0x19e   : > { %v1093_v33 = vrot.slane %v1091_v21, 7  ;;  %v9134_v25 = vrot.slane %v1134_v47, 7  ;;  %v1117_v32 = vshrl.u32 %v7225_v57, 16  ;;  %v1120_v36 = vshll.u32 %v7225_v57, 16  ;;  %v1330_v19 = vld [vmem:[#allocation2 + $0x54] sm:$0xf] }
 0x19f   : > { %v1114_v46 = vsel %vm8901_vm9, %v1106_v0, %v1113_v26  ;;  %v1300_v41 = vsel %vm8907_vm10, %v1115_v27, %v1299_v13  ;;  %7689 = vmatprep.mubr.bf16.mxu1 %v6887_v30  ;;  %v9144_v35 = vrot.slane %v1507_v7, 5  ;;  %v1462_v58 = vor.u32 %v9052_v14, %v9050_v15  ;;  %v8305_v0 = vld [vmem:[#allocation8 + $0x98] sm:$0xff]   ;;  %7828 = vmatpush3.bf16.msra.mxu0 %v8318_v8  ;;  %v9155_v14 = vld [vmem:[#allocation2 + $0x4c] sm:$0xf]  ;;  %v9171_v7 = vld [vmem:[#allocation2 + $0x38] sm:$0x1]  ;;  %v735_v8 = vpop.f32.mrf.mxu1 }
 0x1a0   : > { %1298 = vst [vmem:[#allocation2 + $0xac] sm:$0xf] %v1114_v46  ;;  %1301 = vst [vmem:[#allocation2 + $0xb0] sm:$0x1] %v1300_v41  ;;  %v1096_v43 = vor.u32 %v1094_v37, %v1093_v33  ;;  %v1098_v55 = vrot.slane %v1093_v33, 4  ;;  %v1139_v40 = vor.u32 %v1137_v28, %v9134_v25  ;;  %v1140_v62 = vrot.slane %v9134_v25, 4  ;;  %7770 = vmatpush3.bf16.msra.mxu1 %v8297_v1 }
 0x1a1   : > { %v9150_v52 = vrot.slane %v1117_v32, 7  ;;  %v1463_v53 = vrot.slane %v1462_v58, 4  ;;  %v1465_v45 = vshll.u32 %v9031_v60, 16  ;;  %v1471_v15 = vrot.slane %v1469_v9, 4  ;;  %7771 = vmatprep.subr.bf16.mxu1 %v8300_v39  ;;  %7909 = vmatprep.subr.bf16.mxu0 %v9132_v23  ;;  %v8310_v21 = vld [vmem:[#allocation8 + $0x90] sm:$0xff]  }
 0x1a2   : > { %v1097_v29 = vsel %vm8901_vm9, %v1089_v11, %v1096_v43  ;;  %v1293_v61 = vsel %vm8907_vm10, %v1098_v55, %v1292_v31  ;;  %v1310_v4 = vsel %vm8888_vm8, %v1139_v40, %v1309_v16  ;;  %v1475_v60 = vshll.u32 %v9136_v48, 16  ;;  %v8415_v47 = vld [vmem:[%s11225_s2] ss:$0 sm:$0xff]  ;;  %v9196_v40 = vld [vmem:[#allocation2 + $0x44] sm:$0x1] }
 0x1a3   : > { %1291 = vst [vmem:[#allocation2 + $0xa0] sm:$0xf] %v1097_v29  ;;  %1294 = vst [vmem:[#allocation2 + $0xa4] sm:$0x1] %v1293_v61  ;;  %v1122_v9 = vor.u32 %v1120_v36, %v9150_v52  ;;  %v1123_v20 = vrot.slane %v9150_v52, 4  ;;  %v1467_v2 = vrot.slane %v1465_v45, 5  ;;  %v6915_v63 = vcombine.low %v1328_v50, %v9155_v14 }
 0x1a4   : > { %1311 = vst [vmem:[#allocation2 + $0xc0] sm:$0xf] %v1310_v4  ;;  %v1528_v1 = vshrl.u32 %v1328_v50, 16  ;;  %v1477_v5 = vrot.slane %v1475_v60, 5  ;;  %v1531_v11 = vshll.u32 %v1328_v50, 16  ;;  %v1541_v6 = vshrl.u32 %v9155_v14, 16  ;;  %7772 = vmatpush3.bf16.msra.mxu1 %v8300_v39 }
 0x1a5   : > { %v1303_v10 = vsel %vm8888_vm8, %v1122_v9, %v1302_v38  ;;  %v1468_v13 = vsel %vm8852_vm2, %v1463_v53, %v1467_v2  ;;  %v1472_v57 = vor.u32 %v1471_v15, %v1467_v2  ;;  %7773 = vmatprep.subr.bf16.mxu1 %v8305_v0  ;;  %7745 = vmatprep.mubr.bf16.mxu0 %v6915_v63  ;;  %v1489_v26 = vshll.u32 %v9076_v12, 16  ;;  %v9190_v36 = vld [vmem:[#allocation2 + $0x58] sm:$0xf]  ;;  %v8315_v50 = vld [vmem:[#allocation8 + $0x88] sm:$0xff]   ;;  %v1313_v38 = vld [vmem:[#allocation2 + $0xc8] sm:$0x1] }
 0x1a6   : > { %v9177_v18 = vrot.slane %v1528_v1, 4  ;;  %1304 = vst [vmem:[#allocation2 + $0xb4] sm:$0xf] %v1303_v10  ;;  %v9179_v37 = vrot.slane %v1531_v11, 5  ;;  %v744_v39 = vadd.f32 %v8415_v47, %v7668_v51  ;;  %v1486_v34 = vor.u32 %v9112_v44, %v9094_v42  ;;  %v9239_v52 = vld [vmem:[#allocation2 + $0x70] sm:$0xf] }
 0x1a7   : > { %v1473_v27 = vrot.slane %v1472_v57, 4  ;;  %v1495_v30 = vrot.slane %v1493_v24, 4  ;;  %v1499_v31 = vshll.u32 %v9171_v7, 16  ;;  %v736_v28 = vadd.f32 %v8415_v47, %v735_v8  ;;  %v1306_v47 = vld [vmem:[#allocation2 + $0xbc] sm:$0x1] }
 0x1a8   : > { %v778_v16 = vmax.f32 %v744_v39, 0.0  ;;  %v1487_v33 = vrot.slane %v1486_v34, 4  ;;  %v1491_v32 = vrot.slane %v1489_v26, 5  ;;  %v1552_v46 = vshrl.u32 %v1330_v19, 16  ;;  %7774 = vmatpush3.bf16.msra.mxu1 %v8305_v0  ;;  %v9212_v26 = vld [vmem:[#allocation2 + $0x64] sm:$0xf] }
 0x1a9   : > { %v1478_v41 = vsel %vm8852_vm2, %v1473_v27, %v1477_v5  ;;  %v1501_v42 = vrot.slane %v1499_v31, 5  ;;  %v776_v44 = vmax.f32 %v736_v28, 0.0  ;;  %v1555_v58 = vshll.u32 %v1330_v19, 16  ;;  %7775 = vmatprep.subr.bf16.mxu1 %v8310_v21  ;;  %v1332_v5 = vld [vmem:[#allocation2 + $0x60] sm:$0xf] }
 0x1aa   : > { %v6888_v43 = vcombine.low %v1468_v13, %v1478_v41  ;;  %v7228_v12 = vpack.c.bf16 %v778_v16, %v778_v16  ;;  %v1492_v24 = vsel %vm8852_vm2, %v1487_v33, %v1491_v32  ;;  %v1496_v55 = vor.u32 %v1495_v30, %v1491_v32  ;;  %v8319_v13 = vld [vmem:[#allocation8 + $0x80] sm:$0xff]   ;;  %v9216_v16 = vld [vmem:[#allocation8 + $0x138] sm:$0xff]  }
 0x1ab   : > { %v7226_v51 = vpack.c.bf16 %v776_v44, %v776_v44  ;;  %v9198_v53 = vrot.slane %v1552_v46, 4  ;;  %v9200_v0 = vrot.slane %v1555_v58, 5  ;;  %v1565_v45 = vshrl.u32 %v9190_v36, 16  ;;  %v1334_v44 = vld [vmem:[#allocation2 + $0x6c] sm:$0xf] }
 0x1ac   : > { %7690 = vmatmul.mubr.bf16.gmra.mxu1 %v6888_v43  ;;  %v1142_v15 = vshrl.u32 %v7228_v12, 16  ;;  %v1145_v29 = vshll.u32 %v7228_v12, 16  ;;  %v1497_v61 = vrot.slane %v1496_v55, 4  ;;  %v6916_v4 = vcombine.low %v1330_v19, %v9190_v36 }
 0x1ad   : > { %v1125_v60 = vshrl.u32 %v7226_v51, 16  ;;  %v1128_v9 = vshll.u32 %v7226_v51, 16  ;;  %v1510_v2 = vor.u32 %v9144_v35, %v9124_v49  ;;  %v1513_v1 = vshll.u32 %v9122_v3, 16  ;;  %7776 = vmatpush3.bf16.msra.mxu1 %v8310_v21 }
 0x1ae   : > { %v1144_v11 = vrot.slane %v1142_v15, 7  ;;  %v1502_v63 = vsel %vm8852_vm2, %v1497_v61, %v1501_v42  ;;  %7746 = vmatmul.mubr.bf16.gmra.mxu0 %v6916_v4  ;;  %v1519_v8 = vrot.slane %v1517_v17, 4  ;;  %v1523_v10 = vshll.u32 %v9196_v40, 16  ;;  %7777 = vmatprep.subr.bf16.mxu1 %v8315_v50  ;;  %v9226_v42 = vld [vmem:[#allocation2 + $0x50] sm:$0x1] }
 0x1af   : > { %v6889_v57 = vcombine.low %v1492_v24, %v1502_v63  ;;  %v1127_v19 = vrot.slane %v1125_v60, 7  ;;  %v1511_v49 = vrot.slane %v1510_v2, 4  ;;  %v1515_v35 = vrot.slane %v1513_v1, 5  ;;  %v1336_v15 = vld [vmem:[#allocation2 + $0x78] sm:$0xf] }
 0x1b0   : > { %v1147_v39 = vor.u32 %v1145_v29, %v1144_v11  ;;  %v1149_v34 = vrot.slane %v1144_v11, 4  ;;  %v1525_v21 = vrot.slane %v1523_v10, 5  ;;  %v1576_v27 = vshrl.u32 %v1332_v5, 16  ;;  %v9251_v2 = vld [vmem:[#allocation2 + $0x7c] sm:$0xf] }
 0x1b1   : > { %7693 = vmatprep.mubr.bf16.mxu1 %v6889_v57  ;;  %v1130_v30 = vor.u32 %v1128_v9, %v1127_v19  ;;  %v1132_v31 = vrot.slane %v1127_v19, 4  ;;  %v1516_v17 = vsel %vm8852_vm2, %v1511_v49, %v1515_v35  ;;  %v1520_v28 = vor.u32 %v1519_v8, %v1515_v35  ;;  %7778 = vmatpush3.bf16.msra.mxu1 %v8315_v50  ;;  %v9261_v19 = vld [vmem:[#allocation2 + $0x68] sm:$0x1] }
 0x1b2   : > { %v1148_v33 = vsel %vm8901_vm9, %v1140_v62, %v1147_v39  ;;  %v1314_v32 = vsel %vm8907_vm10, %v1149_v34, %v1313_v38  ;;  %v9224_v46 = vrot.slane %v1576_v27, 4  ;;  %v1579_v41 = vshll.u32 %v1332_v5, 16  ;;  %7779 = vmatprep.subr.bf16.mxu1 %v8319_v13 }
 0x1b3   : > { %1312 = vst [vmem:[#allocation2 + $0xc4] sm:$0xf] %v1148_v33  ;;  %1315 = vst [vmem:[#allocation2 + $0xc8] sm:$0x1] %v1314_v32  ;;  %v1131_v25 = vsel %vm8901_vm9, %v1123_v20, %v1130_v30  ;;  %v1307_v62 = vsel %vm8907_vm10, %v1132_v31, %v1306_v47  ;;  %v1521_v58 = vrot.slane %v1520_v28, 4  ;;  %v1589_v43 = vshrl.u32 %v9212_v26, 16 }
 0x1b4   : > { %1305 = vst [vmem:[#allocation2 + $0xb8] sm:$0xf] %v1131_v25  ;;  %1308 = vst [vmem:[#allocation2 + $0xbc] sm:$0x1] %v1307_v62  ;;  %v1581_v12 = vrot.slane %v1579_v41, 5  ;;  %v6917_v24 = vcombine.low %v1332_v5, %v9212_v26  ;;  %v1534_v55 = vor.u32 %v9179_v37, %v9177_v18  ;;  %v1537_v50 = vshll.u32 %v9155_v14, 16 }
 0x1b5   : > { %v1526_v54 = vsel %vm8852_vm2, %v1521_v58, %v1525_v21  ;;  %v1543_v56 = vrot.slane %v1541_v6, 4  ;;  %v1547_v20 = vshll.u32 %v9226_v42, 16  ;;  %v1600_v51 = vshrl.u32 %v1334_v44, 16  ;;  %7780 = vmatpush3.bf16.msra.mxu1 %v8319_v13  ;;  %v9246_v37 = vld [vmem:[#allocation2 + $0x5c] sm:$0x1] }
 0x1b6   : > { %v6890_v29 = vcombine.low %v1516_v17, %v1526_v54  ;;  %7749 = vmatprep.mubr.bf16.mxu0 %v6917_v24  ;;  %v1535_v61 = vrot.slane %v1534_v55, 4  ;;  %v1539_v4 = vrot.slane %v1537_v50, 5  ;;  %v1603_v18 = vshll.u32 %v1334_v44, 16  ;;  %7861 = vmatprep.subr.bf16.mxu1 %v9216_v16  ;;  %v9271_v28 = vld [vmem:[#allocation2 + $0x88] sm:$0xf] }
 0x1b7   : > { %v1549_v38 = vrot.slane %v1547_v20, 5  ;;  %v1602_v60 = vrot.slane %v1600_v51, 4  ;;  %v1613_v9 = vshrl.u32 %v9239_v52, 16  ;;  %v6918_v6 = vcombine.low %v1334_v44, %v9239_v52  ;;  %v9278_v54 = vld [vmem:[#allocation2 + $0x74] sm:$0x1] }
 0x1b8   : > { %7694 = vmatmul.mubr.bf16.gmra.mxu1 %v6890_v29  ;;  %v1540_v1 = vsel %vm8852_vm2, %v1535_v61, %v1539_v4  ;;  %v1544_v5 = vor.u32 %v1543_v56, %v1539_v4  ;;  %v1605_v11 = vrot.slane %v1603_v18, 5  ;;  %v1558_v63 = vor.u32 %v9200_v0, %v9198_v53  ;;  %v1338_v0 = vld [vmem:[#allocation2 + $0x84] sm:$0xf] }
 0x1b9   : > { %7750 = vmatmul.mubr.bf16.gmra.mxu0 %v6918_v6  ;;  %v1561_v8 = vshll.u32 %v9190_v36, 16  ;;  %v1567_v10 = vrot.slane %v1565_v45, 4  ;;  %v1571_v13 = vshll.u32 %v9246_v37, 16  ;;  %v1624_v57 = vshrl.u32 %v1336_v15, 16 }
 0x1ba   : > { %v1545_v47 = vrot.slane %v1544_v5, 4  ;;  %v1559_v49 = vrot.slane %v1558_v63, 4  ;;  %v1627_v35 = vshll.u32 %v1336_v15, 16  ;;  %v1637_v39 = vshrl.u32 %v9251_v2, 16 }
 0x1bb   : > { %v1563_v34 = vrot.slane %v1561_v8, 5  ;;  %v1573_v21 = vrot.slane %v1571_v13, 5  ;;  %v9264_v27 = vrot.slane %v1624_v57, 4  ;;  %v6919_v53 = vcombine.low %v1336_v15, %v9251_v2  ;;  %v1340_v15 = vld [vmem:[#allocation2 + $0x90] sm:$0xf] }
 0x1bc   : > { %v1550_v45 = vsel %vm8852_vm2, %v1545_v47, %v1549_v38  ;;  %v1629_v30 = vrot.slane %v1627_v35, 5  ;;  %v1582_v31 = vor.u32 %v1581_v12, %v9224_v46  ;;  %v1585_v17 = vshll.u32 %v9212_v26, 16  ;;  %v9285_v38 = vld [vmem:[#allocation2 + $0x94] sm:$0xf]  ;;  %v9288_v47 = vld [vmem:[#allocation2 + $0x80] sm:$0x1] }
 0x1bd   : > { %v6891_v33 = vcombine.low %v1540_v1, %v1550_v45  ;;  %v1564_v32 = vsel %vm8852_vm2, %v1559_v49, %v1563_v34  ;;  %v1568_v41 = vor.u32 %v1567_v10, %v1563_v34  ;;  %7753 = vmatprep.mubr.bf16.mxu0 %v6919_v53  ;;  %v1591_v44 = vrot.slane %v1589_v43, 4  ;;  %v1342_v34 = vld [vmem:[#allocation2 + $0x9c] sm:$0xf] }
 0x1be   : > { %v1583_v25 = vrot.slane %v1582_v31, 4  ;;  %v1587_v62 = vrot.slane %v1585_v17, 5  ;;  %v1595_v58 = vshll.u32 %v9261_v19, 16  ;;  %v1648_v24 = vshrl.u32 %v1338_v0, 16 }
 0x1bf   : > { %7697 = vmatprep.mubr.bf16.mxu1 %v6891_v33  ;;  %v1569_v55 = vrot.slane %v1568_v41, 4  ;;  %v1651_v50 = vshll.u32 %v1338_v0, 16  ;;  %v1661_v46 = vshrl.u32 %v9271_v28, 16  ;;  %v6920_v12 = vcombine.low %v1338_v0, %v9271_v28 }
 0x1c0   : > { %v1588_v56 = vsel %vm8852_vm2, %v1583_v25, %v1587_v62  ;;  %v1592_v20 = vor.u32 %v1591_v44, %v1587_v62  ;;  %v1597_v51 = vrot.slane %v1595_v58, 5  ;;  %v1650_v43 = vrot.slane %v1648_v24, 4  ;;  %v9301_v58 = vld [vmem:[#allocation2 + $0x8c] sm:$0x1] }
 0x1c1   : > { %v1574_v29 = vsel %vm8852_vm2, %v1569_v55, %v1573_v21  ;;  %v1653_v61 = vrot.slane %v1651_v50, 5  ;;  %7754 = vmatmul.mubr.bf16.gmra.mxu0 %v6920_v12  ;;  %v1606_v4 = vor.u32 %v1605_v11, %v1602_v60  ;;  %v1609_v18 = vshll.u32 %v9239_v52, 16  ;;  %v9294_v21 = vld [vmem:[#allocation2 + $0xa0] sm:$0xf] }
 0x1c2   : > { %v6892_v6 = vcombine.low %v1564_v32, %v1574_v29  ;;  %v1593_v1 = vrot.slane %v1592_v20, 4  ;;  %v1615_v5 = vrot.slane %v1613_v9, 4  ;;  %v1619_v63 = vshll.u32 %v9278_v54, 16 }
 0x1c3   : > { %v1607_v8 = vrot.slane %v1606_v4, 4  ;;  %v1611_v10 = vrot.slane %v1609_v18, 5  ;;  %v1672_v13 = vshrl.u32 %v1340_v15, 16  ;;  %v1675_v57 = vshll.u32 %v1340_v15, 16 }
 0x1c4   : > { %7698 = vmatmul.mubr.bf16.gmra.mxu1 %v6892_v6  ;;  %v1598_v49 = vsel %vm8852_vm2, %v1593_v1, %v1597_v51  ;;  %v1621_v60 = vrot.slane %v1619_v63, 5  ;;  %v1685_v11 = vshrl.u32 %v9285_v38, 16  ;;  %v6921_v35 = vcombine.low %v1340_v15, %v9285_v38  ;;  %v9307_v51 = vld [vmem:[#allocation2 + $0xac] sm:$0xf] }
 0x1c5   : > { %v6893_v9 = vcombine.low %v1588_v56, %v1598_v49  ;;  %v1612_v53 = vsel %vm8852_vm2, %v1607_v8, %v1611_v10  ;;  %v1616_v0 = vor.u32 %v1615_v5, %v1611_v10  ;;  %v1674_v45 = vrot.slane %v1672_v13, 4  ;;  %v1344_v56 = vld [vmem:[#allocation2 + $0xa8] sm:$0xf]  ;;  %v9313_v8 = vld [vmem:[#allocation2 + $0x98] sm:$0x1] }
 0x1c6   : > { %v1677_v31 = vrot.slane %v1675_v57, 5  ;;  %7757 = vmatprep.mubr.bf16.mxu0 %v6921_v35  ;;  %v1630_v17 = vor.u32 %v1629_v30, %v9264_v27  ;;  %v1633_v33 = vshll.u32 %v9251_v2, 16  ;;  %v1639_v32 = vrot.slane %v1637_v39, 4  ;;  %v1346_v10 = vld [vmem:[#allocation2 + $0xb4] sm:$0xf] }
 0x1c7   : > { %7701 = vmatprep.mubr.bf16.mxu1 %v6893_v9  ;;  %v1617_v41 = vrot.slane %v1616_v0, 4  ;;  %v1643_v44 = vshll.u32 %v9288_v47, 16  ;;  %v1696_v25 = vshrl.u32 %v1342_v34, 16  ;;  %v1699_v62 = vshll.u32 %v1342_v34, 16  ;;  %v9316_v35 = vld [vmem:[#allocation2 + $0xb8] sm:$0xf] }
 0x1c8   : > { %v1631_v24 = vrot.slane %v1630_v17, 4  ;;  %v1635_v55 = vrot.slane %v1633_v33, 5  ;;  %v1709_v50 = vshrl.u32 %v9294_v21, 16  ;;  %v6922_v12 = vcombine.low %v1342_v34, %v9294_v21 }
 0x1c9   : > { %v1622_v27 = vsel %vm8852_vm2, %v1617_v41, %v1621_v60  ;;  %v1645_v30 = vrot.slane %v1643_v44, 5  ;;  %v1698_v39 = vrot.slane %v1696_v25, 4  ;;  %v1701_v20 = vrot.slane %v1699_v62, 5 }
 0x1ca   : > { %v6894_v15 = vcombine.low %v1612_v53, %v1622_v27  ;;  %v1636_v29 = vsel %vm8852_vm2, %v1631_v24, %v1635_v55  ;;  %v1640_v4 = vor.u32 %v1639_v32, %v1635_v55  ;;  %7758 = vmatmul.mubr.bf16.gmra.mxu0 %v6922_v12  ;;  %v1654_v18 = vor.u32 %v1653_v61, %v1650_v43 }
 0x1cb   : > { %v1657_v6 = vshll.u32 %v9271_v28, 16  ;;  %v1663_v1 = vrot.slane %v1661_v46, 4  ;;  %v1667_v5 = vshll.u32 %v9301_v58, 16  ;;  %v1720_v63 = vshrl.u32 %v1344_v56, 16 }
 0x1cc   : > { %7702 = vmatmul.mubr.bf16.gmra.mxu1 %v6894_v15  ;;  %v1641_v13 = vrot.slane %v1640_v4, 4  ;;  %v1655_v57 = vrot.slane %v1654_v18, 4  ;;  %v1723_v49 = vshll.u32 %v1344_v56, 16  ;;  %v1733_v60 = vshrl.u32 %v9307_v51, 16 }
 0x1cd   : > { %v1659_v34 = vrot.slane %v1657_v6, 5  ;;  %v1669_v9 = vrot.slane %v1667_v5, 5  ;;  %v1722_v43 = vrot.slane %v1720_v63, 4  ;;  %v6923_v61 = vcombine.low %v1344_v56, %v9307_v51  ;;  %v9334_v63 = vld [vmem:[#allocation2 + $0xb0] sm:$0x1] }
 0x1ce   : > { %v1646_v46 = vsel %vm8852_vm2, %v1641_v13, %v1645_v30  ;;  %v1725_v53 = vrot.slane %v1723_v49, 5  ;;  %v1678_v0 = vor.u32 %v1677_v31, %v1674_v45  ;;  %v1681_v17 = vshll.u32 %v9285_v38, 16  ;;  %v9327_v31 = vld [vmem:[#allocation2 + $0xa4] sm:$0x1]  ;;  %v8317_v30 = vld [vmem:[#allocation2 + $0xc] sm:$0xff]  }
 0x1cf   : > { %v6895_v33 = vcombine.low %v1636_v29, %v1646_v46  ;;  %v1660_v32 = vsel %vm8852_vm2, %v1655_v57, %v1659_v34  ;;  %v1664_v41 = vor.u32 %v1663_v1, %v1659_v34  ;;  %7761 = vmatprep.mubr.bf16.mxu0 %v6923_v61  ;;  %v1687_v44 = vrot.slane %v1685_v11, 4 }
 0x1d0   : > { %v1679_v25 = vrot.slane %v1678_v0, 4  ;;  %v1683_v62 = vrot.slane %v1681_v17, 5  ;;  %v1691_v24 = vshll.u32 %v9313_v8, 16  ;;  %v1744_v55 = vshrl.u32 %v1346_v10, 16  ;;  %v2362_v17 = vld [vmem:[#allocation2] sm:$0xe] }
 0x1d1   : > { %7705 = vmatprep.mubr.bf16.mxu1 %v6895_v33  ;;  %v1665_v12 = vrot.slane %v1664_v41, 4  ;;  %v1747_v56 = vshll.u32 %v1346_v10, 16  ;;  %v1757_v27 = vshrl.u32 %v9316_v35, 16  ;;  %v6924_v45 = vcombine.low %v1346_v10, %v9316_v35 }
 0x1d2   : > { %v1684_v11 = vsel %vm8852_vm2, %v1679_v25, %v1683_v62  ;;  %v1688_v15 = vor.u32 %v1687_v44, %v1683_v62  ;;  %v1693_v29 = vrot.slane %v1691_v24, 5  ;;  %v1746_v4 = vrot.slane %v1744_v55, 4  ;;  %v8320_v62 = vld [vmem:[#allocation2 + $0x18] sm:$0xff]  }
 0x1d3   : > { %v1670_v18 = vsel %vm8852_vm2, %v1665_v12, %v1669_v9  ;;  %v1749_v6 = vrot.slane %v1747_v56, 5  ;;  %7762 = vmatmul.mubr.bf16.gmra.mxu0 %v6924_v45  ;;  %v1702_v1 = vor.u32 %v1701_v20, %v1698_v39  ;;  %v1705_v5 = vshll.u32 %v9294_v21, 16  ;;  %v8335_v12 = vld [vmem:[#allocation8 + $0x170] sm:$0xff]  }
 0x1d4   : > { %v6896_v10 = vcombine.low %v1660_v32, %v1670_v18  ;;  %v1689_v13 = vrot.slane %v1688_v15, 4  ;;  %v1711_v57 = vrot.slane %v1709_v50, 4  ;;  %v1715_v49 = vshll.u32 %v9327_v31, 16  ;;  %7829 = vmatprep.mubr.bf16.mxu0 %v8317_v30  ;;  %v9341_v32 = vld [vmem:[#allocation2 + $0xbc] sm:$0x1] }
 0x1d5   : > { %v1703_v34 = vrot.slane %v1702_v1, 4  ;;  %v1707_v61 = vrot.slane %v1705_v5, 5  ;;  %v1726_v46 = vor.u32 %v1725_v53, %v1722_v43  ;;  %v1729_v0 = vshll.u32 %v9307_v51, 16  ;;  %v2364_v15 = vld [vmem:[#allocation2 + $0x18] sm:$0xe]  ;;  %v8321_v5 = vld [vmem:[#allocation2 + $0x24] sm:$0xff]  }
 0x1d6   : > { %7706 = vmatmul.mubr.bf16.gmra.mxu1 %v6896_v10  ;;  %v1694_v39 = vsel %vm8852_vm2, %v1689_v13, %v1693_v29  ;;  %v1717_v20 = vrot.slane %v1715_v49, 5  ;;  %v1735_v9 = vrot.slane %v1733_v60, 4  ;;  %v1739_v33 = vshll.u32 %v9334_v63, 16  ;;  %v2363_v10 = vld [vmem:[#allocation2 + $0xc] sm:$0xe] }
 0x1d7   : > { %v6897_v50 = vcombine.low %v1684_v11, %v1694_v39  ;;  %v1708_v41 = vsel %vm8852_vm2, %v1703_v34, %v1707_v61  ;;  %v1712_v44 = vor.u32 %v1711_v57, %v1707_v61  ;;  %v1727_v25 = vrot.slane %v1726_v46, 4  ;;  %v8416_v13 = vld [vmem:[#allocation2 + $0x4] sm:$0xf] }
 0x1d8   : > { %v1731_v43 = vrot.slane %v1729_v0, 5  ;;  %v1741_v53 = vrot.slane %v1739_v33, 5  ;;  %v1750_v24 = vor.u32 %v1749_v6, %v1746_v4  ;;  %v1753_v55 = vshll.u32 %v9316_v35, 16  ;;  %v8418_v33 = vld [vmem:[#allocation2 + $0x10] sm:$0xf] }
 0x1d9   : > { %7709 = vmatprep.mubr.bf16.mxu1 %v6897_v50  ;;  %v1713_v56 = vrot.slane %v1712_v44, 4  ;;  %v1759_v60 = vrot.slane %v1757_v27, 4  ;;  %v1763_v45 = vshll.u32 %v9341_v32, 16  ;;  %v6933_v30 = vrot.slane %v2362_v17, 9  ;;  %v8417_v27 = vld [vmem:[#allocation2 + $0x8] sm:$0x1] }
 0x1da   : > { %v1732_v11 = vsel %vm8852_vm2, %v1727_v25, %v1731_v43  ;;  %v1736_v29 = vor.u32 %v1735_v9, %v1731_v43  ;;  %v1751_v18 = vrot.slane %v1750_v24, 4  ;;  %v1755_v1 = vrot.slane %v1753_v55, 5  ;;  %v8419_v43 = vld [vmem:[#allocation2 + $0x14] sm:$0x1]  ;;  %v2365_v55 = vld [vmem:[#allocation2 + $0x24] sm:$0xe] }
 0x1db   : > { %v1718_v4 = vsel %vm8852_vm2, %v1713_v56, %v1717_v20  ;;  %7830 = vmatmul.mubr.bf16.vlgmr.msra.gmra.mxu0 %v8320_v62  ;;  %v1765_v6 = vrot.slane %v1763_v45, 5  ;;  %v2415_v57 = vrot.slane %v8416_v13, 5  ;;  %v2418_v49 = vrot.slane %v8417_v27, 5  ;;  %v8322_v45 = vld [vmem:[#allocation2 + $0x30] sm:$0xff]  }
 0x1dc   : > { %v6898_v34 = vcombine.low %v1708_v41, %v1718_v4  ;;  %v1737_v61 = vrot.slane %v1736_v29, 4  ;;  %v1756_v46 = vsel %vm8852_vm2, %v1751_v18, %v1755_v1  ;;  %v1760_v0 = vor.u32 %v1759_v60, %v1755_v1  ;;  %7833 = vmatprep.mubr.bf16.mxu0 %v8321_v5  ;;  %7910 = vmatpush3.bf16.msra.mxu0 %v9132_v23  ;;  %v8338_v41 = vld [vmem:[#allocation8 + $0x168] sm:$0xff]   ;;  %v2366_v23 = vld [vmem:[#allocation2 + $0x30] sm:$0xe]  ;;  %v2367_v18 = vld [vmem:[#allocation2 + $0x3c] sm:$0xe] }
 0x1dd   : > { %v9362_v39 = vsel %vm9355_vm13, %v6933_v30, %v2415_v57  ;;  %v2417_v20 = vrot.slane %v2415_v57, 4  ;;  %v6934_v9 = vrot.slane %v2363_v10, 9  ;;  %v2422_v50 = vrot.slane %v8418_v33, 5  ;;  %7911 = vmatprep.subr.bf16.mxu0 %v8335_v12  ;;  %v8324_v5 = vld [vmem:[#allocation2 + $0x3c] sm:$0xff]  }
 0x1de   : > { %7710 = vmatmul.mubr.bf16.gmra.mxu1 %v6898_v34  ;;  %v1742_v44 = vsel %vm8852_vm2, %v1737_v61, %v1741_v53  ;;  %v1761_v25 = vrot.slane %v1760_v0, 4  ;;  %v2425_v62 = vrot.slane %v8419_v43, 5  ;;  %v6935_v24 = vrot.slane %v2364_v15, 9  ;;  %v8420_v15 = vld [vmem:[#allocation2 + $0x1c] sm:$0xf] }
 0x1df   : > { %v6899_v56 = vcombine.low %v1732_v11, %v1742_v44  ;;  %v2419_v60 = vsel %vm9355_vm13, %v2417_v20, %v2418_v49  ;;  %v9370_v30 = vsel %vm9355_vm13, %v6934_v9, %v2422_v50  ;;  %v2424_v29 = vrot.slane %v2422_v50, 4  ;;  %v8340_v4 = vld [vmem:[#allocation8 + $0x160] sm:$0xff]   ;;  %v8421_v49 = vld [vmem:[#allocation2 + $0x28] sm:$0xf]  ;;  %v8422_v9 = vld [vmem:[#allocation2 + $0x34] sm:$0xf] }
 0x1e0   : > { %v1766_v53 = vsel %vm8852_vm2, %v1761_v25, %v1765_v6  ;;  %v6949_v1 = vcombine.low %v9362_v39, %v2419_v60  ;;  %v2429_v10 = vrot.slane %v8420_v15, 5  ;;  %v2432_v11 = vrot.slane %v9096_v22, 5  ;;  %7912 = vmatpush3.bf16.msra.mxu0 %v8335_v12  ;;  %v2368_v0 = vld [vmem:[#allocation2 + $0x48] sm:$0xe]  ;;  %v2369_v43 = vld [vmem:[#allocation2 + $0x54] sm:$0xe] }
 0x1e1   : > { %7713 = vmatprep.mubr.bf16.mxu1 %v6899_v56  ;;  %v6900_v13 = vcombine.low %v1756_v46, %v1766_v53  ;;  %v9378_v57 = vsel %vm9355_vm13, %v2424_v29, %v2425_v62  ;;  %v6936_v27 = vrot.slane %v2365_v55, 9  ;;  %v2436_v34 = vrot.slane %v8421_v49, 5  ;;  %7913 = vmatprep.subr.bf16.mxu0 %v8338_v41  ;;  %v8343_v56 = vld [vmem:[#allocation8 + $0x158] sm:$0xff]   ;;  %v2370_v15 = vld [vmem:[#allocation2 + $0x60] sm:$0xe] }
 0x1e2   : > { %v6950_v6 = vcombine.low %v9370_v30, %v9378_v57  ;;  %v9384_v61 = vsel %vm9355_vm13, %v6935_v24, %v2429_v10  ;;  %v2431_v22 = vrot.slane %v2429_v10, 4  ;;  %v2439_v12 = vrot.slane %v9136_v48, 5 }
 0x1e3   : > { %7834 = vmatmul.mubr.bf16.gmra.mxu0 %v8322_v45  ;;  %v9389_v46 = vsel %vm9355_vm13, %v6936_v27, %v2436_v34  ;;  %v2438_v39 = vrot.slane %v2436_v34, 4  ;;  %v6937_v20 = vrot.slane %v2366_v23, 9  ;;  %v2443_v33 = vrot.slane %v8422_v9, 5  ;;  %v2371_v45 = vld [vmem:[#allocation2 + $0x6c] sm:$0xe] }
 0x1e4   : > { %7837 = vmatprep.mubr.bf16.mxu0 %v8324_v5  ;;  %v9393_v50 = vsel %vm9355_vm13, %v2431_v22, %v2432_v11  ;;  %v2446_v44 = vrot.slane %v9171_v7, 5  ;;  %v6938_v25 = vrot.slane %v2367_v18, 9  ;;  %v2450_v48 = vrot.slane %v9122_v3, 5  ;;  %7914 = vmatpush3.bf16.msra.mxu0 %v8338_v41  ;;  %v8345_v34 = vld [vmem:[#allocation8 + $0x150] sm:$0xff]   ;;  %v2372_v9 = vld [vmem:[#allocation2 + $0x78] sm:$0xe] }
 0x1e5   : > { %v6951_v62 = vcombine.low %v9384_v61, %v9393_v50  ;;  %v9401_v24 = vsel %vm9355_vm13, %v2438_v39, %v2439_v12  ;;  %v9405_v55 = vsel %vm9355_vm13, %v6937_v20, %v2443_v33  ;;  %v2445_v23 = vrot.slane %v2443_v33, 4  ;;  %7915 = vmatprep.subr.bf16.mxu0 %v8340_v4  ;;  %v8327_v61 = vld [vmem:[#allocation2 + $0x54] sm:$0xff]   ;;  %v8326_v33 = vld [vmem:[#allocation8 + $0x130] sm:$0xff]  }
 0x1e6   : > { %7714 = vmatmul.mubr.bf16.gmra.mxu1 %v6900_v13  ;;  %v6952_v3 = vcombine.low %v9389_v46, %v9401_v24  ;;  %v9411_v7 = vsel %vm9355_vm13, %v6938_v25, %v2450_v48  ;;  %v2452_v41 = vrot.slane %v2450_v48, 4  ;;  %v2453_v60 = vrot.slane %v9196_v40, 5  ;;  %v8325_v13 = vld [vmem:[#allocation2 + $0x48] sm:$0xff]   ;;  %v2373_v48 = vld [vmem:[#allocation2 + $0x84] sm:$0xe] }
 0x1e7   : > { %7781 = vmatprep.mubr.bf16.mxu1 %v6949_v1  ;;  %v9416_v29 = vsel %vm9355_vm13, %v2445_v23, %v2446_v44  ;;  %v6939_v18 = vrot.slane %v2368_v0, 9  ;;  %v2457_v53 = vrot.slane %v9155_v14, 5  ;;  %v2460_v5 = vrot.slane %v9226_v42, 5 }
 0x1e8   : > { %v6953_v10 = vcombine.low %v9405_v55, %v9416_v29  ;;  %v9424_v11 = vsel %vm9355_vm13, %v2452_v41, %v2453_v60  ;;  %v6940_v40 = vrot.slane %v2369_v43, 9  ;;  %v2464_v1 = vrot.slane %v9190_v36, 5  ;;  %7916 = vmatpush3.bf16.msra.mxu0 %v8340_v4  ;;  %v2374_v41 = vld [vmem:[#allocation2 + $0x90] sm:$0xe]  ;;  %v8348_v60 = vld [vmem:[#allocation8 + $0x148] sm:$0xff]  }
 0x1e9   : > { %v6954_v27 = vcombine.low %v9411_v7, %v9424_v11  ;;  %v9431_v14 = vsel %vm9355_vm13, %v6939_v18, %v2457_v53  ;;  %v2459_v42 = vrot.slane %v2457_v53, 4  ;;  %v2467_v49 = vrot.slane %v9246_v37, 5  ;;  %7917 = vmatprep.subr.bf16.mxu0 %v8343_v56 }
 0x1ea   : > { %v9436_v22 = vsel %vm9355_vm13, %v6940_v40, %v2464_v1  ;;  %v2466_v36 = vrot.slane %v2464_v1, 4  ;;  %v6941_v4 = vrot.slane %v2370_v15, 9  ;;  %v2471_v12 = vrot.slane %v9212_v26, 5  ;;  %v8329_v15 = vld [vmem:[#allocation8 + $0x128] sm:$0xff]   ;;  %v9486_v40 = vld [vmem:[#allocation2 + $0x10] sm:$0xf] }
 0x1eb   : > { %7838 = vmatmul.mubr.bf16.gmra.mxu0 %v8325_v13  ;;  %v9441_v0 = vsel %vm9355_vm13, %v2459_v42, %v2460_v5  ;;  %v2474_v39 = vrot.slane %v9261_v19, 5  ;;  %v6942_v20 = vrot.slane %v2371_v45, 9  ;;  %v2478_v37 = vrot.slane %v9239_v52, 5  ;;  %v3987_v1 = vld [vmem:[#allocation2 + $0xc] sm:$0xe]  ;;  %v8328_v13 = vld [vmem:[#allocation2 + $0x60] sm:$0xff]  }
 0x1ec   : > { %7841 = vmatprep.mubr.bf16.mxu0 %v8327_v61  ;;  %v6955_v50 = vcombine.low %v9431_v14, %v9441_v0  ;;  %v9449_v44 = vsel %vm9355_vm13, %v2466_v36, %v2467_v49  ;;  %v9453_v26 = vsel %vm9355_vm13, %v6941_v4, %v2471_v12  ;;  %v2473_v25 = vrot.slane %v2471_v12, 4  ;;  %7918 = vmatpush3.bf16.msra.mxu0 %v8343_v56  ;;  %v9493_v36 = vld [vmem:[#allocation2 + $0x14] sm:$0x1]  ;;  %v8330_v4 = vld [vmem:[#allocation2 + $0x6c] sm:$0xff]  }
 0x1ed   : > { %v6956_v52 = vcombine.low %v9436_v22, %v9449_v44  ;;  %v9459_v19 = vsel %vm9355_vm13, %v6942_v20, %v2478_v37  ;;  %v2480_v43 = vrot.slane %v2478_v37, 4  ;;  %v2481_v23 = vrot.slane %v9278_v54, 5  ;;  %7919 = vmatprep.subr.bf16.mxu0 %v8345_v34  ;;  %v8349_v20 = vld [vmem:[#allocation8 + $0x140] sm:$0xff]   ;;  %v8336_v14 = vld [vmem:[#allocation2 + $0x90] sm:$0xff]  }
 0x1ee   : > { %7782 = vmatmul.mubr.bf16.vlgmr.msra.gmra.mxu1 %v6950_v6  ;;  %v9467_v56 = vsel %vm9355_vm13, %v2473_v25, %v2474_v39  ;;  %v6943_v45 = vrot.slane %v2372_v9, 9  ;;  %v2485_v18 = vrot.slane %v9251_v2, 5  ;;  %v2488_v53 = vrot.slane %v9288_v47, 5  ;;  %v2375_v6 = vld [vmem:[#allocation2 + $0x9c] sm:$0xe]  ;;  %v9653_v44 = vld [vmem:[#allocation8 + $0x1b8] sm:$0xff]  }
 0x1ef   : > { %7862 = vmatpush3.bf16.msra.mxu1 %v9216_v16  ;;  %7785 = vmatprep.mubr.bf16.mxu1 %v6951_v62  ;;  %v6957_v54 = vcombine.low %v9453_v26, %v9467_v56  ;;  %v9476_v5 = vsel %vm9355_vm13, %v2480_v43, %v2481_v23  ;;  %v6944_v30 = vrot.slane %v2373_v48, 9  ;;  %v2492_v57 = vrot.slane %v9271_v28, 5  ;;  %v2376_v48 = vld [vmem:[#allocation2 + $0xa8] sm:$0xe] }
 0x1f0   : > { %7863 = vmatprep.subr.bf16.mxu1 %v8326_v33  ;;  %v6958_v2 = vcombine.low %v9459_v19, %v9476_v5  ;;  %v9483_v16 = vsel %vm9355_vm13, %v6943_v45, %v2485_v18  ;;  %v2487_v47 = vrot.slane %v2485_v18, 4  ;;  %v2495_v62 = vrot.slane %v9301_v58, 5  ;;  %7920 = vmatpush3.bf16.msra.mxu0 %v8345_v34  ;;  %v9520_v45 = vld [vmem:[#allocation2 + $0x20] sm:$0x1]  ;;  %v8341_v26 = vld [vmem:[#allocation2 + $0xa8] sm:$0xff]  }
 0x1f1   : > { %v9490_v28 = vsel %vm9355_vm13, %v6944_v30, %v2492_v57  ;;  %v2494_v42 = vrot.slane %v2492_v57, 4  ;;  %v6945_v49 = vrot.slane %v2374_v41, 9  ;;  %v2499_v61 = vrot.slane %v9285_v38, 5  ;;  %7921 = vmatprep.subr.bf16.mxu0 %v8348_v60  ;;  %v3993_v5 = vld [vmem:[#allocation2 + $0x54] sm:$0xe] }
 0x1f2   : > { %v9497_v58 = vsel %vm9355_vm13, %v2487_v47, %v2488_v53  ;;  %v2502_v34 = vrot.slane %v9313_v8, 5  ;;  %v6946_v12 = vrot.slane %v2375_v6, 9  ;;  %v2506_v39 = vrot.slane %v9294_v21, 5  ;;  %v9511_v8 = vld [vmem:[#allocation2 + $0x1c] sm:$0xf] }
 0x1f3   : > { %7864 = vmatpush3.bf16.msra.mxu1 %v8326_v33  ;;  %7842 = vmatmul.mubr.bf16.gmra.mxu0 %v8328_v13  ;;  %v6959_v37 = vcombine.low %v9483_v16, %v9497_v58  ;;  %v9505_v38 = vsel %vm9355_vm13, %v2494_v42, %v2495_v62  ;;  %v9509_v9 = vsel %vm9355_vm13, %v6945_v49, %v2499_v61  ;;  %v2501_v25 = vrot.slane %v2499_v61, 4  ;;  %v8332_v21 = vld [vmem:[#allocation8 + $0x120] sm:$0xff]   ;;  %v9538_v13 = vld [vmem:[#allocation8 + $0x1f8] sm:$0xff]   ;;  %v8346_v16 = vld [vmem:[#allocation2 + $0xc0] sm:$0xff]  }
 0x1f4   : > { %7865 = vmatprep.subr.bf16.mxu1 %v8329_v15  ;;  %7845 = vmatprep.mubr.bf16.mxu0 %v8330_v4  ;;  %v6960_v33 = vcombine.low %v9490_v28, %v9505_v38  ;;  %v9517_v43 = vsel %vm9355_vm13, %v6946_v12, %v2506_v39  ;;  %v2508_v23 = vrot.slane %v2506_v39, 4  ;;  %v2509_v41 = vrot.slane %v9327_v31, 5  ;;  %v3988_v6 = vld [vmem:[#allocation2 + $0x18] sm:$0xe]  ;;  %v8337_v49 = vld [vmem:[#allocation8 + $0x118] sm:$0xff]  }
 0x1f5   : > { %v9524_v18 = vsel %vm9355_vm13, %v2501_v25, %v2502_v34  ;;  %7922 = vmatpush3.bf16.msra.mxu0 %v8348_v60  ;;  %v7021_v53 = vrot.slane %v3987_v1, 9  ;;  %v4053_v30 = vrot.slane %v9486_v40, 5  ;;  %v4056_v57 = vrot.slane %v9493_v36, 5  ;;  %v2377_v1 = vld [vmem:[#allocation2 + $0xb4] sm:$0xe]  ;;  %v8331_v4 = vld [vmem:[#allocation2 + $0x78] sm:$0xff]  }
 0x1f6   : > { %7786 = vmatmul.mubr.bf16.gmra.mxu1 %v6952_v3  ;;  %v6961_v31 = vcombine.low %v9509_v9, %v9524_v18  ;;  %v9535_v47 = vsel %vm9355_vm13, %v2508_v23, %v2509_v41  ;;  %v6947_v62 = vrot.slane %v2376_v48, 9  ;;  %v2513_v60 = vrot.slane %v9307_v51, 5  ;;  %7923 = vmatprep.subr.bf16.mxu0 %v8349_v20  ;;  %v9550_v51 = vld [vmem:[#allocation2 + $0x28] sm:$0xf]  ;;  %v3989_v25 = vld [vmem:[#allocation2 + $0x24] sm:$0xe] }
 0x1f7   : > { %7789 = vmatprep.mubr.bf16.mxu1 %v6953_v10  ;;  %7866 = vmatpush3.bf16.msra.mxu1 %v8329_v15  ;;  %v9547_v24 = vsel %vm9355_vm13, %v7021_v53, %v4053_v30  ;;  %v4055_v3 = vrot.slane %v4053_v30, 4  ;;  %v2516_v42 = vrot.slane %v9334_v63, 5  ;;  %v7022_v29 = vrot.slane %v3988_v6, 9  ;;  %v9557_v15 = vld [vmem:[#allocation2 + $0x2c] sm:$0x1]  ;;  %v8334_v48 = vld [vmem:[#allocation2 + $0x84] sm:$0xff]  }
 0x1f8   : > { %7867 = vmatprep.subr.bf16.mxu1 %v8332_v21  ;;  %v9554_v61 = vsel %vm9355_vm13, %v6947_v62, %v2513_v60  ;;  %v2515_v55 = vrot.slane %v2513_v60, 4  ;;  %v4060_v10 = vrot.slane %v9511_v8, 5  ;;  %v4063_v63 = vrot.slane %v9520_v45, 5  ;;  %v8342_v60 = vld [vmem:[#allocation8 + $0x110] sm:$0xff]  }
 0x1f9   : > { %v9561_v34 = vsel %vm9355_vm13, %v4055_v3, %v4056_v57  ;;  %7924 = vmatpush3.bf16.msra.mxu0 %v8349_v20  ;;  %v6948_v12 = vrot.slane %v2377_v1, 9  ;;  %v2520_v39 = vrot.slane %v9316_v35, 5  ;;  %v3233_v20 = vld [vmem:[#allocation2 + $0xc] sm:$0xf]  ;;  %v2523_v62 = vrot.slane %v9341_v32, 5 }
 0x1fa   : > { %v7037_v23 = vcombine.low %v9547_v24, %v9561_v34  ;;  %v9569_v41 = vsel %vm9355_vm13, %v2515_v55, %v2516_v42  ;;  %v9573_v53 = vsel %vm9355_vm13, %v7022_v29, %v4060_v10  ;;  %v4062_v30 = vrot.slane %v4060_v10, 4  ;;  %8005 = vmatprep.subr.bf16.mxu0 %v9538_v13  ;;  %v9736_v38 = vld [vmem:[#allocation2 + $0x68] sm:$0x1] }
 0x1fb   : > { %7846 = vmatmul.mubr.bf16.gmra.mxu0 %v8331_v4  ;;  %7868 = vmatpush3.bf16.msra.mxu1 %v8332_v21  ;;  %v9580_v57 = vsel %vm9355_vm13, %v6948_v12, %v2520_v39  ;;  %v2522_v6 = vrot.slane %v2520_v39, 4  ;;  %v7023_v3 = vrot.slane %v3989_v25, 9  ;;  %v4067_v21 = vrot.slane %v9550_v51, 5  ;;  %v9595_v4 = vld [vmem:[#allocation2 + $0x34] sm:$0xf] }
 0x1fc   : > { %7849 = vmatprep.mubr.bf16.mxu0 %v8334_v48  ;;  %7869 = vmatprep.subr.bf16.mxu1 %v8337_v49  ;;  %v9585_v1 = vsel %vm9355_vm13, %v4062_v30, %v4063_v63  ;;  %v4070_v42 = vrot.slane %v9557_v15, 5  ;;  %v3282_v32 = vshrl.u32 %v3233_v20, 16  ;;  %v3285_v10 = vshll.u32 %v3233_v20, 16  ;;  %v3990_v12 = vld [vmem:[#allocation2 + $0x30] sm:$0xe] }
 0x1fd   : > { %v9593_v29 = vsel %vm9355_vm13, %v2522_v6, %v2523_v62  ;;  %v9604_v39 = vsel %vm9355_vm13, %v7023_v3, %v4067_v21  ;;  %v4069_v25 = vrot.slane %v4067_v21, 4  ;;  %v3291_v48 = vshll.u32 %v9486_v40, 16  ;;  %v9607_v30 = vld [vmem:[#allocation2 + $0x38] sm:$0x1]  ;;  %v8347_v62 = vld [vmem:[#allocation8 + $0x108] sm:$0xff]  }
 0x1fe   : > { %7790 = vmatmul.mubr.bf16.gmra.mxu1 %v6954_v27  ;;  %v3284_v20 = vrot.slane %v3282_v32, 4  ;;  %v3287_v7 = vrot.slane %v3285_v10, 5  ;;  %v3295_v11 = vshrl.u32 %v9486_v40, 16  ;;  %v3301_v27 = vshll.u32 %v9493_v36, 16  ;;  %v3236_v6 = vld [vmem:[#allocation2 + $0x18] sm:$0xf] }
 0x1ff   : > { %7793 = vmatprep.mubr.bf16.mxu1 %v6955_v50  ;;  %7870 = vmatpush3.bf16.msra.mxu1 %v8337_v49  ;;  %v9616_v3 = vsel %vm9355_vm13, %v4069_v25, %v4070_v42  ;;  %v3293_v21 = vrot.slane %v3291_v48, 5  ;;  %v7024_v63 = vrot.slane %v3990_v12, 9  ;;  %v4074_v35 = vrot.slane %v9595_v4, 5  ;;  %v8339_v32 = vld [vmem:[#allocation2 + $0x9c] sm:$0xff]  }
 0x200   : > { %7871 = vmatprep.subr.bf16.mxu1 %v8342_v60  ;;  %v3288_v50 = vor.u32 %v3287_v7, %v3284_v20  ;;  %v3297_v49 = vrot.slane %v3295_v11, 4  ;;  %v3303_v40 = vrot.slane %v3301_v27, 5  ;;  %v4077_v42 = vrot.slane %v9607_v30, 5  ;;  %v3991_v48 = vld [vmem:[#allocation2 + $0x3c] sm:$0xe] }
 0x201   : > { %v9623_v36 = vsel %vm9355_vm13, %v7024_v63, %v4074_v35  ;;  %v4076_v10 = vrot.slane %v4074_v35, 4  ;;  %v3306_v25 = vshrl.u32 %v3236_v6, 16  ;;  %v3309_v55 = vshll.u32 %v3236_v6, 16  ;;  %v9627_v20 = vld [vmem:[#allocation2 + $0x40] sm:$0xf]  ;;  %v8350_v7 = vld [vmem:[#allocation8 + $0x100] sm:$0xff]  }
 0x202   : > { %v3289_v12 = vrot.slane %v3288_v50, 4  ;;  %v3298_v46 = vor.u32 %v3297_v49, %v3293_v21  ;;  %v3315_v0 = vshll.u32 %v9511_v8, 16  ;;  %v3319_v11 = vshrl.u32 %v9511_v8, 16 }
 0x203   : > { %7850 = vmatmul.mubr.bf16.gmra.mxu0 %v8336_v14  ;;  %7872 = vmatpush3.bf16.msra.mxu1 %v8342_v60  ;;  %v9631_v63 = vsel %vm9355_vm13, %v4076_v10, %v4077_v42  ;;  %v3308_v35 = vrot.slane %v3306_v25, 4  ;;  %v3325_v27 = vshll.u32 %v9520_v45, 16  ;;  %v9635_v60 = vld [vmem:[#allocation2 + $0x44] sm:$0x1]  ;;  %v3311_v49 = vrot.slane %v3309_v55, 5 }
 0x204   : > { %7853 = vmatprep.mubr.bf16.mxu0 %v8339_v32  ;;  %7873 = vmatprep.subr.bf16.mxu1 %v8347_v62  ;;  %v3294_v6 = vsel %vm8852_vm2, %v3289_v12, %v3293_v21  ;;  %v3299_v14 = vrot.slane %v3298_v46, 4  ;;  %v7040_v50 = vcombine.low %v9623_v36, %v9631_v63  ;;  %v3239_v32 = vld [vmem:[#allocation2 + $0x24] sm:$0xf]  ;;  %v3317_v10 = vrot.slane %v3315_v0, 5  ;;  %v9655_v12 = vld [vmem:[#allocation2 + $0x4c] sm:$0xf] }
 0x205   : > { %v3321_v42 = vrot.slane %v3319_v11, 4  ;;  %v3327_v8 = vrot.slane %v3325_v27, 5  ;;  %v7025_v25 = vrot.slane %v3991_v48, 9  ;;  %v3312_v46 = vor.u32 %v3311_v49, %v3308_v35  ;;  %v3992_v35 = vld [vmem:[#allocation2 + $0x48] sm:$0xe]  ;;  %v8344_v11 = vld [vmem:[#allocation2 + $0xb4] sm:$0xff]  }
 0x206   : > { %7794 = vmatmul.mubr.bf16.gmra.mxu1 %v6956_v52  ;;  %v3304_v45 = vsel %vm8852_vm2, %v3299_v14, %v3303_v40  ;;  %v4081_v55 = vrot.slane %v9627_v20, 5  ;;  %v4084_v21 = vrot.slane %v9635_v60, 5  ;;  %v3330_v0 = vshrl.u32 %v3239_v32, 16 }
 0x207   : > { %7797 = vmatprep.mubr.bf16.mxu1 %v6957_v54  ;;  %7874 = vmatpush3.bf16.msra.mxu1 %v8347_v62  ;;  %v9651_v22 = vcombine.low %v3294_v6, %v3304_v45  ;;  %v3322_v52 = vor.u32 %v3321_v42, %v3317_v10  ;;  %v3333_v48 = vshll.u32 %v3239_v32, 16  ;;  %v3313_v56 = vrot.slane %v3312_v46, 4  ;;  %v9670_v46 = vld [vmem:[#allocation2 + $0x50] sm:$0x1] }
 0x208   : > { %7875 = vmatprep.subr.bf16.mxu1 %v8350_v7  ;;  %v9659_v54 = vsel %vm9355_vm13, %v7025_v25, %v4081_v55  ;;  %v4083_v62 = vrot.slane %v4081_v55, 4  ;;  %v3339_v40 = vshll.u32 %v9550_v51, 16  ;;  %v3332_v6 = vrot.slane %v3330_v0, 4  ;;  %v3242_v55 = vld [vmem:[#allocation2 + $0x30] sm:$0xf] }
 0x209   : > { %v3323_v27 = vrot.slane %v3322_v52, 4  ;;  %v3335_v14 = vrot.slane %v3333_v48, 5  ;;  %v3343_v49 = vshrl.u32 %v9550_v51, 16  ;;  %v3318_v32 = vsel %vm8852_vm2, %v3313_v56, %v3317_v10 }
 0x20a   : > { %v9667_v42 = vsel %vm9355_vm13, %v4083_v62, %v4084_v21  ;;  %v3341_v25 = vrot.slane %v3339_v40, 5  ;;  %v3349_v45 = vshll.u32 %v9557_v15, 16  ;;  %v7026_v48 = vrot.slane %v3992_v35, 9  ;;  %v9684_v40 = vld [vmem:[#allocation2 + $0x58] sm:$0xf] }
 0x20b   : > { %7854 = vmatmul.mubr.bf16.gmra.mxu0 %v8341_v26  ;;  %7876 = vmatpush3.bf16.msra.mxu1 %v8350_v7  ;;  %v3328_v51 = vsel %vm8852_vm2, %v3323_v27, %v3327_v8  ;;  %v7041_v7 = vcombine.low %v9659_v54, %v9667_v42  ;;  %v3336_v10 = vor.u32 %v3335_v14, %v3332_v6  ;;  %v3345_v52 = vrot.slane %v3343_v49, 4  ;;  %v8361_v54 = vld [vmem:[#allocation8 + $0x1d8] sm:$0xff]  }
 0x20c   : > { %7857 = vmatprep.mubr.bf16.mxu0 %v8344_v11  ;;  %7957 = vmatprep.subr.bf16.mxu1 %v9653_v44  ;;  %v9677_v0 = vcombine.low %v3318_v32, %v3328_v51  ;;  %v3351_v21 = vrot.slane %v3349_v45, 5  ;;  %v4088_v15 = vrot.slane %v9655_v12, 5  ;;  %v4091_v62 = vrot.slane %v9670_v46, 5  ;;  %v9697_v32 = vld [vmem:[#allocation2 + $0x5c] sm:$0x1] }
 0x20d   : > { %v3337_v26 = vrot.slane %v3336_v10, 4  ;;  %v3346_v56 = vor.u32 %v3345_v52, %v3341_v25  ;;  %v3354_v8 = vshrl.u32 %v3242_v55, 16  ;;  %v3357_v27 = vshll.u32 %v3242_v55, 16  ;;  %v3245_v51 = vld [vmem:[#allocation2 + $0x3c] sm:$0xf] }
 0x20e   : > { %7798 = vmatmul.mubr.bf16.gmra.mxu1 %v6958_v2  ;;  %v9691_v35 = vsel %vm9355_vm13, %v7026_v48, %v4088_v15  ;;  %v4090_v11 = vrot.slane %v4088_v15, 4  ;;  %v3363_v19 = vshll.u32 %v9595_v4, 16  ;;  %v3367_v49 = vshrl.u32 %v9595_v4, 16 }
 0x20f   : > { %7801 = vmatprep.mubr.bf16.mxu1 %v6959_v37  ;;  %v3342_v2 = vsel %vm8852_vm2, %v3337_v26, %v3341_v25  ;;  %v3347_v6 = vrot.slane %v3346_v56, 4  ;;  %v3356_v14 = vrot.slane %v3354_v8, 4  ;;  %v3359_v37 = vrot.slane %v3357_v27, 5 }
 0x210   : > { %v9701_v58 = vsel %vm9355_vm13, %v4090_v11, %v4091_v62  ;;  %v3365_v45 = vrot.slane %v3363_v19, 5  ;;  %v3373_v55 = vshll.u32 %v9607_v30, 16  ;;  %v3369_v52 = vrot.slane %v3367_v49, 4 }
 0x211   : > { %v3352_v10 = vsel %vm8852_vm2, %v3347_v6, %v3351_v21  ;;  %v7042_v25 = vcombine.low %v9691_v35, %v9701_v58  ;;  %v7027_v4 = vrot.slane %v3993_v5, 9  ;;  %v3360_v15 = vor.u32 %v3359_v37, %v3356_v14  ;;  %v3994_v14 = vld [vmem:[#allocation2 + $0x60] sm:$0xe] }
 0x212   : > { %v9708_v48 = vcombine.low %v3342_v2, %v3352_v10  ;;  %v3375_v26 = vrot.slane %v3373_v55, 5  ;;  %v4095_v56 = vrot.slane %v9684_v40, 5  ;;  %v3370_v30 = vor.u32 %v3369_v52, %v3365_v45  ;;  %v9720_v2 = vld [vmem:[#allocation2 + $0x64] sm:$0xf]  ;;  %v8356_v52 = vld [vmem:[#allocation8 + $0x1f0] sm:$0xff]  }
 0x213   : > { %7858 = vmatmul.mubr.bf16.gmra.mxu0 %v8346_v16  ;;  %v4098_v62 = vrot.slane %v9697_v32, 5  ;;  %v3378_v21 = vshrl.u32 %v3245_v51, 16  ;;  %v3381_v8 = vshll.u32 %v3245_v51, 16  ;;  %v3361_v11 = vrot.slane %v3360_v15, 4 }
 0x214   : > { %7925 = vmatprep.mubr.bf16.mxu0 %v7037_v23  ;;  %v9717_v27 = vsel %vm9355_vm13, %v7027_v4, %v4095_v56  ;;  %v4097_v19 = vrot.slane %v4095_v56, 4  ;;  %v3387_v5 = vshll.u32 %v9627_v20, 16  ;;  %v3371_v24 = vrot.slane %v3370_v30, 4 }
 0x215   : > { %v3380_v34 = vrot.slane %v3378_v21, 4  ;;  %v3383_v23 = vrot.slane %v3381_v8, 5  ;;  %v3391_v6 = vshrl.u32 %v9627_v20, 16  ;;  %v3366_v49 = vsel %vm8852_vm2, %v3361_v11, %v3365_v45  ;;  %v3995_v11 = vld [vmem:[#allocation2 + $0x6c] sm:$0xe] }
 0x216   : > { %7802 = vmatmul.mubr.bf16.gmra.mxu1 %v6960_v33  ;;  %v9733_v16 = vsel %vm9355_vm13, %v4097_v19, %v4098_v62  ;;  %v3389_v37 = vrot.slane %v3387_v5, 5  ;;  %v3397_v28 = vshll.u32 %v9635_v60, 16  ;;  %v3248_v33 = vld [vmem:[#allocation2 + $0x48] sm:$0xf]  ;;  %v3376_v20 = vsel %vm8852_vm2, %v3371_v24, %v3375_v26 }
 0x217   : > { %7805 = vmatprep.mubr.bf16.mxu1 %v6961_v31  ;;  %v7043_v9 = vcombine.low %v9717_v27, %v9733_v16  ;;  %v3384_v18 = vor.u32 %v3383_v23, %v3380_v34  ;;  %v3393_v31 = vrot.slane %v3391_v6, 4  ;;  %v9742_v55 = vcombine.low %v3366_v49, %v3376_v20  ;;  %v8358_v49 = vld [vmem:[#allocation8 + $0x1e8] sm:$0xff]  }
 0x218   : > { %v3399_v45 = vrot.slane %v3397_v28, 5  ;;  %v7028_v51 = vrot.slane %v3994_v14, 9  ;;  %v4102_v10 = vrot.slane %v9720_v2, 5  ;;  %v4105_v15 = vrot.slane %v9736_v38, 5 }
 0x219   : > { %v3385_v4 = vrot.slane %v3384_v18, 4  ;;  %v3394_v60 = vor.u32 %v3393_v31, %v3389_v37  ;;  %v3402_v56 = vshrl.u32 %v3248_v33, 16  ;;  %v11271_v26 = vcombine.low %v9573_v53, %v9585_v1  ;;  %v9760_v1 = vld [vmem:[#allocation2 + $0x74] sm:$0x1] }
 0x21a   : > { %v9751_v30 = vsel %vm9355_vm13, %v7028_v51, %v4102_v10  ;;  %v4104_v62 = vrot.slane %v4102_v10, 4  ;;  %v3405_v21 = vshll.u32 %v3248_v33, 16  ;;  %v3411_v8 = vshll.u32 %v9655_v12, 16  ;;  %v9775_v33 = vld [vmem:[#allocation2 + $0x70] sm:$0xf] }
 0x21b   : > { %7926 = vmatmul.mubr.bf16.vlgmr.msra.gmra.mxu0 %v11271_v26  ;;  %v11272_v19 = vcombine.low %v9604_v39, %v9616_v3  ;;  %v3390_v5 = vsel %vm8852_vm2, %v3385_v4, %v3389_v37  ;;  %v3395_v24 = vrot.slane %v3394_v60, 4  ;;  %v3404_v34 = vrot.slane %v3402_v56, 4  ;;  %v3251_v3 = vld [vmem:[#allocation2 + $0x54] sm:$0xf] }
 0x21c   : > { %v3415_v53 = vshrl.u32 %v9655_v12, 16  ;;  %8006 = vmatpush3.bf16.msra.mxu0 %v9538_v13  ;;  %v9765_v23 = vsel %vm9355_vm13, %v4104_v62, %v4105_v15  ;;  %v3407_v6 = vrot.slane %v3405_v21, 5  ;;  %v3413_v14 = vrot.slane %v3411_v8, 5 }
 0x21d   : > { %7929 = vmatprep.mubr.bf16.mxu0 %v11272_v19  ;;  %v3421_v39 = vshll.u32 %v9670_v46, 16  ;;  %8007 = vmatprep.subr.bf16.mxu0 %v8356_v52  ;;  %v11273_v37 = vcombine.low %v9517_v43, %v9535_v47  ;;  %v3400_v12 = vsel %vm8852_vm2, %v3395_v24, %v3399_v45  ;;  %v7044_v13 = vcombine.low %v9751_v30, %v9765_v23 }
 0x21e   : > { %v3417_v28 = vrot.slane %v3415_v53, 4  ;;  %v7029_v20 = vrot.slane %v3995_v11, 9  ;;  %v11274_v46 = vcombine.low %v9554_v61, %v9569_v41  ;;  %v9780_v18 = vcombine.low %v3390_v5, %v3400_v12  ;;  %v8359_v41 = vld [vmem:[#allocation8 + $0x1e0] sm:$0xff]   ;;  %v3254_v53 = vld [vmem:[#allocation2 + $0x60] sm:$0xf] }
 0x21f   : > { %7806 = vmatmul.mubr.bf16.gmra.mxu1 %v11273_v37  ;;  %v3408_v31 = vor.u32 %v3407_v6, %v3404_v34  ;;  %v3423_v51 = vrot.slane %v3421_v39, 5  ;;  %v4109_v43 = vrot.slane %v9775_v33, 5  ;;  %v4112_v45 = vrot.slane %v9760_v1, 5  ;;  %v3996_v11 = vld [vmem:[#allocation2 + $0x78] sm:$0xe] }
 0x220   : > { %7809 = vmatprep.mubr.bf16.mxu1 %v11274_v46  ;;  %v3418_v47 = vor.u32 %v3417_v28, %v3413_v14  ;;  %v3426_v10 = vshrl.u32 %v3251_v3, 16  ;;  %v3429_v4 = vshll.u32 %v3251_v3, 16  ;;  %8008 = vmatpush3.bf16.msra.mxu0 %v8356_v52  ;;  %v3435_v61 = vshll.u32 %v9684_v40, 16  ;;  %v9800_v34 = vld [vmem:[#allocation2 + $0x80] sm:$0x1] }
 0x221   : > { %v3409_v60 = vrot.slane %v3408_v31, 4  ;;  %v9786_v15 = vsel %vm9355_vm13, %v7029_v20, %v4109_v43  ;;  %v4111_v56 = vrot.slane %v4109_v43, 4  ;;  %8009 = vmatprep.subr.bf16.mxu0 %v8358_v49  ;;  %v3439_v8 = vshrl.u32 %v9684_v40, 16  ;;  %v9809_v6 = vld [vmem:[#allocation2 + $0x7c] sm:$0xf] }
 0x222   : > { %v3419_v26 = vrot.slane %v3418_v47, 4  ;;  %v3428_v62 = vrot.slane %v3426_v10, 4  ;;  %v3431_v21 = vrot.slane %v3429_v4, 5  ;;  %v3437_v5 = vrot.slane %v3435_v61, 5  ;;  %v8362_v61 = vld [vmem:[#allocation8 + $0x1d0] sm:$0xff]  }
 0x223   : > { %7930 = vmatmul.mubr.bf16.gmra.mxu0 %v7040_v50  ;;  %v3414_v52 = vsel %vm8852_vm2, %v3409_v60, %v3413_v14  ;;  %v9797_v19 = vsel %vm9355_vm13, %v4111_v56, %v4112_v45  ;;  %v3445_v24 = vshll.u32 %v9697_v32, 16  ;;  %v3441_v40 = vrot.slane %v3439_v8, 4  ;;  %v9827_v45 = vld [vmem:[#allocation2 + $0x8c] sm:$0x1] }
 0x224   : > { %7933 = vmatprep.mubr.bf16.mxu0 %v7041_v7  ;;  %v3424_v36 = vsel %vm8852_vm2, %v3419_v26, %v3423_v51  ;;  %v7045_v63 = vcombine.low %v9786_v15, %v9797_v19  ;;  %v3432_v50 = vor.u32 %v3431_v21, %v3428_v62  ;;  %8010 = vmatpush3.bf16.msra.mxu0 %v8358_v49  ;;  %v7030_v39 = vrot.slane %v3996_v11, 9  ;;  %v3997_v51 = vld [vmem:[#allocation2 + $0x84] sm:$0xe]  ;;  %v3257_v56 = vld [vmem:[#allocation2 + $0x6c] sm:$0xf] }
 0x225   : > { %v9811_v14 = vcombine.low %v3414_v52, %v3424_v36  ;;  %v3447_v32 = vrot.slane %v3445_v24, 5  ;;  %v4116_v3 = vrot.slane %v9809_v6, 5  ;;  %8011 = vmatprep.subr.bf16.mxu0 %v8359_v41  ;;  %v11275_v42 = vcombine.low %v9580_v57, %v9593_v29  ;;  %v9838_v21 = vld [vmem:[#allocation2 + $0x88] sm:$0xf] }
 0x226   : > { %v3433_v7 = vrot.slane %v3432_v50, 4  ;;  %v3442_v37 = vor.u32 %v3441_v40, %v3437_v5  ;;  %v4119_v12 = vrot.slane %v9800_v34, 5  ;;  %v3450_v28 = vshrl.u32 %v3254_v53, 16 }
 0x227   : > { %7810 = vmatmul.mubr.bf16.gmra.mxu1 %v11275_v42  ;;  %v9821_v49 = vsel %vm9355_vm13, %v7030_v39, %v4116_v3  ;;  %v4118_v20 = vrot.slane %v4116_v3, 4  ;;  %v3453_v46 = vshll.u32 %v3254_v53, 16  ;;  %v3459_v31 = vshll.u32 %v9720_v2, 16  ;;  %v3998_v3 = vld [vmem:[#allocation2 + $0x90] sm:$0xe] }
 0x228   : > { %7877 = vmatprep.mubr.bf16.mxu1 %v9651_v22  ;;  %v3438_v57 = vsel %vm8852_vm2, %v3433_v7, %v3437_v5  ;;  %v3443_v29 = vrot.slane %v3442_v37, 4  ;;  %v3452_v43 = vrot.slane %v3450_v28, 4  ;;  %v3463_v47 = vshrl.u32 %v9720_v2, 16  ;;  %8012 = vmatpush3.bf16.msra.mxu0 %v8359_v41  ;;  %v8352_v5 = vld [vmem:[#allocation8 + $0x1b0] sm:$0xff]   ;;  %v9866_v37 = vld [vmem:[#allocation2 + $0x98] sm:$0x1] }
 0x229   : > { %v9831_v22 = vsel %vm9355_vm13, %v4118_v20, %v4119_v12  ;;  %v3455_v10 = vrot.slane %v3453_v46, 5  ;;  %v3461_v4 = vrot.slane %v3459_v31, 5  ;;  %v3469_v60 = vshll.u32 %v9736_v38, 16  ;;  %8013 = vmatprep.subr.bf16.mxu0 %v8361_v54  ;;  %v3260_v12 = vld [vmem:[#allocation2 + $0x78] sm:$0xf] }
 0x22a   : > { %v3448_v26 = vsel %vm8852_vm2, %v3443_v29, %v3447_v32  ;;  %v7046_v2 = vcombine.low %v9821_v49, %v9831_v22  ;;  %v3465_v62 = vrot.slane %v3463_v47, 4  ;;  %v7031_v41 = vrot.slane %v3997_v51, 9  ;;  %v8364_v32 = vld [vmem:[#allocation8 + $0x1c8] sm:$0xff]   ;;  %v9872_v46 = vld [vmem:[#allocation2 + $0x94] sm:$0xf] }
 0x22b   : > { %7934 = vmatmul.mubr.bf16.gmra.mxu0 %v7042_v25  ;;  %v9843_v8 = vcombine.low %v3438_v57, %v3448_v26  ;;  %v3456_v38 = vor.u32 %v3455_v10, %v3452_v43  ;;  %v3471_v11 = vrot.slane %v3469_v60, 5  ;;  %v4123_v52 = vrot.slane %v9838_v21, 5 }
 0x22c   : > { %7937 = vmatprep.mubr.bf16.mxu0 %v7043_v9  ;;  %v3466_v24 = vor.u32 %v3465_v62, %v3461_v4  ;;  %v4126_v53 = vrot.slane %v9827_v45, 5  ;;  %v3474_v36 = vshrl.u32 %v3257_v56, 16  ;;  %v3477_v50 = vshll.u32 %v3257_v56, 16  ;;  %8014 = vmatpush3.bf16.msra.mxu0 %v8361_v54  ;;  %v3999_v62 = vld [vmem:[#allocation2 + $0x9c] sm:$0xe] }
 0x22d   : > { %v3457_v40 = vrot.slane %v3456_v38, 4  ;;  %v9852_v35 = vsel %vm9355_vm13, %v7031_v41, %v4123_v52  ;;  %v4125_v58 = vrot.slane %v4123_v52, 4  ;;  %v3483_v25 = vshll.u32 %v9775_v33, 16  ;;  %8015 = vmatprep.subr.bf16.mxu0 %v8362_v61  ;;  %v8354_v41 = vld [vmem:[#allocation8 + $0x1a0] sm:$0xff]  }
 0x22e   : > { %v3467_v27 = vrot.slane %v3466_v24, 4  ;;  %v3476_v16 = vrot.slane %v3474_v36, 4  ;;  %v3479_v9 = vrot.slane %v3477_v50, 5  ;;  %v3487_v39 = vshrl.u32 %v9775_v33, 16  ;;  %v8353_v33 = vld [vmem:[#allocation8 + $0x1a8] sm:$0xff]  }
 0x22f   : > { %7878 = vmatmul.mubr.bf16.vlgmr.msra.gmra.mxu1 %v9677_v0  ;;  %v3462_v54 = vsel %vm8852_vm2, %v3457_v40, %v3461_v4  ;;  %v9863_v42 = vsel %vm9355_vm13, %v4125_v58, %v4126_v53  ;;  %v3485_v7 = vrot.slane %v3483_v25, 5  ;;  %v3493_v0 = vshll.u32 %v9760_v1, 16  ;;  %v8365_v4 = vld [vmem:[#allocation8 + $0x1c0] sm:$0xff]   ;;  %v9897_v36 = vld [vmem:[#allocation2 + $0xa4] sm:$0x1]  ;;  %v8357_v25 = vld [vmem:[#allocation8 + $0x198] sm:$0xff]  }
 0x230   : > { %7958 = vmatpush3.bf16.msra.mxu1 %v9653_v44  ;;  %7881 = vmatprep.mubr.bf16.mxu1 %v9708_v48  ;;  %v3472_v44 = vsel %vm8852_vm2, %v3467_v27, %v3471_v11  ;;  %v7047_v48 = vcombine.low %v9852_v35, %v9863_v42  ;;  %v3480_v28 = vor.u32 %v3479_v9, %v3476_v16  ;;  %v3489_v20 = vrot.slane %v3487_v39, 4  ;;  %v3263_v11 = vld [vmem:[#allocation2 + $0x84] sm:$0xf] }
 0x231   : > { %7959 = vmatprep.subr.bf16.mxu1 %v8352_v5  ;;  %8016 = vmatpush3.bf16.msra.mxu0 %v8362_v61  ;;  %v9874_v31 = vcombine.low %v3462_v54, %v3472_v44  ;;  %v3495_v51 = vrot.slane %v3493_v0, 5  ;;  %v7032_v1 = vrot.slane %v3998_v3, 9  ;;  %v4130_v57 = vrot.slane %v9872_v46, 5  ;;  %v4000_v44 = vld [vmem:[#allocation2 + $0xa8] sm:$0xe] }
 0x232   : > { %8017 = vmatprep.subr.bf16.mxu0 %v8364_v32  ;;  %v3481_v29 = vrot.slane %v3480_v28, 4  ;;  %v3490_v43 = vor.u32 %v3489_v20, %v3485_v7  ;;  %v4133_v47 = vrot.slane %v9866_v37, 5  ;;  %v3498_v10 = vshrl.u32 %v3260_v12, 16 }
 0x233   : > { %7938 = vmatmul.mubr.bf16.gmra.mxu0 %v7044_v13  ;;  %v9883_v60 = vsel %vm9355_vm13, %v7032_v1, %v4130_v57  ;;  %v4132_v56 = vrot.slane %v4130_v57, 4  ;;  %v3501_v61 = vshll.u32 %v3260_v12, 16  ;;  %v3507_v26 = vshll.u32 %v9809_v6, 16  ;;  %v9925_v57 = vld [vmem:[#allocation2 + $0xb0] sm:$0x1] }
 0x234   : > { %7960 = vmatpush3.bf16.msra.mxu1 %v8352_v5  ;;  %7941 = vmatprep.mubr.bf16.mxu0 %v7045_v63  ;;  %v3486_v38 = vsel %vm8852_vm2, %v3481_v29, %v3485_v7  ;;  %v3491_v30 = vrot.slane %v3490_v43, 4  ;;  %v3500_v23 = vrot.slane %v3498_v10, 4  ;;  %v3511_v13 = vshrl.u32 %v9809_v6, 16  ;;  %v9904_v6 = vld [vmem:[#allocation2 + $0xa0] sm:$0xf] }
 0x235   : > { %7961 = vmatprep.subr.bf16.mxu1 %v8353_v33  ;;  %v9894_v52 = vsel %vm9355_vm13, %v4132_v56, %v4133_v47  ;;  %v3503_v5 = vrot.slane %v3501_v61, 5  ;;  %v3509_v24 = vrot.slane %v3507_v26, 5  ;;  %v3517_v53 = vshll.u32 %v9800_v34, 16  ;;  %8018 = vmatpush3.bf16.msra.mxu0 %v8364_v32  ;;  %v3266_v29 = vld [vmem:[#allocation2 + $0x90] sm:$0xf]  ;;  %v8360_v47 = vld [vmem:[#allocation8 + $0x190] sm:$0xff]  }
 0x236   : > { %v3496_v15 = vsel %vm8852_vm2, %v3491_v30, %v3495_v51  ;;  %v7048_v19 = vcombine.low %v9883_v60, %v9894_v52  ;;  %v3513_v63 = vrot.slane %v3511_v13, 4  ;;  %v7033_v50 = vrot.slane %v3999_v62, 9  ;;  %8019 = vmatprep.subr.bf16.mxu0 %v8365_v4  ;;  %v9933_v43 = vld [vmem:[#allocation2 + $0xac] sm:$0xf]  ;;  %v4001_v30 = vld [vmem:[#allocation2 + $0xb4] sm:$0xe] }
 0x237   : > { %7882 = vmatmul.mubr.bf16.gmra.mxu1 %v9742_v55  ;;  %v9907_v34 = vcombine.low %v3486_v38, %v3496_v15  ;;  %v3504_v40 = vor.u32 %v3503_v5, %v3500_v23  ;;  %v3519_v58 = vrot.slane %v3517_v53, 5  ;;  %v4137_v55 = vrot.slane %v9904_v6, 5  ;;  %v3269_v5 = vld [vmem:[#allocation2 + $0x9c] sm:$0xf] }
 0x238   : > { %7885 = vmatprep.mubr.bf16.mxu1 %v9780_v18  ;;  %7962 = vmatpush3.bf16.msra.mxu1 %v8353_v33  ;;  %v3514_v32 = vor.u32 %v3513_v63, %v3509_v24  ;;  %v4140_v27 = vrot.slane %v9897_v36, 5  ;;  %v3522_v16 = vshrl.u32 %v3263_v11, 16  ;;  %v3525_v9 = vshll.u32 %v3263_v11, 16 }
 0x239   : > { %7963 = vmatprep.subr.bf16.mxu1 %v8354_v41  ;;  %v3505_v39 = vrot.slane %v3504_v40, 4  ;;  %v9913_v3 = vsel %vm9355_vm13, %v7033_v50, %v4137_v55  ;;  %v4139_v18 = vrot.slane %v4137_v55, 4  ;;  %v3531_v54 = vshll.u32 %v9838_v21, 16  ;;  %8020 = vmatpush3.bf16.msra.mxu0 %v8365_v4  ;;  %v9952_v50 = vld [vmem:[#allocation2 + $0xbc] sm:$0x1] }
 0x23a   : > { %v3515_v7 = vrot.slane %v3514_v32, 4  ;;  %v3524_v0 = vrot.slane %v3522_v16, 4  ;;  %v3527_v12 = vrot.slane %v3525_v9, 5  ;;  %v3535_v33 = vshrl.u32 %v9838_v21, 16 }
 0x23b   : > { %7942 = vmatmul.mubr.bf16.gmra.mxu0 %v7046_v2  ;;  %v3510_v28 = vsel %vm8852_vm2, %v3505_v39, %v3509_v24  ;;  %v4141_v20 = vsel %vm9355_vm13, %v4139_v18, %v4140_v27  ;;  %v3533_v51 = vrot.slane %v3531_v54, 5  ;;  %v3541_v1 = vshll.u32 %v9827_v45, 16 }
 0x23c   : > { %7964 = vmatpush3.bf16.msra.mxu1 %v8354_v41  ;;  %7945 = vmatprep.mubr.bf16.mxu0 %v7047_v48  ;;  %v3520_v49 = vsel %vm8852_vm2, %v3515_v7, %v3519_v58  ;;  %v7049_v22 = vcombine.low %v9913_v3, %v4141_v20  ;;  %v3528_v2 = vor.u32 %v3527_v12, %v3524_v0  ;;  %v3537_v21 = vrot.slane %v3535_v33, 4  ;;  %v8366_v7 = vld [vmem:[#allocation8 + $0x180] sm:$0xff]  }
 0x23d   : > { %7965 = vmatprep.subr.bf16.mxu1 %v8357_v25  ;;  %v9935_v10 = vcombine.low %v3510_v28, %v3520_v49  ;;  %v3543_v45 = vrot.slane %v3541_v1, 5  ;;  %v7034_v4 = vrot.slane %v4000_v44, 9  ;;  %v4144_v56 = vrot.slane %v9933_v43, 5 }
 0x23e   : > { %v3529_v35 = vrot.slane %v3528_v2, 4  ;;  %v3538_v42 = vor.u32 %v3537_v21, %v3533_v51  ;;  %v4147_v48 = vrot.slane %v9925_v57, 5  ;;  %v3546_v61 = vshrl.u32 %v3266_v29, 16  ;;  %v9981_v2 = vld [vmem:[#allocation2 + $0xc8] sm:$0x1] }
 0x23f   : > { %7886 = vmatmul.mubr.bf16.gmra.mxu1 %v9811_v14  ;;  %v9943_v26 = vsel %vm9355_vm13, %v7034_v4, %v4144_v56  ;;  %v4146_v62 = vrot.slane %v4144_v56, 4  ;;  %v3549_v41 = vshll.u32 %v3266_v29, 16  ;;  %v3555_v38 = vshll.u32 %v9872_v46, 16  ;;  %v9987_v4 = vld [vmem:[#allocation2 + $0xc4] sm:$0xf]  ;;  %v9989_v56 = vld [vmem:[#allocation8 + $0x238] sm:$0xff]  }
 0x240   : > { %7889 = vmatprep.mubr.bf16.mxu1 %v9843_v8  ;;  %7966 = vmatpush3.bf16.msra.mxu1 %v8357_v25  ;;  %v3534_v14 = vsel %vm8852_vm2, %v3529_v35, %v3533_v51  ;;  %v3539_v23 = vrot.slane %v3538_v42, 4  ;;  %v3548_v13 = vrot.slane %v3546_v61, 4  ;;  %v3559_v11 = vshrl.u32 %v9872_v46, 16  ;;  %v8363_v8 = vld [vmem:[#allocation8 + $0x188] sm:$0xff]   ;;  %v9957_v25 = vld [vmem:[#allocation2 + $0xb8] sm:$0xf] }
 0x241   : > { %7967 = vmatprep.subr.bf16.mxu1 %v8360_v47  ;;  %v4148_v24 = vsel %vm9355_vm13, %v4146_v62, %v4147_v48  ;;  %v3551_v53 = vrot.slane %v3549_v41, 5  ;;  %v3557_v15 = vrot.slane %v3555_v38, 5  ;;  %v3565_v63 = vshll.u32 %v9866_v37, 16  ;;  %v4002_v51 = vld [vmem:[#allocation2 + $0xc0] sm:$0xe] }
 0x242   : > { %v3544_v40 = vsel %vm8852_vm2, %v3539_v23, %v3543_v45  ;;  %v7050_v58 = vcombine.low %v9943_v26, %v4148_v24  ;;  %v3561_v55 = vrot.slane %v3559_v11, 4  ;;  %v7035_v46 = vrot.slane %v4001_v30, 9  ;;  %v9965_v9 = vpop.f32.mrf.mxu0  ;;  %v4872_v11 = vld [vmem:[#allocation2 + $0x18] sm:$0xf] }
 0x243   : > { %7946 = vmatmul.mubr.bf16.gmra.mxu0 %v7048_v19  ;;  %v9962_v32 = vcombine.low %v3534_v14, %v3544_v40  ;;  %v3552_v27 = vor.u32 %v3551_v53, %v3548_v13  ;;  %v3567_v16 = vrot.slane %v3565_v63, 5  ;;  %v4151_v37 = vrot.slane %v9957_v25, 5 }
 0x244   : > { %7968 = vmatpush3.bf16.msra.mxu1 %v8360_v47  ;;  %7949 = vmatprep.mubr.bf16.mxu0 %v7049_v22  ;;  %v3562_v39 = vor.u32 %v3561_v55, %v3557_v15  ;;  %v4154_v3 = vrot.slane %v9952_v50, 5  ;;  %v3570_v18 = vshrl.u32 %v3269_v5, 16  ;;  %v3573_v54 = vshll.u32 %v3269_v5, 16  ;;  %v9971_v12 = vpop.f32.mrf.mxu0  ;;  %v10007_v55 = vld [vmem:[#allocation2 + $0x1c] sm:$0xf] }
 0x245   : > { %7969 = vmatprep.subr.bf16.mxu1 %v8363_v8  ;;  %v3553_v0 = vrot.slane %v3552_v27, 4  ;;  %v4152_v60 = vsel %vm9355_vm13, %v7035_v46, %v4151_v37  ;;  %v4153_v52 = vrot.slane %v4151_v37, 4  ;;  %v3579_v19 = vshll.u32 %v9904_v6, 16  ;;  %v10012_v37 = vld [vmem:[#allocation2 + $0x20] sm:$0x1] }
 0x246   : > { %v3563_v33 = vrot.slane %v3562_v39, 4  ;;  %v3572_v44 = vrot.slane %v3570_v18, 4  ;;  %v3575_v28 = vrot.slane %v3573_v54, 5  ;;  %v3583_v20 = vshrl.u32 %v9904_v6, 16  ;;  %v9983_v21 = vpop.f32.mrf.mxu0  ;;  %v3275_v39 = vld [vmem:[#allocation2 + $0xb4] sm:$0xf] }
 0x247   : > { %7890 = vmatmul.mubr.bf16.gmra.mxu1 %v9874_v31  ;;  %v3558_v1 = vsel %vm8852_vm2, %v3553_v0, %v3557_v15  ;;  %v4155_v29 = vsel %vm9355_vm13, %v4153_v52, %v4154_v3  ;;  %v3581_v49 = vrot.slane %v3579_v19, 5  ;;  %v3589_v22 = vshll.u32 %v9897_v36, 16  ;;  %v3272_v31 = vld [vmem:[#allocation2 + $0xa8] sm:$0xf] }
 0x248   : > { %7893 = vmatprep.mubr.bf16.mxu1 %v9907_v34  ;;  %7970 = vmatpush3.bf16.msra.mxu1 %v8363_v8  ;;  %v3568_v6 = vsel %vm8852_vm2, %v3563_v33, %v3567_v16  ;;  %v7051_v47 = vcombine.low %v4152_v60, %v4155_v29  ;;  %v3576_v34 = vor.u32 %v3575_v28, %v3572_v44  ;;  %v3585_v45 = vrot.slane %v3583_v20, 4  ;;  %v9995_v38 = vpop.f32.mrf.mxu0 }
 0x249   : > { %7971 = vmatprep.subr.bf16.mxu1 %v8366_v7  ;;  %v9991_v35 = vcombine.low %v3558_v1, %v3568_v6  ;;  %v3591_v36 = vrot.slane %v3589_v22, 5  ;;  %v7036_v42 = vrot.slane %v4002_v51, 9  ;;  %v4158_v48 = vrot.slane %v9987_v4, 5 }
 0x24a   : > { %v3577_v61 = vrot.slane %v3576_v34, 4  ;;  %v3586_v26 = vor.u32 %v3585_v45, %v3581_v49  ;;  %v4161_v62 = vrot.slane %v9981_v2, 5  ;;  %v3594_v41 = vshrl.u32 %v3272_v31, 16  ;;  %v10014_v3 = vpop.f32.mrf.mxu0 }
 0x24b   : > { %7950 = vmatmul.mubr.bf16.gmra.mxu0 %v7050_v58  ;;  %v4159_v30 = vsel %vm9355_vm13, %v7036_v42, %v4158_v48  ;;  %v4160_v14 = vrot.slane %v4158_v48, 4  ;;  %v3597_v23 = vshll.u32 %v3272_v31, 16  ;;  %v3603_v13 = vshll.u32 %v9933_v43, 16 }
 0x24c   : > { %7972 = vmatpush3.bf16.msra.mxu1 %v8366_v7  ;;  %7953 = vmatprep.mubr.bf16.mxu0 %v7051_v47  ;;  %v3582_v5 = vsel %vm8852_vm2, %v3577_v61, %v3581_v49  ;;  %v3587_v8 = vrot.slane %v3586_v26, 4  ;;  %v3596_v24 = vrot.slane %v3594_v41, 4  ;;  %v3607_v53 = vshrl.u32 %v9933_v43, 16  ;;  %v4875_v47 = vld [vmem:[#allocation2 + $0x24] sm:$0xf] }
 0x24d   : > { %8053 = vmatprep.subr.bf16.mxu1 %v9989_v56  ;;  %v4162_v15 = vsel %vm9355_vm13, %v4160_v14, %v4161_v62  ;;  %v3599_v63 = vrot.slane %v3597_v23, 5  ;;  %v3605_v40 = vrot.slane %v3603_v13, 5  ;;  %v3613_v58 = vshll.u32 %v9925_v57, 16  ;;  %v10029_v41 = vld [vmem:[#allocation2 + $0x28] sm:$0xf] }
 0x24e   : > { %v3592_v46 = vsel %vm8852_vm2, %v3587_v8, %v3591_v36  ;;  %v7052_v27 = vcombine.low %v4159_v30, %v4162_v15  ;;  %v3609_v16 = vrot.slane %v3607_v53, 4  ;;  %v4921_v43 = vshrl.u32 %v4872_v11, 16  ;;  %v10032_v13 = vld [vmem:[#allocation2 + $0x2c] sm:$0x1] }
 0x24f   : > { %7894 = vmatmul.mubr.bf16.gmra.mxu1 %v9935_v10  ;;  %v7009_v18 = vcombine.low %v3582_v5, %v3592_v46  ;;  %v3600_v54 = vor.u32 %v3599_v63, %v3596_v24  ;;  %v3615_v57 = vrot.slane %v3613_v58, 5  ;;  %v4924_v7 = vshll.u32 %v4872_v11, 16 }
 0x250   : > { %7897 = vmatprep.mubr.bf16.mxu1 %v9962_v32  ;;  %v3610_v0 = vor.u32 %v3609_v16, %v3605_v40  ;;  %v4923_v60 = vrot.slane %v4921_v43, 4  ;;  %v4930_v10 = vshll.u32 %v10007_v55, 16  ;;  %v4934_v52 = vshrl.u32 %v10007_v55, 16  ;;  %v10020_v32 = vpop.f32.mrf.mxu0 }
 0x251   : > { %v3601_v19 = vrot.slane %v3600_v54, 4  ;;  %v4926_v33 = vrot.slane %v4924_v7, 5  ;;  %v4940_v44 = vshll.u32 %v10012_v37, 16  ;;  %v3618_v28 = vshrl.u32 %v3275_v39, 16 }
 0x252   : > { %v3611_v20 = vrot.slane %v3610_v0, 4  ;;  %v4932_v51 = vrot.slane %v4930_v10, 5  ;;  %v4936_v1 = vrot.slane %v4934_v52, 4  ;;  %v3621_v29 = vshll.u32 %v3275_v39, 16  ;;  %v10034_v5 = vpop.f32.mrf.mxu0 }
 0x253   : > { %7954 = vmatmul.mubr.bf16.gmra.mxu0 %v7052_v27  ;;  %v3606_v49 = vsel %vm8852_vm2, %v3601_v19, %v3605_v40  ;;  %v4927_v22 = vor.u32 %v4926_v33, %v4923_v60  ;;  %v4942_v31 = vrot.slane %v4940_v44, 5  ;;  %v3620_v6 = vrot.slane %v3618_v28, 4  ;;  %v4878_v28 = vld [vmem:[#allocation2 + $0x30] sm:$0xf] }
 0x254   : > { %v3616_v34 = vsel %vm8852_vm2, %v3611_v20, %v3615_v57  ;;  %v4937_v45 = vor.u32 %v4936_v1, %v4932_v51  ;;  %v3623_v36 = vrot.slane %v3621_v29, 5  ;;  %v3627_v42 = vshll.u32 %v9957_v25, 16  ;;  %v10045_v57 = vpop.f32.mrf.mxu0 }
 0x255   : > { %v7010_v48 = vcombine.low %v3606_v49, %v3616_v34  ;;  %v4928_v61 = vrot.slane %v4927_v22, 4  ;;  %v3631_v26 = vshrl.u32 %v9957_v25, 16  ;;  %v3637_v62 = vshll.u32 %v9952_v50, 16  ;;  %v3278_v50 = vld [vmem:[#allocation2 + $0xc0] sm:$0xf] }
 0x256   : > { %v4938_v30 = vrot.slane %v4937_v45, 4  ;;  %v3624_v14 = vor.u32 %v3623_v36, %v3620_v6  ;;  %v3629_v23 = vrot.slane %v3627_v42, 5  ;;  %v4945_v11 = vshrl.u32 %v4875_v47, 16  ;;  %v10051_v22 = vld [vmem:[#allocation2 + $0x34] sm:$0xf] }
 0x257   : > { %7898 = vmatmul.mubr.bf16.gmra.mxu1 %v9991_v35  ;;  %v4933_v8 = vsel %vm8852_vm2, %v4928_v61, %v4932_v51  ;;  %v3633_v24 = vrot.slane %v3631_v26, 4  ;;  %v3639_v25 = vrot.slane %v3637_v62, 5  ;;  %v4948_v53 = vshll.u32 %v4875_v47, 16  ;;  %v7687_v20 = vpop.f32.mrf.mxu1  ;;  %v10058_v61 = vld [vmem:[#allocation2 + $0x38] sm:$0x1] }
 0x258   : > { %7901 = vmatprep.mubr.bf16.mxu1 %v7009_v18  ;;  %v4943_v15 = vsel %vm8852_vm2, %v4938_v30, %v4942_v31  ;;  %v3625_v35 = vrot.slane %v3624_v14, 4  ;;  %v4947_v63 = vrot.slane %v4945_v11, 4  ;;  %v4954_v40 = vshll.u32 %v10029_v41, 16 }
 0x259   : > { %v7085_v58 = vcombine.low %v4933_v8, %v4943_v15  ;;  %v3634_v46 = vor.u32 %v3633_v24, %v3629_v23  ;;  %v4950_v27 = vrot.slane %v4948_v53, 5  ;;  %v4958_v16 = vshrl.u32 %v10029_v41, 16  ;;  %v1930_v11 = vpop.f32.mrf.mxu1  ;;  %v10064_v53 = vld [vmem:[#allocation2 + $0x40] sm:$0xf] }
 0x25a   : > { %v3630_v43 = vsel %vm8852_vm2, %v3625_v35, %v3629_v23  ;;  %v4956_v39 = vrot.slane %v4954_v40, 5  ;;  %v4964_v18 = vshll.u32 %v10032_v13, 16  ;;  %v3642_v54 = vshrl.u32 %v3278_v50, 16  ;;  %v4881_v23 = vld [vmem:[#allocation2 + $0x3c] sm:$0xf] }
 0x25b   : > { %8021 = vmatprep.mubr.bf16.mxu0 %v7085_v58  ;;  %v3635_v7 = vrot.slane %v3634_v46, 4  ;;  %v4951_v0 = vor.u32 %v4950_v27, %v4947_v63  ;;  %v4960_v60 = vrot.slane %v4958_v16, 4  ;;  %v3645_v10 = vshll.u32 %v3278_v50, 16 }
 0x25c   : > { %v4966_v52 = vrot.slane %v4964_v18, 5  ;;  %v3644_v19 = vrot.slane %v3642_v54, 4  ;;  %v3651_v33 = vshll.u32 %v9987_v4, 16  ;;  %v3655_v44 = vshrl.u32 %v9987_v4, 16 }
 0x25d   : > { %v3640_v51 = vsel %vm8852_vm2, %v3635_v7, %v3639_v25  ;;  %v4952_v1 = vrot.slane %v4951_v0, 4  ;;  %v4961_v29 = vor.u32 %v4960_v60, %v4956_v39  ;;  %v3647_v49 = vrot.slane %v3645_v10, 5  ;;  %v10054_v45 = vpop.f32.mrf.mxu0  ;;  %v4884_v7 = vld [vmem:[#allocation2 + $0x48] sm:$0xf]  ;;  %v7688_v0 = vpop.f32.mrf.mxu1 }
 0x25e   : > { %v7011_v31 = vcombine.low %v3630_v43, %v3640_v51  ;;  %v3653_v6 = vrot.slane %v3651_v33, 5  ;;  %v3657_v47 = vrot.slane %v3655_v44, 4  ;;  %v3661_v34 = vshll.u32 %v9981_v2, 16 }
 0x25f   : > { %7902 = vmatmul.mubr.bf16.gmra.mxu1 %v7010_v48  ;;  %v4957_v4 = vsel %vm8852_vm2, %v4952_v1, %v4956_v39  ;;  %v4962_v36 = vrot.slane %v4961_v29, 4  ;;  %v3648_v42 = vor.u32 %v3647_v49, %v3644_v19  ;;  %v4969_v26 = vshrl.u32 %v4878_v28, 16  ;;  %v10066_v40 = vpop.f32.mrf.mxu0  ;;  %v10074_v19 = vld [vmem:[#allocation2 + $0x44] sm:$0x1]  ;;  %v10077_v29 = vld [vmem:[#allocation2 + $0x4c] sm:$0xf] }
 0x260   : > { %7905 = vmatprep.mubr.bf16.mxu1 %v7011_v31  ;;  %v3658_v62 = vor.u32 %v3657_v47, %v3653_v6  ;;  %v3663_v30 = vrot.slane %v3661_v34, 5  ;;  %v4972_v14 = vshll.u32 %v4878_v28, 16  ;;  %v4978_v48 = vshll.u32 %v10051_v22, 16 }
 0x261   : > { %v4967_v2 = vsel %vm8852_vm2, %v4962_v36, %v4966_v52  ;;  %v3649_v8 = vrot.slane %v3648_v42, 4  ;;  %v4971_v24 = vrot.slane %v4969_v26, 4  ;;  %v4982_v25 = vshrl.u32 %v10051_v22, 16  ;;  %v8367_v52 = vld [vmem:[#allocation2 + $0x18] sm:$0xff]   ;;  %v10079_v49 = vpop.f32.mrf.mxu0  ;;  %v10085_v26 = vld [vmem:[#allocation2 + $0x50] sm:$0x1] }
 0x262   : > { %v7086_v50 = vcombine.low %v4957_v4, %v4967_v2  ;;  %v3659_v15 = vrot.slane %v3658_v62, 4  ;;  %v4974_v35 = vrot.slane %v4972_v14, 5  ;;  %v4980_v63 = vrot.slane %v4978_v48, 5 }
 0x263   : > { %v3654_v58 = vsel %vm8852_vm2, %v3649_v8, %v3653_v6  ;;  %v4984_v46 = vrot.slane %v4982_v25, 4  ;;  %v4988_v27 = vshll.u32 %v10058_v61, 16  ;;  %v4993_v16 = vshrl.u32 %v4881_v23, 16  ;;  %v4887_v25 = vld [vmem:[#allocation2 + $0x54] sm:$0xf] }
 0x264   : > { %8022 = vmatmul.mubr.bf16.vlgmr.msra.gmra.mxu0 %v7086_v50  ;;  %v3664_v43 = vsel %vm8852_vm2, %v3659_v15, %v3663_v30  ;;  %v4975_v39 = vor.u32 %v4974_v35, %v4971_v24  ;;  %v4996_v18 = vshll.u32 %v4881_v23, 16  ;;  %v5002_v54 = vshll.u32 %v10064_v53, 16  ;;  %v10087_v30 = vpop.f32.mrf.mxu1  ;;  %v10094_v50 = vpop.f32.mrf.mxu0 }
 0x265   : > { %v7012_v60 = vcombine.low %v3654_v58, %v3664_v43  ;;  %v4985_v10 = vor.u32 %v4984_v46, %v4980_v63  ;;  %v4995_v33 = vrot.slane %v4993_v16, 4  ;;  %v5006_v1 = vshrl.u32 %v10064_v53, 16  ;;  %v10101_v46 = vld [vmem:[#allocation2 + $0x58] sm:$0xf]  ;;  %v8369_v43 = vld [vmem:[#allocation2 + $0x24] sm:$0xff]  }
 0x266   : > { %v4976_v44 = vrot.slane %v4975_v39, 4  ;;  %v4998_v28 = vrot.slane %v4996_v18, 5  ;;  %v5004_v51 = vrot.slane %v5002_v54, 5  ;;  %v4990_v6 = vrot.slane %v4988_v27, 5 }
 0x267   : > { %7906 = vmatmul.mubr.bf16.gmra.mxu1 %v7012_v60  ;;  %v4986_v31 = vrot.slane %v4985_v10, 4  ;;  %v10082_v47 = vadd.f32 %v9965_v9, %v7687_v20  ;;  %v5017_v34 = vshrl.u32 %v4884_v7, 16  ;;  %v5008_v36 = vrot.slane %v5006_v1, 4 }
 0x268   : > { %7973 = vmatprep.mubr.bf16.mxu1 %v8367_v52  ;;  %v4999_v4 = vor.u32 %v4998_v28, %v4995_v33  ;;  %v5012_v42 = vshll.u32 %v10074_v19, 16  ;;  %v5020_v62 = vshll.u32 %v4884_v7, 16  ;;  %v4981_v14 = vsel %vm8852_vm2, %v4976_v44, %v4980_v63  ;;  %v10108_v52 = vld [vmem:[#allocation2 + $0x5c] sm:$0x1]  ;;  %v8370_v28 = vld [vmem:[#allocation2 + $0x30] sm:$0xff]  }
 0x269   : > { %v4991_v48 = vsel %vm8852_vm2, %v4986_v31, %v4990_v6  ;;  %v5019_v23 = vrot.slane %v5017_v34, 4  ;;  %v5026_v9 = vshll.u32 %v10077_v29, 16  ;;  %v5009_v8 = vor.u32 %v5008_v36, %v5004_v51 }
 0x26a   : > { %v7087_v20 = vcombine.low %v4981_v14, %v4991_v48  ;;  %v5000_v2 = vrot.slane %v4999_v4, 4  ;;  %v5022_v24 = vrot.slane %v5020_v62, 5  ;;  %v5030_v35 = vshrl.u32 %v10077_v29, 16 }
 0x26b   : > { %v5028_v15 = vrot.slane %v5026_v9, 5  ;;  %v5036_v58 = vshll.u32 %v10085_v26, 16  ;;  %v10099_v63 = vadd.f32 %v9971_v12, %v1930_v11  ;;  %v5010_v27 = vrot.slane %v5009_v8, 4  ;;  %v8371_v11 = vld [vmem:[#allocation8 + $0x230] sm:$0xff]  }
 0x26c   : > { %8025 = vmatprep.mubr.bf16.mxu0 %v7087_v20  ;;  %v5014_v16 = vrot.slane %v5012_v42, 5  ;;  %v5023_v39 = vor.u32 %v5022_v24, %v5019_v23  ;;  %v10104_v18 = vadd.f32 %v9983_v21, %v7688_v0  ;;  %v7691_v54 = vpop.f32.mrf.mxu1  ;;  %v5005_v7 = vsel %vm8852_vm2, %v5000_v2, %v5004_v51  ;;  %v4890_v21 = vld [vmem:[#allocation2 + $0x60] sm:$0xf]  ;;  %v10116_v42 = vld [vmem:[#allocation2 + $0x64] sm:$0xf] }
 0x26d   : > { %v5032_v60 = vrot.slane %v5030_v35, 4  ;;  %v5038_v10 = vrot.slane %v5036_v58, 5  ;;  %v5041_v12 = vshrl.u32 %v4887_v25, 16  ;;  %v5044_v1 = vshll.u32 %v4887_v25, 16  ;;  %v8374_v35 = vld [vmem:[#allocation8 + $0x228] sm:$0xff]  }
 0x26e   : > { %v5015_v33 = vsel %vm8852_vm2, %v5010_v27, %v5014_v16  ;;  %v5024_v44 = vrot.slane %v5023_v39, 4  ;;  %v5050_v31 = vshll.u32 %v10101_v46, 16  ;;  %v1946_v0 = vpop.f32.mrf.mxu1  ;;  %v10113_v6 = vpop.f32.mrf.mxu0  ;;  %v5054_v36 = vshrl.u32 %v10101_v46, 16 }
 0x26f   : > { %v7088_v34 = vcombine.low %v5005_v7, %v5015_v33  ;;  %7974 = vmatmul.mubr.bf16.vlgmr.msra.gmra.mxu1 %v8369_v43  ;;  %v5033_v51 = vor.u32 %v5032_v60, %v5028_v15  ;;  %v5043_v4 = vrot.slane %v5041_v12, 4  ;;  %v5046_v14 = vrot.slane %v5044_v1, 5 }
 0x270   : > { %v5029_v62 = vsel %vm8852_vm2, %v5024_v44, %v5028_v15  ;;  %8054 = vmatpush3.bf16.msra.mxu1 %v9989_v56  ;;  %7977 = vmatprep.mubr.bf16.mxu1 %v8370_v28  ;;  %v5052_v48 = vrot.slane %v5050_v31, 5  ;;  %v5060_v23 = vshll.u32 %v10108_v52, 16  ;;  %v7692_v9 = vpop.f32.mrf.mxu1  ;;  %v10122_v20 = vpop.f32.mrf.mxu0  ;;  %v5056_v8 = vrot.slane %v5054_v36, 4  ;;  %v10127_v56 = vld [vmem:[#allocation2 + $0x68] sm:$0x1]  ;;  %v8372_v44 = vld [vmem:[#allocation2 + $0x3c] sm:$0xff]  }
 0x271   : > { %8026 = vmatmul.mubr.bf16.gmra.mxu0 %v7088_v34  ;;  %v5034_v2 = vrot.slane %v5033_v51, 4  ;;  %8055 = vmatprep.subr.bf16.mxu1 %v8371_v11  ;;  %v10125_v24 = vadd.f32 %v10014_v3, %v7691_v54  ;;  %v5065_v25 = vshrl.u32 %v4890_v21, 16  ;;  %v5047_v15 = vor.u32 %v5046_v14, %v5043_v4  ;;  %v4893_v31 = vld [vmem:[#allocation2 + $0x6c] sm:$0xf]  ;;  %v8377_v14 = vld [vmem:[#allocation8 + $0x220] sm:$0xff]  }
 0x272   : > { %v5062_v58 = vrot.slane %v5060_v23, 5  ;;  %v5068_v27 = vshll.u32 %v4890_v21, 16  ;;  %v5074_v16 = vshll.u32 %v10116_v42, 16  ;;  %v10130_v43 = vpop.f32.mrf.mxu0  ;;  %v5057_v7 = vor.u32 %v5056_v8, %v5052_v48  ;;  %v1949_v3 = vpop.f32.mrf.mxu1 }
 0x273   : > { %11276 = vst [vmem:[#allocation16_spill] sm:$0xff] %v10125_v24  ;;  %v5039_v39 = vsel %vm8852_vm2, %v5034_v2, %v5038_v10  ;;  %v5067_v60 = vrot.slane %v5065_v25, 4  ;;  %v5078_v12 = vshrl.u32 %v10116_v42, 16  ;;  %v5048_v33 = vrot.slane %v5047_v15, 4  ;;  %v10139_v10 = vld [vmem:[#allocation2 + $0x70] sm:$0xf] }
 0x274   : > { %v7089_v54 = vcombine.low %v5029_v62, %v5039_v39  ;;  %v5070_v28 = vrot.slane %v5068_v27, 5  ;;  %v5076_v1 = vrot.slane %v5074_v16, 5  ;;  %8056 = vmatpush3.bf16.msra.mxu1 %v8371_v11  ;;  %v5058_v21 = vrot.slane %v5057_v7, 4  ;;  %v10141_v36 = vpop.f32.mrf.mxu0  ;;  %v8373_v11 = vld [vmem:[#allocation2 + $0x48] sm:$0xff]   ;;  %v4896_v16 = vld [vmem:[#allocation2 + $0x78] sm:$0xf] }
 0x275   : > { %v5080_v34 = vrot.slane %v5078_v12, 4  ;;  %v5084_v51 = vshll.u32 %v10127_v56, 16  ;;  %v10137_v4 = vadd.f32 %v10020_v32, %v1946_v0  ;;  %8057 = vmatprep.subr.bf16.mxu1 %v8374_v35  ;;  %v5053_v62 = vsel %vm8852_vm2, %v5048_v33, %v5052_v48  ;;  %v10151_v32 = vld [vmem:[#allocation2 + $0x74] sm:$0x1]  ;;  %v8379_v24 = vld [vmem:[#allocation2 + $0x78] sm:$0xff]  }
 0x276   : > { %8029 = vmatprep.mubr.bf16.mxu0 %v7089_v54  ;;  %v5071_v23 = vor.u32 %v5070_v28, %v5067_v60  ;;  %v10146_v2 = vadd.f32 %v10034_v5, %v7692_v9  ;;  %v10149_v8 = vadd.f32 %v10045_v57, %v1949_v3  ;;  %v5063_v0 = vsel %vm8852_vm2, %v5058_v21, %v5062_v58  ;;  %v10156_v60 = vld [vmem:[#allocation2 + $0x7c] sm:$0xf]  ;;  %v8380_v33 = vld [vmem:[#allocation8 + $0x218] sm:$0xff]  }
 0x277   : > { %11277 = vst [vmem:[#allocation17_spill] sm:$0xff] %v10137_v4  ;;  %7978 = vmatmul.mubr.bf16.gmra.mxu1 %v8372_v44  ;;  %v5081_v25 = vor.u32 %v5080_v34, %v5076_v1  ;;  %v5086_v15 = vrot.slane %v5084_v51, 5  ;;  %v5089_v27 = vshrl.u32 %v4893_v31, 16  ;;  %v7090_v39 = vcombine.low %v5053_v62, %v5063_v0 }
 0x278   : > { %11278 = vst [vmem:[#allocation18_spill] sm:$0xff] %v10146_v2  ;;  %11279 = vst [vmem:[#allocation19_spill] sm:$0xff] %v10149_v8  ;;  %v5072_v48 = vrot.slane %v5071_v23, 4  ;;  %7981 = vmatprep.mubr.bf16.mxu1 %v8373_v11  ;;  %v5092_v7 = vshll.u32 %v4893_v31, 16  ;;  %v5098_v5 = vshll.u32 %v10139_v10, 16  ;;  %v7695_v9 = vpop.f32.mrf.mxu1  ;;  %8058 = vmatpush3.bf16.msra.mxu1 %v8374_v35  ;;  %v5102_v3 = vshrl.u32 %v10139_v10, 16 }
 0x279   : > { %v5082_v57 = vrot.slane %v5081_v25, 4  ;;  %v5091_v12 = vrot.slane %v5089_v27, 4  ;;  %v5108_v58 = vshll.u32 %v10151_v32, 16  ;;  %v10160_v54 = vpop.f32.mrf.mxu0  ;;  %8059 = vmatprep.subr.bf16.mxu1 %v8377_v14  ;;  %8030 = vmatmul.mubr.bf16.gmra.mxu0 %v7090_v39  ;;  %v10165_v21 = vadd.f32 %v10054_v45, %v7695_v9  ;;  %v10167_v35 = vld [vmem:[#allocation2 + $0x80] sm:$0x1]  ;;  %v8375_v39 = vld [vmem:[#allocation2 + $0x54] sm:$0xff]  }
 0x27a   : > { %v5077_v44 = vsel %vm8852_vm2, %v5072_v48, %v5076_v1  ;;  %v5094_v28 = vrot.slane %v5092_v7, 5  ;;  %v5100_v31 = vrot.slane %v5098_v5, 5  ;;  %v1962_v34 = vpop.f32.mrf.mxu1  ;;  %v5104_v62 = vrot.slane %v5102_v3, 4  ;;  %v8383_v3 = vld [vmem:[#allocation8 + $0x210] sm:$0xff]  }
 0x27b   : > { %11280 = vst [vmem:[#allocation20_spill] sm:$0xff] %v10165_v21  ;;  %v5087_v51 = vsel %vm8852_vm2, %v5082_v57, %v5086_v15  ;;  %v5110_v23 = vrot.slane %v5108_v58, 5  ;;  %v5113_v11 = vshrl.u32 %v4896_v16, 16  ;;  %v10171_v0 = vpop.f32.mrf.mxu0  ;;  %v5116_v1 = vshll.u32 %v4896_v16, 16  ;;  %v4899_v15 = vld [vmem:[#allocation2 + $0x84] sm:$0xf] }
 0x27c   : > { %v7091_v25 = vcombine.low %v5077_v44, %v5087_v51  ;;  %v5095_v27 = vor.u32 %v5094_v28, %v5091_v12  ;;  %v5122_v48 = vshll.u32 %v10156_v60, 16  ;;  %v7696_v7 = vpop.f32.mrf.mxu1  ;;  %8060 = vmatpush3.bf16.msra.mxu1 %v8377_v14  ;;  %v5105_v45 = vor.u32 %v5104_v62, %v5100_v31  ;;  %v8376_v16 = vld [vmem:[#allocation2 + $0x60] sm:$0xff]   ;;  %v10181_v51 = vld [vmem:[#allocation2 + $0x88] sm:$0xf] }
 0x27d   : > { %v5115_v5 = vrot.slane %v5113_v11, 4  ;;  %v5126_v9 = vshrl.u32 %v10156_v60, 16  ;;  %v5132_v21 = vshll.u32 %v10167_v35, 16  ;;  %v10176_v57 = vpop.f32.mrf.mxu0  ;;  %8061 = vmatprep.subr.bf16.mxu1 %v8380_v33  ;;  %v5118_v12 = vrot.slane %v5116_v1, 5 }
 0x27e   : > { %8033 = vmatprep.mubr.bf16.mxu0 %v7091_v25  ;;  %v5096_v58 = vrot.slane %v5095_v27, 4  ;;  %v5124_v44 = vrot.slane %v5122_v48, 5  ;;  %v10179_v28 = vadd.f32 %v10066_v40, %v1962_v34  ;;  %v1965_v14 = vpop.f32.mrf.mxu1  ;;  %v5106_v62 = vrot.slane %v5105_v45, 4  ;;  %v10193_v34 = vld [vmem:[#allocation2 + $0x8c] sm:$0x1] }
 0x27f   : > { %7982 = vmatmul.mubr.bf16.gmra.mxu1 %v8375_v39  ;;  %v5128_v11 = vrot.slane %v5126_v9, 4  ;;  %v5134_v8 = vrot.slane %v5132_v21, 5  ;;  %v10184_v2 = vadd.f32 %v10079_v49, %v7696_v7  ;;  %v10186_v4 = vpop.f32.mrf.mxu0  ;;  %v5119_v27 = vor.u32 %v5118_v12, %v5115_v5  ;;  %11285 = vst [vmem:[#allocation25_spill] sm:$0xff] %v10193_v34  ;;  %v4902_v7 = vld [vmem:[#allocation2 + $0x90] sm:$0xf] }
 0x280   : > { %11281 = vst [vmem:[#allocation21_spill] sm:$0xff] %v10179_v28  ;;  %11283 = vst [vmem:[#allocation23_spill] sm:$0xff] %v10186_v4  ;;  %v5101_v25 = vsel %vm8852_vm2, %v5096_v58, %v5100_v31  ;;  %7985 = vmatprep.mubr.bf16.mxu1 %v8376_v16  ;;  %v10191_v40 = vadd.f32 %v10094_v50, %v1965_v14  ;;  %v5137_v1 = vshrl.u32 %v4899_v15, 16  ;;  %8062 = vmatpush3.bf16.msra.mxu1 %v8380_v33  ;;  %v8386_v31 = vld [vmem:[#allocation8 + $0x208] sm:$0xff]  }
 0x281   : > { %11282 = vst [vmem:[#allocation22_spill] sm:$0xff] %v10184_v2  ;;  %v5111_v21 = vsel %vm8852_vm2, %v5106_v62, %v5110_v23  ;;  %v5129_v39 = vor.u32 %v5128_v11, %v5124_v44  ;;  %v5140_v49 = vshll.u32 %v4899_v15, 16  ;;  %v5146_v48 = vshll.u32 %v10181_v51, 16  ;;  %v10198_v45 = vpop.f32.mrf.mxu0  ;;  %8063 = vmatprep.subr.bf16.mxu1 %v8383_v3  ;;  %v10202_v23 = vld [vmem:[#allocation2 + $0x94] sm:$0xf] }
 0x282   : > { %11284 = vst [vmem:[#allocation24_spill] sm:$0xff] %v10191_v40  ;;  %v7092_v5 = vcombine.low %v5101_v25, %v5111_v21  ;;  %v5120_v9 = vrot.slane %v5119_v27, 4  ;;  %v5139_v50 = vrot.slane %v5137_v1, 4  ;;  %v5150_v58 = vshrl.u32 %v10181_v51, 16  ;;  %v10208_v25 = vld [vmem:[#allocation2 + $0x98] sm:$0x1] }
 0x283   : > { %v5130_v12 = vrot.slane %v5129_v39, 4  ;;  %v5142_v16 = vrot.slane %v5140_v49, 5  ;;  %v5148_v33 = vrot.slane %v5146_v48, 5  ;;  %v5156_v14 = vshll.u32 %v10193_v34, 16  ;;  %v10204_v15 = vpop.f32.mrf.mxu0  ;;  %11286 = vst [vmem:[#allocation26_spill] sm:$0xff] %v10208_v25  ;;  %v8378_v40 = vld [vmem:[#allocation2 + $0x6c] sm:$0xff]  }
 0x284   : > { %8034 = vmatmul.mubr.bf16.gmra.mxu0 %v7092_v5  ;;  %v5125_v62 = vsel %vm8852_vm2, %v5120_v9, %v5124_v44  ;;  %v5152_v11 = vrot.slane %v5150_v58, 4  ;;  %v7699_v4 = vpop.f32.mrf.mxu1  ;;  %v5161_v27 = vshrl.u32 %v4902_v7, 16  ;;  %v5164_v1 = vshll.u32 %v4902_v7, 16  ;;  %8064 = vmatpush3.bf16.msra.mxu1 %v8383_v3  ;;  %v4905_v5 = vld [vmem:[#allocation2 + $0x9c] sm:$0xf] }
 0x285   : > { %v5135_v21 = vsel %vm8852_vm2, %v5130_v12, %v5134_v8  ;;  %v5143_v39 = vor.u32 %v5142_v16, %v5139_v50  ;;  %v5158_v49 = vrot.slane %v5156_v14, 5  ;;  %v10213_v48 = vadd.f32 %v10113_v6, %v7699_v4  ;;  %v10215_v2 = vpop.f32.mrf.mxu0  ;;  %8065 = vmatprep.subr.bf16.mxu1 %v8386_v31  ;;  %v8389_v3 = vld [vmem:[#allocation8 + $0x200] sm:$0xff]  }
 0x286   : > { %v7093_v44 = vcombine.low %v5125_v62, %v5135_v21  ;;  %v5153_v9 = vor.u32 %v5152_v11, %v5148_v33  ;;  %v5163_v58 = vrot.slane %v5161_v27, 4  ;;  %v5166_v28 = vrot.slane %v5164_v1, 5  ;;  %v1978_v7 = vpop.f32.mrf.mxu1  ;;  %v10225_v11 = vld [vmem:[#allocation2 + $0xa0] sm:$0xf] }
 0x287   : > { %11287 = vst [vmem:[#allocation27_spill] sm:$0xff] %v10213_v48  ;;  %v5144_v34 = vrot.slane %v5143_v39, 4  ;;  %7986 = vmatmul.mubr.bf16.gmra.mxu1 %v8378_v40  ;;  %v5170_v8 = vshll.u32 %v10202_v23, 16  ;;  %v5174_v50 = vshrl.u32 %v10202_v23, 16  ;;  %v5180_v6 = vshll.u32 %v10208_v25, 16  ;;  %v10220_v4 = vpop.f32.mrf.mxu0  ;;  %11290 = vst [vmem:[#allocation30_spill] sm:$0xff] %v10225_v11 }
 0x288   : > { %11288 = vst [vmem:[#allocation28_spill] sm:$0xff] %v10220_v4  ;;  %8037 = vmatprep.mubr.bf16.mxu0 %v7093_v44  ;;  %v5154_v12 = vrot.slane %v5153_v9, 4  ;;  %v5167_v16 = vor.u32 %v5166_v28, %v5163_v58  ;;  %7989 = vmatprep.mubr.bf16.mxu1 %v8379_v24  ;;  %v10223_v14 = vadd.f32 %v10122_v20, %v1978_v7  ;;  %v7700_v62 = vpop.f32.mrf.mxu1  ;;  %v5185_v27 = vshrl.u32 %v4905_v5, 16  ;;  %v10229_v48 = vld [vmem:[#allocation2 + $0xa4] sm:$0x1] }
 0x289   : > { %v5149_v40 = vsel %vm8852_vm2, %v5144_v34, %v5148_v33  ;;  %v5172_v1 = vrot.slane %v5170_v8, 5  ;;  %v5176_v21 = vrot.slane %v5174_v50, 4  ;;  %v5182_v39 = vrot.slane %v5180_v6, 5  ;;  %11291 = vst [vmem:[#allocation31_spill] sm:$0xff] %v10229_v48  ;;  %8066 = vmatpush3.bf16.msra.mxu1 %v8386_v31  ;;  %v4908_v58 = vld [vmem:[#allocation2 + $0xa8] sm:$0xf] }
 0x28a   : > { %11289 = vst [vmem:[#allocation29_spill] sm:$0xff] %v10223_v14  ;;  %v5159_v28 = vsel %vm8852_vm2, %v5154_v12, %v5158_v49  ;;  %v5168_v24 = vrot.slane %v5167_v16, 4  ;;  %v10234_v20 = vadd.f32 %v10130_v43, %v7700_v62  ;;  %v1981_v44 = vpop.f32.mrf.mxu1  ;;  %v5187_v9 = vrot.slane %v5185_v27, 4  ;;  %v10236_v7 = vpop.f32.mrf.mxu0  ;;  %8067 = vmatprep.subr.bf16.mxu1 %v8389_v3  ;;  %v10246_v16 = vld [vmem:[#allocation2 + $0xac] sm:$0xf] }
 0x28b   : > { %v7094_v34 = vcombine.low %v5149_v40, %v5159_v28  ;;  %v5177_v33 = vor.u32 %v5176_v21, %v5172_v1  ;;  %v10239_v8 = vadd.f32 %v10141_v36, %v1981_v44  ;;  %v5188_v50 = vshll.u32 %v4905_v5, 16  ;;  %11294 = vst [vmem:[#allocation34_spill] sm:$0xff] %v10246_v16  ;;  %v8381_v5 = vld [vmem:[#allocation2 + $0x84] sm:$0xff]   ;;  %v10253_v4 = vld [vmem:[#allocation2 + $0xb0] sm:$0x1] }
 0x28c   : > { %11292 = vst [vmem:[#allocation32_spill] sm:$0xff] %v10234_v20  ;;  %v5173_v31 = vsel %vm8852_vm2, %v5168_v24, %v5172_v1  ;;  %v5194_v49 = vshll.u32 %v10225_v11, 16  ;;  %v5198_v43 = vshrl.u32 %v10225_v11, 16  ;;  %v5204_v6 = vshll.u32 %v10229_v48, 16  ;;  %v7703_v12 = vpop.f32.mrf.mxu1  ;;  %v10248_v62 = vpop.f32.mrf.mxu0  ;;  %v8382_v1 = vld [vmem:[#allocation2 + $0x90] sm:$0xff]   ;;  %11296 = vst [vmem:[#allocation36_spill] sm:$0xff] %v10253_v4 }
 0x28d   : > { %11293 = vst [vmem:[#allocation33_spill] sm:$0xff] %v10239_v8  ;;  %8038 = vmatmul.mubr.bf16.gmra.mxu0 %v7094_v34  ;;  %v5178_v27 = vrot.slane %v5177_v33, 4  ;;  %v5190_v40 = vrot.slane %v5188_v50, 5  ;;  %v10251_v36 = vadd.f32 %v10160_v54, %v7703_v12  ;;  %v5209_v21 = vshrl.u32 %v4908_v58, 16  ;;  %8068 = vmatpush3.bf16.msra.mxu1 %v8389_v3 }
 0x28e   : > { %v5196_v28 = vrot.slane %v5194_v49, 5  ;;  %v5200_v24 = vrot.slane %v5198_v43, 4  ;;  %v5206_v44 = vrot.slane %v5204_v6, 5  ;;  %v5212_v8 = vshll.u32 %v4908_v58, 16  ;;  %v1994_v20 = vpop.f32.mrf.mxu1  ;;  %v10255_v14 = vpop.f32.mrf.mxu0  ;;  %v4911_v6 = vld [vmem:[#allocation2 + $0xb4] sm:$0xf] }
 0x28f   : > { %11295 = vst [vmem:[#allocation35_spill] sm:$0xff] %v10251_v36  ;;  %v5183_v34 = vsel %vm8852_vm2, %v5178_v27, %v5182_v39  ;;  %v5191_v33 = vor.u32 %v5190_v40, %v5187_v9  ;;  %7990 = vmatmul.mubr.bf16.gmra.mxu1 %v8381_v5  ;;  %v5211_v54 = vrot.slane %v5209_v21, 4  ;;  %v5218_v50 = vshll.u32 %v10246_v16, 16  ;;  %v10272_v5 = vld [vmem:[#allocation2 + $0xb8] sm:$0xf] }
 0x290   : > { %v7095_v12 = vcombine.low %v5173_v31, %v5183_v34  ;;  %v5201_v36 = vor.u32 %v5200_v24, %v5196_v28  ;;  %v5214_v3 = vrot.slane %v5212_v8, 5  ;;  %v5222_v49 = vshrl.u32 %v10246_v16, 16  ;;  %7993 = vmatprep.mubr.bf16.mxu1 %v8382_v1  ;;  %v7704_v43 = vpop.f32.mrf.mxu1  ;;  %v10261_v58 = vpop.f32.mrf.mxu0  ;;  %v10276_v24 = vld [vmem:[#allocation2 + $0xbc] sm:$0x1] }
 0x291   : > { %11297 = vst [vmem:[#allocation37_spill] sm:$0xff] %v10261_v58  ;;  %v5192_v48 = vrot.slane %v5191_v33, 4  ;;  %v5220_v11 = vrot.slane %v5218_v50, 5  ;;  %v5228_v25 = vshll.u32 %v10253_v4, 16  ;;  %v10265_v39 = vadd.f32 %v10171_v0, %v1994_v20  ;;  %11301 = vst [vmem:[#allocation41_spill] sm:$0xff] %v10276_v24 }
 0x292   : > { %8041 = vmatprep.mubr.bf16.mxu0 %v7095_v12  ;;  %v5202_v9 = vrot.slane %v5201_v36, 4  ;;  %v5215_v27 = vor.u32 %v5214_v3, %v5211_v54  ;;  %v5224_v31 = vrot.slane %v5222_v49, 4  ;;  %v10268_v8 = vadd.f32 %v10176_v57, %v7704_v43  ;;  %v10270_v40 = vpop.f32.mrf.mxu1  ;;  %v4914_v54 = vld [vmem:[#allocation2 + $0xc0] sm:$0xf] }
 0x293   : > { %11298 = vst [vmem:[#allocation38_spill] sm:$0xff] %v10265_v39  ;;  %11300 = vst [vmem:[#allocation40_spill] sm:$0xff] %v10270_v40  ;;  %v5197_v21 = vsel %vm8852_vm2, %v5192_v48, %v5196_v28  ;;  %v5230_v1 = vrot.slane %v5228_v25, 5  ;;  %v5233_v34 = vshrl.u32 %v4911_v6, 16  ;;  %v10278_v0 = vpop.f32.mrf.mxu0  ;;  %v5236_v57 = vshll.u32 %v4911_v6, 16  ;;  %v8384_v48 = vld [vmem:[#allocation2 + $0x9c] sm:$0xff]  }
 0x294   : > { %11299 = vst [vmem:[#allocation39_spill] sm:$0xff] %v10268_v8  ;;  %v5207_v20 = vsel %vm8852_vm2, %v5202_v9, %v5206_v44  ;;  %v5216_v36 = vrot.slane %v5215_v27, 4  ;;  %v5225_v33 = vor.u32 %v5224_v31, %v5220_v11  ;;  %v5242_v3 = vshll.u32 %v10272_v5, 16  ;;  %v10289_v27 = vld [vmem:[#allocation2 + $0xc4] sm:$0xf]  ;;  %v8385_v6 = vld [vmem:[#allocation2 + $0xa8] sm:$0xff]  }
 0x295   : > { %v7096_v50 = vcombine.low %v5197_v21, %v5207_v20  ;;  %v5235_v12 = vrot.slane %v5233_v34, 4  ;;  %v5246_v49 = vshrl.u32 %v10272_v5, 16  ;;  %v10284_v25 = vpop.f32.mrf.mxu0  ;;  %v5238_v58 = vrot.slane %v5236_v57, 5  ;;  %v10294_v20 = vld [vmem:[#allocation2 + $0xc8] sm:$0x1] }
 0x296   : > { %v5221_v28 = vsel %vm8852_vm2, %v5216_v36, %v5220_v11  ;;  %v5226_v43 = vrot.slane %v5225_v33, 4  ;;  %v5252_v44 = vshll.u32 %v10276_v24, 16  ;;  %v7707_v9 = vpop.f32.mrf.mxu1  ;;  %v5244_v31 = vrot.slane %v5242_v3, 5 }
 0x297   : > { %8042 = vmatmul.mubr.bf16.gmra.mxu0 %v7096_v50  ;;  %v5248_v21 = vrot.slane %v5246_v49, 4  ;;  %v10292_v34 = vadd.f32 %v10198_v45, %v7707_v9  ;;  %7994 = vmatmul.mubr.bf16.gmra.mxu1 %v8384_v48  ;;  %v5257_v8 = vshrl.u32 %v4914_v54, 16  ;;  %v10296_v40 = vpop.f32.mrf.mxu0  ;;  %v5239_v36 = vor.u32 %v5238_v58, %v5235_v12 }
 0x298   : > { %v5231_v11 = vsel %vm8852_vm2, %v5226_v43, %v5230_v1  ;;  %v5254_v33 = vrot.slane %v5252_v44, 5  ;;  %v5260_v57 = vshll.u32 %v4914_v54, 16  ;;  %7997 = vmatprep.mubr.bf16.mxu1 %v8385_v6  ;;  %v2010_v39 = vpop.f32.mrf.mxu1  ;;  %v5266_v45 = vshll.u32 %v10289_v27, 16 }
 0x299   : > { %11302 = vst [vmem:[#allocation42_spill] sm:$0xff] %v10292_v34  ;;  %v7097_v50 = vcombine.low %v5221_v28, %v5231_v11  ;;  %v5249_v3 = vor.u32 %v5248_v21, %v5244_v31  ;;  %v5259_v49 = vrot.slane %v5257_v8, 4  ;;  %v10301_v9 = vpop.f32.mrf.mxu0  ;;  %v5240_v48 = vrot.slane %v5239_v36, 4  ;;  %v5626_v28 = vld [vmem:[#allocation2 + $0x18] sm:$0xe] }
 0x29a   : > { %11303 = vst [vmem:[#allocation43_spill] sm:$0xff] %v10301_v9  ;;  %v5262_v34 = vrot.slane %v5260_v57, 5  ;;  %v5270_v4 = vshrl.u32 %v10289_v27, 16  ;;  %v5276_v16 = vshll.u32 %v10294_v20, 16  ;;  %v7708_v24 = vpop.f32.mrf.mxu1  ;;  %v5268_v1 = vrot.slane %v5266_v45, 5 }
 0x29b   : > { %8045 = vmatprep.mubr.bf16.mxu0 %v7097_v50  ;;  %v5250_v58 = vrot.slane %v5249_v3, 4  ;;  %v10306_v54 = vadd.f32 %v10204_v15, %v2010_v39  ;;  %v10309_v12 = vadd.f32 %v10215_v2, %v7708_v24  ;;  %v10311_v8 = vpop.f32.mrf.mxu0  ;;  %v5245_v43 = vsel %vm8852_vm2, %v5240_v48, %v5244_v31  ;;  %v4917_v11 = vld [vmem:[#allocation2 + $0xcc] sm:$0xf]  ;;  %v8387_v15 = vld [vmem:[#allocation2 + $0xb4] sm:$0xff]   ;;  %v10322_v24 = vld [vmem:[#allocation2 + $0xd0] sm:$0xf] }
 0x29c   : > { %v5263_v44 = vor.u32 %v5262_v34, %v5259_v49  ;;  %v5272_v6 = vrot.slane %v5270_v4, 4  ;;  %v10315_v21 = vpop.f32.mrf.mxu1  ;;  %v5278_v57 = vrot.slane %v5276_v16, 5  ;;  %v5692_v2 = vrot.slane %v10007_v55, 5  ;;  %v8388_v34 = vld [vmem:[#allocation2 + $0xc0] sm:$0xff]  }
 0x29d   : > { %v5255_v36 = vsel %vm8852_vm2, %v5250_v58, %v5254_v33  ;;  %v10319_v39 = vpop.f32.mrf.mxu0  ;;  %v7109_v4 = vrot.slane %v5626_v28, 9  ;;  %v5695_v16 = vrot.slane %v10012_v37, 5  ;;  %v5281_v33 = vshrl.u32 %v4917_v11, 16  ;;  %v5627_v9 = vld [vmem:[#allocation2 + $0x24] sm:$0xe] }
 0x29e   : > { %v7098_v50 = vcombine.low %v5245_v43, %v5255_v36  ;;  %v5264_v3 = vrot.slane %v5263_v44, 4  ;;  %v5273_v45 = vor.u32 %v5272_v6, %v5268_v1  ;;  %v7711_v31 = vpop.f32.mrf.mxu1  ;;  %v5694_v48 = vrot.slane %v5692_v2, 4  ;;  %v10332_v6 = vld [vmem:[#allocation2 + $0xd4] sm:$0x1] }
 0x29f   : > { %v10325_v49 = vadd.f32 %v10236_v7, %v7711_v31  ;;  %7998 = vmatmul.mubr.bf16.gmra.mxu1 %v8387_v15  ;;  %v10328_v58 = vpop.f32.mrf.mxu0  ;;  %11305 = vst [vmem:[#allocation45_spill] sm:$0xff] %v10332_v6  ;;  %v5284_v28 = vshll.u32 %v4917_v11, 16  ;;  %v5290_v7 = vshll.u32 %v10322_v24, 16  ;;  %v5283_v15 = vrot.slane %v5281_v33, 4 }
 0x2a0   : > { %8046 = vmatmul.mubr.bf16.gmra.mxu0 %v7098_v50  ;;  %v5269_v55 = vsel %vm8852_vm2, %v5264_v3, %v5268_v1  ;;  %v5274_v43 = vrot.slane %v5273_v45, 4  ;;  %8001 = vmatprep.mubr.bf16.mxu1 %v8388_v34  ;;  %v2026_v44 = vpop.f32.mrf.mxu1  ;;  %v5696_v37 = vsel %vm9355_vm13, %v5694_v48, %v5695_v16  ;;  %v5294_v50 = vshrl.u32 %v10322_v24, 16  ;;  %v8390_v48 = vld [vmem:[#allocation2 + $0xcc] sm:$0xff]  }
 0x2a1   : > { %11304 = vst [vmem:[#allocation44_spill] sm:$0xff] %v10325_v49  ;;  %v10336_v36 = vadd.f32 %v10248_v62, %v2026_v44  ;;  %v10341_v31 = vpop.f32.mrf.mxu0  ;;  %v5693_v11 = vsel %vm9355_vm13, %v7109_v4, %v5692_v2  ;;  %v5286_v45 = vrot.slane %v5284_v28, 5  ;;  %v5292_v34 = vrot.slane %v5290_v7, 5 }
 0x2a2   : > { %11307 = vst [vmem:[#allocation47_spill] sm:$0xff] %v10341_v31  ;;  %v5279_v1 = vsel %vm8852_vm2, %v5274_v43, %v5278_v57  ;;  %v7712_v3 = vpop.f32.mrf.mxu1  ;;  %v5296_v16 = vrot.slane %v5294_v50, 4  ;;  %v5300_v33 = vshll.u32 %v10332_v6, 16  ;;  %v5628_v31 = vld [vmem:[#allocation2 + $0x30] sm:$0xe]  ;;  %v10355_v57 = vadd.f32 %v9995_v38, %v10087_v30 }
 0x2a3   : > { %11306 = vst [vmem:[#allocation46_spill] sm:$0xff] %v10336_v36  ;;  %v7099_v62 = vcombine.low %v5269_v55, %v5279_v1  ;;  %v10348_v44 = vadd.f32 %v10255_v14, %v7712_v3  ;;  %v10351_v36 = vpop.f32.mrf.mxu0  ;;  %v7125_v2 = vcombine.low %v5693_v11, %v5696_v37  ;;  %v5287_v4 = vor.u32 %v5286_v45, %v5283_v15  ;;  %v5629_v3 = vld [vmem:[#allocation2 + $0x3c] sm:$0xe] }
 0x2a4   : > { %v10357_v43 = vpop.f32.mrf.mxu1  ;;  %v5699_v55 = vrot.slane %v10029_v41, 5  ;;  %v5297_v14 = vor.u32 %v5296_v16, %v5292_v34  ;;  %v5302_v28 = vrot.slane %v5300_v33, 5  ;;  %v7110_v7 = vrot.slane %v5627_v9, 9 }
 0x2a5   : > { %11308 = vst [vmem:[#allocation48_spill] sm:$0xff] %v10348_v44  ;;  %8049 = vmatprep.mubr.bf16.mxu0 %v7099_v62  ;;  %v5702_v50 = vrot.slane %v10032_v13, 5  ;;  %v10361_v1 = vpop.f32.mrf.mxu0  ;;  %v5288_v49 = vrot.slane %v5287_v4, 4  ;;  %v7111_v38 = vrot.slane %v5628_v31, 9  ;;  %v5706_v30 = vrot.slane %v10051_v22, 5 }
 0x2a6   : > { %v7715_v44 = vpop.f32.mrf.mxu1  ;;  %v5701_v6 = vrot.slane %v5699_v55, 4  ;;  %v5298_v41 = vrot.slane %v5297_v14, 4  ;;  %v5700_v15 = vsel %vm9355_vm13, %v7110_v7, %v5699_v55  ;;  %v5709_v9 = vrot.slane %v10058_v61, 5  ;;  %v5630_v62 = vld [vmem:[#allocation2 + $0x48] sm:$0xe] }
 0x2a7   : > { %v10365_v37 = vadd.f32 %v10278_v0, %v7715_v44  ;;  %8002 = vmatmul.mubr.bf16.gmra.mxu1 %v8390_v48  ;;  %v10370_v13 = vpop.f32.mrf.mxu0  ;;  %v5293_v45 = vsel %vm8852_vm2, %v5288_v49, %v5292_v34  ;;  %v5708_v31 = vrot.slane %v5706_v30, 4  ;;  %v7112_v0 = vrot.slane %v5629_v3, 9  ;;  %v5631_v49 = vld [vmem:[#allocation2 + $0x54] sm:$0xe]  ;;  %v5632_v55 = vld [vmem:[#allocation2 + $0x60] sm:$0xe] }
 0x2a8   : > { %8069 = vmatprep.mubr.bf16.mxu1 %v7125_v2  ;;  %v2042_v11 = vpop.f32.mrf.mxu1  ;;  %v5703_v22 = vsel %vm9355_vm13, %v5701_v6, %v5702_v50  ;;  %v5303_v48 = vsel %vm8852_vm2, %v5298_v41, %v5302_v28  ;;  %v5707_v61 = vsel %vm9355_vm13, %v7111_v38, %v5706_v30  ;;  %v5713_v33 = vrot.slane %v10064_v53, 5 }
 0x2a9   : > { %v10377_v44 = vadd.f32 %v10284_v25, %v2042_v11  ;;  %v10383_v16 = vpop.f32.mrf.mxu0  ;;  %v7100_v34 = vcombine.low %v5293_v45, %v5303_v48  ;;  %v7126_v6 = vcombine.low %v5700_v15, %v5703_v22  ;;  %v5710_v4 = vsel %vm9355_vm13, %v5708_v31, %v5709_v9  ;;  %v5633_v45 = vld [vmem:[#allocation2 + $0x6c] sm:$0xe] }
 0x2aa   : > { %v7716_v2 = vpop.f32.mrf.mxu1  ;;  %v5716_v25 = vrot.slane %v10074_v19, 5  ;;  %v7127_v14 = vcombine.low %v5707_v61, %v5710_v4  ;;  %v5715_v7 = vrot.slane %v5713_v33, 4  ;;  %v7113_v50 = vrot.slane %v5630_v62, 9 }
 0x2ab   : > { %v10390_v59 = vadd.f32 %v10296_v40, %v7716_v2  ;;  %v10392_v28 = vpop.f32.mrf.mxu0  ;;  %8050 = vmatmul.mubr.bf16.gmra.mxu0 %v7100_v34  ;;  %v5714_v3 = vsel %vm9355_vm13, %v7112_v0, %v5713_v33  ;;  %v5720_v38 = vrot.slane %v10077_v29, 5  ;;  %v7114_v30 = vrot.slane %v5631_v49, 9 }
 0x2ac   : > { %v10394_v53 = vpop.f32.mrf.mxu1  ;;  %v5727_v19 = vrot.slane %v10101_v46, 5  ;;  %v5717_v40 = vsel %vm9355_vm13, %v5715_v7, %v5716_v25  ;;  %v5723_v15 = vrot.slane %v10085_v26, 5  ;;  %v5730_v9 = vrot.slane %v10108_v52, 5 }
 0x2ad   : > { %v10402_v41 = vpop.f32.mrf.mxu0  ;;  %v7115_v11 = vrot.slane %v5632_v55, 9  ;;  %v7128_v31 = vcombine.low %v5714_v3, %v5717_v40  ;;  %v5721_v0 = vsel %vm9355_vm13, %v7113_v50, %v5720_v38  ;;  %v5722_v29 = vrot.slane %v5720_v38, 4 }
 0x2ae   : > { %v7783_v22 = vpop.f32.mrf.mxu1  ;;  %v10410_v46 = vsel %vm9355_vm13, %v7114_v30, %v5727_v19  ;;  %v5729_v26 = vrot.slane %v5727_v19, 4  ;;  %v5734_v52 = vrot.slane %v10116_v42, 5  ;;  %v5737_v61 = vrot.slane %v10127_v56, 5 }
 0x2af   : > { %v10413_v62 = vadd.f32 %v7783_v22, %v10082_v47  ;;  %8070 = vmatmul.mubr.bf16.vlgmr.msra.gmra.mxu1 %v7126_v6  ;;  %v10415_v48 = vpop.f32.mrf.mxu0  ;;  %v5724_v49 = vsel %vm9355_vm13, %v5722_v29, %v5723_v15  ;;  %v7116_v34 = vrot.slane %v5633_v45, 9  ;;  %v5741_v2 = vrot.slane %v10139_v10, 5  ;;  %v5634_v47 = vld [vmem:[#allocation2 + $0x78] sm:$0xe] }
 0x2b0   : > { %8073 = vmatprep.mubr.bf16.mxu1 %v7127_v14  ;;  %v2688_v33 = vpop.f32.mrf.mxu1  ;;  %v5744_v4 = vrot.slane %v10151_v32, 5  ;;  %v7129_v25 = vcombine.low %v5721_v0, %v5724_v49  ;;  %v10430_v42 = vsel %vm9355_vm13, %v5729_v26, %v5730_v9  ;;  %v10434_v56 = vsel %vm9355_vm13, %v7115_v11, %v5734_v52  ;;  %v5635_v14 = vld [vmem:[#allocation2 + $0x84] sm:$0xe] }
 0x2b1   : > { %v10424_v6 = vadd.f32 %v2688_v33, %v10099_v63  ;;  %v10426_v55 = vpop.f32.mrf.mxu0  ;;  %v7130_v10 = vcombine.low %v10410_v46, %v10430_v42  ;;  %v5736_v32 = vrot.slane %v5734_v52, 4  ;;  %v10440_v63 = vsel %vm9355_vm13, %v7116_v34, %v5741_v2  ;;  %v5637_v52 = vld [vmem:[#allocation2 + $0x9c] sm:$0xe]  ;;  %v11309_v49 = vld [vmem:[#allocation25_spill] sm:$0xff] }
 0x2b2   : > { %v7784_v7 = vpop.f32.mrf.mxu1  ;;  %v5743_v50 = vrot.slane %v5741_v2, 4  ;;  %v7117_v30 = vrot.slane %v5634_v47, 9  ;;  %v5748_v19 = vrot.slane %v10156_v60, 5  ;;  %v5751_v40 = vrot.slane %v10167_v35, 5  ;;  %v11310_v2 = vld [vmem:[#allocation16_spill] sm:$0xff] }
 0x2b3   : > { %v10443_v3 = vadd.f32 %v7784_v7, %v10104_v18  ;;  %v10445_v38 = vpop.f32.mrf.mxu0  ;;  %v5738_v9 = vsel %vm9355_vm13, %v5736_v32, %v5737_v61  ;;  %v7118_v45 = vrot.slane %v5635_v14, 9  ;;  %v5755_v22 = vrot.slane %v10181_v51, 5  ;;  %v5636_v18 = vld [vmem:[#allocation2 + $0x90] sm:$0xe]  ;;  %v11311_v7 = vld [vmem:[#allocation26_spill] sm:$0xff] }
 0x2b4   : > { %v2691_v15 = vpop.f32.mrf.mxu1  ;;  %v10453_v11 = vsel %vm9355_vm13, %v5743_v50, %v5744_v4  ;;  %v7131_v60 = vcombine.low %v10434_v56, %v5738_v9  ;;  %v10466_v26 = vsel %vm9355_vm13, %v7117_v30, %v5748_v19  ;;  %v5750_v33 = vrot.slane %v5748_v19, 4  ;;  %v11312_v9 = vld [vmem:[#allocation30_spill] sm:$0xff] }
 0x2b5   : > { %v10457_v0 = vadd.f32 %v2691_v15, %v10355_v57  ;;  %v10459_v29 = vpop.f32.mrf.mxu0  ;;  %v7132_v35 = vcombine.low %v10440_v63, %v10453_v11  ;;  %v10470_v51 = vsel %vm9355_vm13, %v7118_v45, %v5755_v22  ;;  %v5757_v57 = vrot.slane %v5755_v22, 4  ;;  %v5638_v11 = vld [vmem:[#allocation2 + $0xa8] sm:$0xe] }
 0x2b6   : > { %v7787_v61 = vpop.f32.mrf.mxu1  ;;  %v5758_v34 = vrot.slane %v11309_v49, 5  ;;  %v7119_v56 = vrot.slane %v5636_v18, 9  ;;  %v5762_v14 = vrot.slane %v10202_v23, 5  ;;  %v5765_v32 = vrot.slane %v11311_v7, 5  ;;  %v11316_v7 = vld [vmem:[#allocation18_spill] sm:$0xff] }
 0x2b7   : > { %v2821_v4 = vadd.f32 %v7787_v61, %v11310_v2  ;;  %8074 = vmatmul.mubr.bf16.gmra.mxu1 %v7128_v31  ;;  %v10474_v47 = vpop.f32.mrf.mxu0  ;;  %v5752_v30 = vsel %vm9355_vm13, %v5750_v33, %v5751_v40  ;;  %v7120_v15 = vrot.slane %v5637_v52, 9  ;;  %v5769_v45 = vrot.slane %v11312_v9, 5  ;;  %v11313_v31 = vld [vmem:[#allocation17_spill] sm:$0xff]  ;;  %v5639_v40 = vld [vmem:[#allocation2 + $0xb4] sm:$0xe] }
 0x2b8   : > { %8077 = vmatprep.mubr.bf16.mxu1 %v7129_v25  ;;  %v2704_v50 = vpop.f32.mrf.mxu1  ;;  %v10482_v19 = vsel %vm9355_vm13, %v5757_v57, %v5758_v34  ;;  %v7133_v23 = vcombine.low %v10466_v26, %v5752_v30  ;;  %v10493_v18 = vsel %vm9355_vm13, %v7119_v56, %v5762_v14  ;;  %v5764_v57 = vrot.slane %v5762_v14, 4  ;;  %v11315_v34 = vld [vmem:[#allocation31_spill] sm:$0xff] }
 0x2b9   : > { %v2819_v22 = vadd.f32 %v2704_v50, %v11313_v31  ;;  %v10486_v61 = vpop.f32.mrf.mxu0  ;;  %v10497_v52 = vsel %vm9355_vm13, %v7120_v15, %v5769_v45  ;;  %v5771_v49 = vrot.slane %v5769_v45, 4  ;;  %v5772_v2 = vrot.slane %v11315_v34, 5  ;;  %v11317_v31 = vld [vmem:[#allocation19_spill] sm:$0xff] }
 0x2ba   : > { %11314 = vst [vmem:[#allocation25_spill] sm:$0xff] %v10486_v61  ;;  %v7788_v33 = vpop.f32.mrf.mxu1  ;;  %v10505_v9 = vsel %vm9355_vm13, %v5764_v57, %v5765_v32  ;;  %v7122_v14 = vrot.slane %v5639_v40, 9  ;;  %v5783_v15 = vrot.slane %v10272_v5, 5  ;;  %v11318_v40 = vld [vmem:[#allocation41_spill] sm:$0xff]  ;;  %v11319_v5 = vld [vmem:[#allocation20_spill] sm:$0xff]  ;;  %v10546_v42 = vadd.f32 %v10311_v8, %v10413_v62 }
 0x2bb   : > { %v2822_v50 = vadd.f32 %v7788_v33, %v11316_v7  ;;  %v10501_v26 = vpop.f32.mrf.mxu0  ;;  %v10509_v56 = vsel %vm9355_vm13, %v5771_v49, %v5772_v2  ;;  %v7135_v33 = vcombine.low %v10493_v18, %v10505_v9  ;;  %v5786_v2 = vrot.slane %v11318_v40, 5  ;;  %v11321_v40 = vld [vmem:[#allocation22_spill] sm:$0xff] }
 0x2bc   : > { %v2707_v30 = vpop.f32.mrf.mxu1  ;;  %v10523_v57 = vsel %vm9355_vm13, %v7122_v14, %v5783_v15  ;;  %v5785_v49 = vrot.slane %v5783_v15, 4  ;;  %v10565_v8 = vadd.f32 %v10361_v1, %v2819_v22 }
 0x2bd   : > { %v10513_v45 = vadd.f32 %v2707_v30, %v11317_v31  ;;  %v10515_v34 = vpop.f32.mrf.mxu0  ;;  %v11320_v31 = vld [vmem:[#allocation21_spill] sm:$0xff] }
 0x2be   : > { %v7791_v32 = vpop.f32.mrf.mxu1  ;;  %v10534_v9 = vsel %vm9355_vm13, %v5785_v49, %v5786_v2  ;;  %v10557_v2 = vadd.f32 %v10351_v36, %v2821_v4  ;;  %v11323_v36 = vld [vmem:[#allocation27_spill] sm:$0xff] }
 0x2bf   : > { %v2825_v25 = vadd.f32 %v7791_v32, %v11319_v5  ;;  %8078 = vmatmul.mubr.bf16.gmra.mxu1 %v7130_v10  ;;  %v10530_v30 = vpop.f32.mrf.mxu0  ;;  %v10550_v10 = vadd.f32 %v10319_v39, %v10424_v6  ;;  %v10568_v39 = vadd.f32 %v10370_v13, %v2822_v50 }
 0x2c0   : > { %8081 = vmatprep.mubr.bf16.mxu1 %v7131_v60  ;;  %v2720_v18 = vpop.f32.mrf.mxu1  ;;  %v10554_v60 = vadd.f32 %v10328_v58, %v10443_v3 }
 0x2c1   : > { %v2823_v14 = vadd.f32 %v2720_v18, %v11320_v31  ;;  %v10537_v7 = vpop.f32.mrf.mxu0  ;;  %v8391_v18 = vld [vmem:[#allocation9 + $0x38] sm:$0xff]   ;;  %v11322_v31 = vld [vmem:[#allocation24_spill] sm:$0xff]  ;;  %v10571_v58 = vadd.f32 %v10392_v28, %v2825_v25  ;;  %v11324_v28 = vld [vmem:[#allocation29_spill] sm:$0xff] }
 0x2c2   : > { %v7792_v32 = vpop.f32.mrf.mxu1  ;;  %8101 = vmatprep.subr.bf16.mxu0 %v8391_v18 }
 0x2c3   : > { %v2826_v5 = vadd.f32 %v7792_v32, %v11321_v40  ;;  %v10542_v46 = vpop.f32.mrf.mxu0  ;;  %v10574_v6 = vadd.f32 %v10402_v41, %v2823_v14  ;;  %8102 = vmatpush3.bf16.msra.mxu0 %v8391_v18  ;;  %v11325_v14 = vld [vmem:[#allocation32_spill] sm:$0xff] }
 0x2c4   : > { %v2723_v49 = vpop.f32.mrf.mxu1 }
 0x2c5   : > { %v10560_v32 = vadd.f32 %v2723_v49, %v11322_v31  ;;  %v10562_v40 = vpop.f32.mrf.mxu0  ;;  %v10583_v1 = vadd.f32 %v10415_v48, %v2826_v5  ;;  %v11327_v5 = vld [vmem:[#allocation33_spill] sm:$0xff] }
 0x2c6   : > { %v7795_v62 = vpop.f32.mrf.mxu1 }
 0x2c7   : > { %v2829_v3 = vadd.f32 %v7795_v62, %v11323_v36  ;;  %8082 = vmatmul.mubr.bf16.gmra.mxu1 %v7132_v35  ;;  %v10580_v4 = vpop.f32.mrf.mxu0  ;;  %v11326_v35 = vld [vmem:[#allocation34_spill] sm:$0xff] }
 0x2c8   : > { %8085 = vmatprep.mubr.bf16.mxu1 %v7133_v23  ;;  %v2736_v13 = vpop.f32.mrf.mxu1  ;;  %v5776_v31 = vrot.slane %v11326_v35, 5  ;;  %v8392_v36 = vld [vmem:[#allocation9 + $0x30] sm:$0xff]  }
 0x2c9   : > { %v2827_v22 = vadd.f32 %v2736_v13, %v11324_v28  ;;  %v10586_v25 = vpop.f32.mrf.mxu0  ;;  %v10589_v41 = vadd.f32 %v10445_v38, %v2829_v3  ;;  %v7121_v13 = vrot.slane %v5638_v11, 9  ;;  %v11328_v28 = vld [vmem:[#allocation35_spill] sm:$0xff]  ;;  %8103 = vmatprep.subr.bf16.mxu0 %v8392_v36 }
 0x2ca   : > { %v7796_v50 = vpop.f32.mrf.mxu1  ;;  %8104 = vmatpush3.bf16.msra.mxu0 %v8392_v36 }
 0x2cb   : > { %v2830_v49 = vadd.f32 %v7796_v50, %v11325_v14  ;;  %v10592_v63 = vpop.f32.mrf.mxu0  ;;  %v10596_v48 = vadd.f32 %v10459_v29, %v2827_v22  ;;  %v11329_v14 = vcombine.low %v10470_v51, %v10482_v19  ;;  %v5778_v29 = vrot.slane %v5776_v31, 4  ;;  %v11330_v22 = vld [vmem:[#allocation36_spill] sm:$0xff] }
 0x2cc   : > { %v2739_v23 = vpop.f32.mrf.mxu1  ;;  %v5779_v35 = vrot.slane %v11330_v22, 5  ;;  %v11335_v22 = vld [vmem:[#allocation39_spill] sm:$0xff] }
 0x2cd   : > { %v10599_v18 = vadd.f32 %v2739_v23, %v11327_v5  ;;  %v10601_v62 = vpop.f32.mrf.mxu0  ;;  %v10604_v38 = vadd.f32 %v10474_v47, %v2830_v49  ;;  %v11331_v47 = vld [vmem:[#allocation38_spill] sm:$0xff] }
 0x2ce   : > { %v7799_v3 = vpop.f32.mrf.mxu1 }
 0x2cf   : > { %v2833_v50 = vadd.f32 %v7799_v3, %v11328_v28  ;;  %8086 = vmatmul.mubr.bf16.gmra.mxu1 %v11329_v14  ;;  %v10611_v15 = vpop.f32.mrf.mxu0  ;;  %v11333_v3 = vld [vmem:[#allocation40_spill] sm:$0xff]  ;;  %v11334_v28 = vld [vmem:[#allocation23_spill] sm:$0xff]  ;;  %v5777_v14 = vsel %vm9355_vm13, %v7121_v13, %v5776_v31 }
 0x2d0   : > { %8089 = vmatprep.mubr.bf16.mxu1 %v7135_v33  ;;  %v2752_v23 = vpop.f32.mrf.mxu1  ;;  %v2303_v51 = vadd.f32 %v11334_v28, %v11333_v3  ;;  %v5780_v33 = vsel %vm9355_vm13, %v5778_v29, %v5779_v35  ;;  %v11337_v35 = vcombine.low %v10497_v52, %v10509_v56 }
 0x2d1   : > { %v2831_v49 = vadd.f32 %v2752_v23, %v11331_v47  ;;  %v10614_v5 = vpop.f32.mrf.mxu0  ;;  %v10617_v11 = vadd.f32 %v10501_v26, %v2833_v50  ;;  %v5640_v23 = vld [vmem:[#allocation2 + $0xc0] sm:$0xe]  ;;  %v5790_v47 = vrot.slane %v10289_v27, 5  ;;  %v7137_v13 = vcombine.low %v5777_v14, %v5780_v33 }
 0x2d2   : > { %v7800_v19 = vpop.f32.mrf.mxu1 }
 0x2d3   : > { %11332 = vst [vmem:[#allocation16_spill] sm:$0xff] %v10617_v11  ;;  %v2834_v61 = vadd.f32 %v7800_v19, %v11335_v22  ;;  %v10626_v36 = vpop.f32.mrf.mxu0  ;;  %v10630_v26 = vadd.f32 %v10515_v34, %v2831_v49  ;;  %v7123_v19 = vrot.slane %v5640_v23, 9  ;;  %v11336_v22 = vld [vmem:[#allocation42_spill] sm:$0xff]  ;;  %v5792_v27 = vrot.slane %v5790_v47, 4 }
 0x2d4   : > { %v2755_v50 = vpop.f32.mrf.mxu1  ;;  %v5793_v34 = vrot.slane %v10294_v20, 5  ;;  %v5641_v23 = vld [vmem:[#allocation2 + $0xcc] sm:$0xe]  ;;  %v11338_v20 = vld [vmem:[#allocation28_spill] sm:$0xff] }
 0x2d5   : > { %v2832_v11 = vadd.f32 %v2755_v50, %v2303_v51  ;;  %v10632_v3 = vpop.f32.mrf.mxu0  ;;  %v10635_v28 = vadd.f32 %v10530_v30, %v2834_v61  ;;  %v8393_v50 = vld [vmem:[#allocation9 + $0x28] sm:$0xff]   ;;  %v5797_v30 = vrot.slane %v10322_v24, 5  ;;  %v2319_v56 = vadd.f32 %v11338_v20, %v10315_v21  ;;  %v11340_v20 = vld [vmem:[#allocation44_spill] sm:$0xff] }
 0x2d6   : > { %v7803_v31 = vpop.f32.mrf.mxu1  ;;  %8105 = vmatprep.subr.bf16.mxu0 %v8393_v50 }
 0x2d7   : > { %v2837_v29 = vadd.f32 %v7803_v31, %v11336_v22  ;;  %8090 = vmatmul.mubr.bf16.gmra.mxu1 %v11337_v35  ;;  %v10642_v49 = vpop.f32.mrf.mxu0  ;;  %v10645_v51 = vadd.f32 %v10537_v7, %v2832_v11  ;;  %8106 = vmatpush3.bf16.msra.mxu0 %v8393_v50  ;;  %v5791_v11 = vsel %vm9355_vm13, %v7123_v19, %v5790_v47  ;;  %v7124_v22 = vrot.slane %v5641_v23, 9  ;;  %v11339_v35 = vld [vmem:[#allocation45_spill] sm:$0xff] }
 0x2d8   : > { %8093 = vmatprep.mubr.bf16.mxu1 %v7137_v13  ;;  %v2768_v61 = vpop.f32.mrf.mxu1  ;;  %v5800_v21 = vrot.slane %v11339_v35, 5  ;;  %v11344_v35 = vld [vmem:[#allocation48_spill] sm:$0xff] }
 0x2d9   : > { %v2835_v14 = vadd.f32 %v2768_v61, %v10306_v54  ;;  %v10649_v33 = vpop.f32.mrf.mxu0  ;;  %v10652_v52 = vadd.f32 %v10542_v46, %v2837_v29  ;;  %v5794_v54 = vsel %vm9355_vm13, %v5792_v27, %v5793_v34  ;;  %v5799_v29 = vrot.slane %v5797_v30, 4 }
 0x2da   : > { %v7804_v31 = vpop.f32.mrf.mxu1  ;;  %v7139_v19 = vcombine.low %v5791_v11, %v5794_v54  ;;  %v11341_v34 = vcombine.low %v10523_v57, %v10534_v9 }
 0x2db   : > { %v2838_v7 = vadd.f32 %v7804_v31, %v10309_v12  ;;  %v10661_v24 = vpop.f32.mrf.mxu0  ;;  %v10664_v13 = vadd.f32 %v10562_v40, %v2835_v14  ;;  %v8394_v31 = vld [vmem:[#allocation9 + $0x20] sm:$0xff]  }
 0x2dc   : > { %v2771_v46 = vpop.f32.mrf.mxu1  ;;  %8107 = vmatprep.subr.bf16.mxu0 %v8394_v31 }
 0x2dd   : > { %v2836_v61 = vadd.f32 %v2771_v46, %v2319_v56  ;;  %v10667_v50 = vpop.f32.mrf.mxu0  ;;  %v10670_v12 = vadd.f32 %v10580_v4, %v2838_v7  ;;  %v5798_v56 = vsel %vm9355_vm13, %v7124_v22, %v5797_v30  ;;  %v5801_v4 = vsel %vm9355_vm13, %v5799_v29, %v5800_v21  ;;  %v11342_v7 = vld [vmem:[#allocation46_spill] sm:$0xff]  ;;  %8108 = vmatpush3.bf16.msra.mxu0 %v8394_v31 }
 0x2df   : > { %v7807_v47 = vpop.f32.mrf.mxu1  ;;  %8094 = vmatmul.mubr.bf16.gmra.mxu1 %v11341_v34  ;;  %v10676_v40 = vpop.f32.mrf.mxu0  ;;  %v10679_v14 = vadd.f32 %v10586_v25, %v2836_v61  ;;  %v11343_v25 = vld [vmem:[#allocation37_spill] sm:$0xff] }
 0x2e0   : > { %v2841_v27 = vadd.f32 %v7807_v47, %v11340_v20  ;;  %8097 = vmatprep.mubr.bf16.mxu1 %v7139_v19  ;;  %v2335_v46 = vadd.f32 %v11343_v25, %v10357_v43  ;;  %v7140_v47 = vcombine.low %v5798_v56, %v5801_v4  ;;  %v8395_v20 = vld [vmem:[#allocation9 + $0x18] sm:$0xff]  }
 0x2e1   : > { %v2784_v23 = vpop.f32.mrf.mxu1  ;;  %v10686_v54 = vpop.f32.mrf.mxu0  ;;  %8109 = vmatprep.subr.bf16.mxu0 %v8395_v20 }
 0x2e2   : > { %v2839_v11 = vadd.f32 %v2784_v23, %v11342_v7  ;;  %v10689_v57 = vadd.f32 %v10592_v63, %v2841_v27  ;;  %v8396_v27 = vld [vmem:[#allocation9 + $0x10] sm:$0xff]   ;;  %8110 = vmatpush3.bf16.msra.mxu0 %v8395_v20 }
 0x2e3   : > { %v7808_v9 = vpop.f32.mrf.mxu1  ;;  %v7931_v30 = vpop.f32.mrf.mxu0  ;;  %8111 = vmatprep.subr.bf16.mxu0 %v8396_v27 }
 0x2e4   : > { %v2842_v61 = vadd.f32 %v7808_v9, %v11344_v35  ;;  %v10695_v17 = vadd.f32 %v10601_v62, %v2839_v11 }
 0x2e5   : > { %v2787_v22 = vpop.f32.mrf.mxu1  ;;  %v4342_v21 = vpop.f32.mrf.mxu0 }
 0x2e6   : > { %v2840_v29 = vadd.f32 %v2787_v22, %v2335_v46  ;;  %v10698_v19 = vadd.f32 %v10611_v15, %v2842_v61  ;;  %8112 = vmatpush3.bf16.msra.mxu0 %v8396_v27 }
 0x2e7   : > { %v7811_v63 = vpop.f32.mrf.mxu1  ;;  %8098 = vmatmul.mubr.bf16.gmra.mxu1 %v7140_v47  ;;  %v10701_v43 = vpop.f32.mrf.mxu0 }
 0x2e8   : > { %v2845_v34 = vadd.f32 %v7811_v63, %v10365_v37  ;;  %v10704_v23 = vadd.f32 %v10614_v5, %v2840_v29  ;;  %v11345_v37 = vld [vmem:[#allocation43_spill] sm:$0xff]  ;;  %v8397_v63 = vld [vmem:[#allocation9 + $0x8] sm:$0xff]  }
 0x2e9   : > { %v2800_v62 = vpop.f32.mrf.mxu1  ;;  %v10707_v4 = vpop.f32.mrf.mxu0  ;;  %v2351_v7 = vadd.f32 %v11345_v37, %v10394_v53  ;;  %8113 = vmatprep.subr.bf16.mxu0 %v8397_v63 }
 0x2ea   : > { %v2843_v56 = vadd.f32 %v2800_v62, %v10377_v44  ;;  %v10710_v15 = vadd.f32 %v10626_v36, %v2845_v34  ;;  %8114 = vmatpush3.bf16.msra.mxu0 %v8397_v63 }
 0x2eb   : > { %v7812_v31 = vpop.f32.mrf.mxu1  ;;  %v7935_v9 = vpop.f32.mrf.mxu0 }
 0x2ec   : > { %v2846_v11 = vadd.f32 %v7812_v31, %v10390_v59  ;;  %v10716_v5 = vadd.f32 %v10632_v3, %v2843_v56 }
 0x2ed   : > { %v2803_v25 = vpop.f32.mrf.mxu1  ;;  %v4358_v44 = vpop.f32.mrf.mxu0 }
 0x2ee   : > { %v2844_v46 = vadd.f32 %v2803_v25, %v2351_v7  ;;  %v10719_v35 = vadd.f32 %v10642_v49, %v2846_v11  ;;  %v8398_v25 = vld [vmem:[#allocation9] sm:$0xff]  }
 0x2ef   : > { %v7879_v36 = vpop.f32.mrf.mxu1  ;;  %v10722_v47 = vpop.f32.mrf.mxu0  ;;  %8115 = vmatprep.subr.bf16.mxu0 %v8398_v25 }
 0x2f0   : > { %v3957_v61 = vadd.f32 %v7879_v36, %v10546_v42  ;;  %v10725_v53 = vadd.f32 %v10649_v33, %v2844_v46  ;;  %v11346_v42 = vld [vmem:[#allocation47_spill] sm:$0xff]  ;;  %v3206_v36 = vadd.f32 %v10383_v16, %v10513_v45  ;;  %8116 = vmatpush3.bf16.msra.mxu0 %v8398_v25 }
 0x2f1   : > { %v3828_v59 = vpop.f32.mrf.mxu1  ;;  %v10728_v3 = vpop.f32.mrf.mxu0  ;;  %v3202_v27 = vadd.f32 %v11346_v42, %v10457_v0 }
 0x2f2   : > { %v3955_v22 = vadd.f32 %v3828_v59, %v10550_v10  ;;  %v10731_v29 = vadd.f32 %v10661_v24, %v3957_v61 }
 0x2f3   : > { %v7880_v49 = vpop.f32.mrf.mxu1  ;;  %v7939_v34 = vpop.f32.mrf.mxu0 }
 0x2f4   : > { %v10734_v20 = vadd.f32 %v7880_v49, %v10554_v60  ;;  %v10739_v33 = vadd.f32 %v10667_v50, %v3955_v22 }
 0x2f5   : > { %v3831_v62 = vpop.f32.mrf.mxu1  ;;  %v4374_v56 = vpop.f32.mrf.mxu0 }
 0x2f6   : > { %v10741_v10 = vadd.f32 %v3831_v62, %v3202_v27  ;;  %v3210_v62 = vadd.f32 %v10426_v55, %v10560_v32  ;;  %v11349_v32 = vld [vmem:[#allocation25_spill] sm:$0xff] }
 0x2f7   : > { %v7883_v24 = vpop.f32.mrf.mxu1  ;;  %v10744_v37 = vpop.f32.mrf.mxu0 }
 0x2f8   : > { %v3961_v31 = vadd.f32 %v7883_v24, %v10557_v2 }
 0x2f9   : > { %v3844_v60 = vpop.f32.mrf.mxu1  ;;  %v10747_v11 = vpop.f32.mrf.mxu0 }
 0x2fa   : > { %v3959_v7 = vadd.f32 %v3844_v60, %v10565_v8  ;;  %v10749_v0 = vadd.f32 %v7931_v30, %v3961_v31 }
 0x2fb   : > { %v7884_v50 = vpop.f32.mrf.mxu1  ;;  %v7943_v61 = vpop.f32.mrf.mxu0 }
 0x2fc   : > { %v10752_v46 = vadd.f32 %v7884_v50, %v10568_v39  ;;  %v10756_v59 = vadd.f32 %v4342_v21, %v3959_v7 }
 0x2fd   : > { %v3847_v2 = vpop.f32.mrf.mxu1  ;;  %v4390_v8 = vpop.f32.mrf.mxu0 }
 0x2fe   : > { %v10758_v22 = vadd.f32 %v3847_v2, %v3206_v36 }
 0x2ff   : > { %v7887_v63 = vpop.f32.mrf.mxu1  ;;  %v10761_v49 = vpop.f32.mrf.mxu0 }
 0x300   : > { %v3965_v30 = vadd.f32 %v7887_v63, %v10571_v58 }
 0x301   : > { %v3860_v42 = vpop.f32.mrf.mxu1  ;;  %v10764_v27 = vpop.f32.mrf.mxu0 }
 0x302   : > { %v3963_v39 = vadd.f32 %v3860_v42, %v10574_v6  ;;  %11347 = vst [vmem:[#allocation26_spill] sm:$0xff] %v10764_v27  ;;  %v10766_v16 = vadd.f32 %v7935_v9, %v3965_v30 }
 0x303   : > { %v7888_v45 = vpop.f32.mrf.mxu1  ;;  %v7947_v24 = vpop.f32.mrf.mxu0 }
 0x304   : > { %v10769_v21 = vadd.f32 %v7888_v45, %v10583_v1  ;;  %v10773_v31 = vadd.f32 %v4358_v44, %v3963_v39  ;;  %v3214_v44 = vadd.f32 %v11349_v32, %v10599_v18  ;;  %v11351_v45 = vld [vmem:[#allocation16_spill] sm:$0xff] }
 0x305   : > { %v3863_v58 = vpop.f32.mrf.mxu1  ;;  %v4406_v7 = vpop.f32.mrf.mxu0 }
 0x306   : > { %v10775_v60 = vadd.f32 %v3863_v58, %v3210_v62 }
 0x307   : > { %v7891_v50 = vpop.f32.mrf.mxu1  ;;  %v10778_v25 = vpop.f32.mrf.mxu0 }
 0x308   : > { %v3969_v6 = vadd.f32 %v7891_v50, %v10589_v41  ;;  %11348 = vst [vmem:[#allocation30_spill] sm:$0xff] %v10778_v25 }
 0x309   : > { %v3876_v9 = vpop.f32.mrf.mxu1  ;;  %v10788_v63 = vpop.f32.mrf.mxu0 }
 0x30a   : > { %v3967_v36 = vadd.f32 %v3876_v9, %v10596_v48  ;;  %v10781_v1 = vadd.f32 %v7939_v34, %v3969_v6  ;;  %11350 = vst [vmem:[#allocation17_spill] sm:$0xff] %v10788_v63 }
 0x30b   : > { %v7892_v2 = vpop.f32.mrf.mxu1  ;;  %v7951_v48 = vpop.f32.mrf.mxu0 }
 0x30c   : > { %v10784_v55 = vadd.f32 %v7892_v2, %v10604_v38  ;;  %v10790_v30 = vadd.f32 %v4374_v56, %v3967_v36 }
 0x30d   : > { %v3879_v42 = vpop.f32.mrf.mxu1  ;;  %v4422_v18 = vpop.f32.mrf.mxu0 }
 0x30e   : > { %v10792_v41 = vadd.f32 %v3879_v42, %v3214_v44 }
 0x30f   : > { %v7895_v39 = vpop.f32.mrf.mxu1  ;;  %v10807_v44 = vpop.f32.mrf.mxu0 }
 0x310   : > { %v3973_v62 = vadd.f32 %v7895_v39, %v11351_v45  ;;  %11352 = vst [vmem:[#allocation31_spill] sm:$0xff] %v10807_v44 }
 0x311   : > { %v3892_v34 = vpop.f32.mrf.mxu1 }
 0x312   : > { %v3971_v58 = vadd.f32 %v3892_v34, %v10630_v26  ;;  %v10796_v50 = vadd.f32 %v7943_v61, %v3973_v62 }
 0x313   : > { %v7896_v38 = vpop.f32.mrf.mxu1 }
 0x314   : > { %v10799_v6 = vadd.f32 %v7896_v38, %v10635_v28  ;;  %v10801_v9 = vadd.f32 %v4390_v8, %v3971_v58  ;;  %v10815_v8 = vpop.f32.mrf.mxu0 }
 0x315   : > { %v3895_v56 = vpop.f32.mrf.mxu1  ;;  %11354 = vst [vmem:[#allocation19_spill] sm:$0xff] %v10815_v8 }
 0x316   : > { %v10804_v36 = vadd.f32 %v3895_v56, %v10645_v51  ;;  %v7955_v34 = vpop.f32.mrf.mxu0 }
 0x317   : > { %v7899_v2 = vpop.f32.mrf.mxu1 }
 0x318   : > { %v3977_v32 = vadd.f32 %v7899_v2, %v10652_v52 }
 0x319   : > { %v3908_v42 = vpop.f32.mrf.mxu1 }
 0x31a   : > { %v3975_v26 = vadd.f32 %v3908_v42, %v10664_v13  ;;  %v10810_v61 = vadd.f32 %v7947_v24, %v3977_v32 }
 0x31b   : > { %v7900_v39 = vpop.f32.mrf.mxu1 }
 0x31c   : > { %v10813_v28 = vadd.f32 %v7900_v39, %v10670_v12  ;;  %v10817_v45 = vadd.f32 %v4406_v7, %v3975_v26  ;;  %v4438_v12 = vpop.f32.mrf.mxu0 }
 0x31d   : > { %v3911_v51 = vpop.f32.mrf.mxu1 }
 0x31e   : > { %11353 = vst [vmem:[#allocation18_spill] sm:$0xff] %v10813_v28  ;;  %v10820_v62 = vadd.f32 %v3911_v51, %v10679_v14  ;;  %v10834_v42 = vpop.f32.mrf.mxu0 }
 0x31f   : > { %v7903_v52 = vpop.f32.mrf.mxu1  ;;  %11358 = vst [vmem:[#allocation22_spill] sm:$0xff] %v10834_v42 }
 0x320   : > { %11355 = vst [vmem:[#allocation41_spill] sm:$0xff] %v10820_v62  ;;  %v3981_v58 = vadd.f32 %v7903_v52, %v10689_v57  ;;  %v10840_v51 = vpop.f32.mrf.mxu0 }
 0x321   : > { %v3924_v38 = vpop.f32.mrf.mxu1  ;;  %11359 = vst [vmem:[#allocation24_spill] sm:$0xff] %v10840_v51 }
 0x322   : > { %v3979_v13 = vadd.f32 %v3924_v38, %v10695_v17  ;;  %v10824_v24 = vadd.f32 %v7951_v48, %v3981_v58 }
 0x323   : > { %v7904_v56 = vpop.f32.mrf.mxu1 }
 0x324   : > { %v10827_v2 = vadd.f32 %v7904_v56, %v10698_v19  ;;  %v10829_v7 = vadd.f32 %v4422_v18, %v3979_v13  ;;  %v10850_v38 = vpop.f32.mrf.mxu0 }
 0x325   : > { %v3927_v32 = vpop.f32.mrf.mxu1 }
 0x326   : > { %11356 = vst [vmem:[#allocation20_spill] sm:$0xff] %v10827_v2  ;;  %v10832_v14 = vadd.f32 %v3927_v32, %v10704_v23  ;;  %v10858_v56 = vpop.f32.mrf.mxu0 }
 0x327   : > { %v7907_v26 = vpop.f32.mrf.mxu1 }
 0x328   : > { %11357 = vst [vmem:[#allocation21_spill] sm:$0xff] %v10832_v14  ;;  %v3985_v57 = vadd.f32 %v7907_v26, %v10710_v15 }
 0x329   : > { %v3940_v39 = vpop.f32.mrf.mxu1 }
 0x32a   : > { %v3983_v17 = vadd.f32 %v3940_v39, %v10716_v5  ;;  %v10838_v48 = vadd.f32 %v7955_v34, %v3985_v57 }
 0x32b   : > { %v7908_v19 = vpop.f32.mrf.mxu1 }
 0x32c   : > { %v10843_v18 = vadd.f32 %v7908_v19, %v10719_v35  ;;  %v10845_v52 = vadd.f32 %v4438_v12, %v3983_v17  ;;  %v10862_v12 = vpop.f32.mrf.mxu0 }
 0x32d   : > { %v3943_v23 = vpop.f32.mrf.mxu1 }
 0x32e   : > { %11360 = vst [vmem:[#allocation27_spill] sm:$0xff] %v10843_v18  ;;  %v10848_v58 = vadd.f32 %v3943_v23, %v10725_v53 }
 0x32f   : > { %v7975_v15 = vpop.f32.mrf.mxu1 }
 0x330   : > { %11361 = vst [vmem:[#allocation29_spill] sm:$0xff] %v10848_v58  ;;  %v10853_v13 = vadd.f32 %v7975_v15, %v10731_v29  ;;  %v10870_v29 = vpop.f32.mrf.mxu0 }
 0x331   : > { %v4713_v5 = vpop.f32.mrf.mxu1 }
 0x332   : > { %v10856_v34 = vadd.f32 %v4713_v5, %v10739_v33  ;;  %v10876_v19 = vpop.f32.mrf.mxu0 }
 0x333   : > { %v7976_v35 = vpop.f32.mrf.mxu1 }
 0x335   : > { %v10860_v32 = vpop.f32.mrf.mxu1 }
 0x337   : > { %v7979_v26 = vpop.f32.mrf.mxu1 }
 0x338   : > { %v10865_v53 = vadd.f32 %v7979_v26, %v10749_v0  ;;  %v10884_v26 = vpop.f32.mrf.mxu0 }
 0x339   : > { %v4729_v57 = vpop.f32.mrf.mxu1 }
 0x33a   : > { %v10868_v39 = vadd.f32 %v4729_v57, %v10756_v59  ;;  %v10890_v51 = vpop.f32.mrf.mxu0 }
 0x33b   : > { %v10872_v17 = vpop.f32.mrf.mxu1 }
 0x33d   : > { %v10874_v33 = vpop.f32.mrf.mxu1 }
 0x33f   : > { %v7983_v23 = vpop.f32.mrf.mxu1 }
 0x340   : > { %v10879_v15 = vadd.f32 %v7983_v23, %v10766_v16  ;;  %v10898_v23 = vpop.f32.mrf.mxu0 }
 0x341   : > { %v4745_v5 = vpop.f32.mrf.mxu1 }
 0x342   : > { %v10882_v0 = vadd.f32 %v4745_v5, %v10773_v31  ;;  %v10904_v8 = vpop.f32.mrf.mxu0 }
 0x343   : > { %v10886_v59 = vpop.f32.mrf.mxu1 }
 0x345   : > { %v10888_v57 = vpop.f32.mrf.mxu1 }
 0x347   : > { %v7987_v58 = vpop.f32.mrf.mxu1 }
 0x348   : > { %v10893_v42 = vadd.f32 %v7987_v58, %v10781_v1  ;;  %v10912_v58 = vpop.f32.mrf.mxu0 }
 0x349   : > { %v4761_v18 = vpop.f32.mrf.mxu1 }
 0x34a   : > { %v10896_v16 = vadd.f32 %v4761_v18, %v10790_v30  ;;  %v10918_v63 = vpop.f32.mrf.mxu0 }
 0x34b   : > { %v10900_v31 = vpop.f32.mrf.mxu1 }
 0x34d   : > { %v10902_v5 = vpop.f32.mrf.mxu1 }
 0x34f   : > { %v7991_v14 = vpop.f32.mrf.mxu1 }
 0x350   : > { %v10907_v44 = vadd.f32 %v7991_v14, %v10796_v50  ;;  %v10926_v14 = vpop.f32.mrf.mxu0 }
 0x351   : > { %v4777_v2 = vpop.f32.mrf.mxu1 }
 0x352   : > { %11362 = vst [vmem:[#allocation32_spill] sm:$0xff] %v10907_v44  ;;  %v10910_v1 = vadd.f32 %v4777_v2, %v10801_v9 }
 0x353   : > { %v10914_v30 = vpop.f32.mrf.mxu1 }
 0x354   : > { %11363 = vst [vmem:[#allocation34_spill] sm:$0xff] %v10910_v1  ;;  %v10932_v1 = vpop.f32.mrf.mxu0 }
 0x355   : > { %v10916_v18 = vpop.f32.mrf.mxu1 }
 0x356   : > { %11364 = vst [vmem:[#allocation33_spill] sm:$0xff] %v10916_v18 }
 0x357   : > { %v7995_v62 = vpop.f32.mrf.mxu1 }
 0x358   : > { %v10921_v25 = vadd.f32 %v7995_v62, %v10810_v61  ;;  %v10940_v62 = vpop.f32.mrf.mxu0 }
 0x359   : > { %v4793_v28 = vpop.f32.mrf.mxu1 }
 0x35a   : > { %11365 = vst [vmem:[#allocation35_spill] sm:$0xff] %v10921_v25  ;;  %v10924_v50 = vadd.f32 %v4793_v28, %v10817_v45 }
 0x35b   : > { %v10928_v9 = vpop.f32.mrf.mxu1 }
 0x35c   : > { %11366 = vst [vmem:[#allocation36_spill] sm:$0xff] %v10924_v50  ;;  %11367 = vst [vmem:[#allocation38_spill] sm:$0xff] %v10928_v9  ;;  %v10946_v50 = vpop.f32.mrf.mxu0 }
 0x35d   : > { %v10930_v2 = vpop.f32.mrf.mxu1 }
 0x35e   : > { %11368 = vst [vmem:[#allocation40_spill] sm:$0xff] %v10930_v2 }
 0x35f   : > { %v7999_v44 = vpop.f32.mrf.mxu1 }
 0x360   : > { %v10935_v18 = vadd.f32 %v7999_v44, %v10824_v24  ;;  %v10954_v24 = vpop.f32.mrf.mxu0 }
 0x361   : > { %v4809_v27 = vpop.f32.mrf.mxu1 }
 0x362   : > { %11369 = vst [vmem:[#allocation23_spill] sm:$0xff] %v10935_v18  ;;  %v10938_v61 = vadd.f32 %v4809_v27, %v10829_v7  ;;  %v4456_v7 = vadd.f32 %v10676_v40, %v10734_v20  ;;  %v4454_v18 = vadd.f32 %v10686_v54, %v10741_v10  ;;  %v10974_v40 = vld [vmem:[%s11227_s4] ss:$0 sm:$0xff]  ;;  %v4460_v10 = vadd.f32 %v10701_v43, %v10752_v46 }
 0x363   : > { %v10942_v28 = vpop.f32.mrf.mxu1  ;;  %v5600_v43 = vadd.f32 %v10876_v19, %v10865_v53 }
 0x364   : > { %11370 = vst [vmem:[#allocation39_spill] sm:$0xff] %v10938_v61 }
 0x365   : > { %v10944_v45 = vpop.f32.mrf.mxu1 }
 0x366   : > { %11371 = vst [vmem:[#allocation42_spill] sm:$0xff] %v10944_v45  ;;  %v4843_v45 = vadd.f32 %v7976_v35, %v4456_v7  ;;  %v4458_v7 = vadd.f32 %v10707_v4, %v10758_v22 }
 0x367   : > { %v8003_v25 = vpop.f32.mrf.mxu1 }
 0x368   : > { %v10949_v2 = vadd.f32 %v8003_v25, %v10838_v48  ;;  %v5596_v25 = vadd.f32 %v10850_v38, %v10853_v13  ;;  %v10966_v48 = vpop.f32.mrf.mxu0  ;;  %v5597_v54 = vadd.f32 %v10862_v12, %v4843_v45  ;;  %v4845_v46 = vadd.f32 %v10874_v33, %v4458_v7 }
 0x369   : > { %v4825_v9 = vpop.f32.mrf.mxu1  ;;  %v4464_v33 = vadd.f32 %v10722_v47, %v10769_v21  ;;  %v5604_v21 = vadd.f32 %v10904_v8, %v10879_v15 }
 0x36a   : > { %11372 = vst [vmem:[#allocation28_spill] sm:$0xff] %v10949_v2  ;;  %v10952_v44 = vadd.f32 %v4825_v9, %v10845_v52  ;;  %v4841_v9 = vadd.f32 %v10860_v32, %v4454_v18  ;;  %v5594_v2 = vadd.f32 %v10858_v56, %v10856_v34  ;;  %v10979_v38 = vpop.f32.mrf.mxu0  ;;  %v4847_v56 = vadd.f32 %v10872_v17, %v4460_v10 }
 0x36b   : > { %v10956_v27 = vpop.f32.mrf.mxu1  ;;  %v4851_v7 = vadd.f32 %v10886_v59, %v4464_v33  ;;  %v5602_v59 = vadd.f32 %v10912_v58, %v10882_v0 }
 0x36c   : > { %11373 = vst [vmem:[#allocation45_spill] sm:$0xff] %v10952_v44  ;;  %v5595_v34 = vadd.f32 %v10870_v29, %v4841_v9  ;;  %v5598_v29 = vadd.f32 %v10884_v26, %v10868_v39 }
 0x36d   : > { %v10960_v61 = vpop.f32.mrf.mxu1 }
 0x36f   : > { %v8071_v52 = vpop.f32.mrf.mxu1 }
 0x370   : > { %v6094_v44 = vadd.f32 %v8071_v52, %v5596_v25 }
 0x371   : > { %v5965_v20 = vpop.f32.mrf.mxu1 }
 0x372   : > { %v6092_v35 = vadd.f32 %v5965_v20, %v5594_v2  ;;  %v6132_v32 = vadd.f32 %v10974_v40, %v6094_v44  ;;  %v10991_v44 = vpop.f32.mrf.mxu0 }
 0x373   : > { %v8072_v13 = vpop.f32.mrf.mxu1 }
 0x374   : > { %v6095_v18 = vadd.f32 %v8072_v13, %v5597_v54  ;;  %v6130_v2 = vadd.f32 %v10974_v40, %v6092_v35  ;;  %v6164_v17 = vmax.f32 %v6132_v32, 0.0  ;;  %v5601_v35 = vadd.f32 %v10890_v51, %v4847_v56  ;;  %v10999_v19 = vpop.f32.mrf.mxu0 }
 0x375   : > { %v5968_v25 = vpop.f32.mrf.mxu1  ;;  %v5599_v32 = vadd.f32 %v10898_v23, %v4845_v46  ;;  %v4462_v51 = vadd.f32 %v10728_v3, %v10775_v60 }
 0x376   : > { %v6133_v12 = vadd.f32 %v10974_v40, %v6095_v18  ;;  %v6093_v45 = vadd.f32 %v5968_v25, %v5595_v34  ;;  %v6162_v54 = vmax.f32 %v6130_v2, 0.0 }
 0x377   : > { %v8075_v52 = vpop.f32.mrf.mxu1 }
 0x378   : > { %v6165_v9 = vmax.f32 %v6133_v12, 0.0  ;;  %v6131_v4 = vadd.f32 %v10974_v40, %v6093_v45  ;;  %v6098_v22 = vadd.f32 %v8075_v52, %v5600_v43  ;;  %v4849_v12 = vadd.f32 %v10888_v57, %v4462_v51  ;;  %v11011_v45 = vpop.f32.mrf.mxu0 }
 0x379   : > { %v5981_v20 = vpop.f32.mrf.mxu1  ;;  %v4468_v57 = vadd.f32 %v10744_v37, %v10784_v55  ;;  %v5608_v55 = vadd.f32 %v10932_v1, %v10893_v42 }
 0x37a   : > { %v6195_v10 = vpack.c.bf16 %v6165_v9, %v6164_v17  ;;  %v6163_v13 = vmax.f32 %v6131_v4, 0.0  ;;  %v6096_v53 = vadd.f32 %v5981_v20, %v5598_v29  ;;  %v6136_v39 = vadd.f32 %v10974_v40, %v6098_v22  ;;  %v11019_v4 = vpop.f32.mrf.mxu0 }
 0x37b   : > { %v8076_v18 = vpop.f32.mrf.mxu1  ;;  %v5605_v29 = vadd.f32 %v10918_v63, %v4851_v7  ;;  %v5603_v20 = vadd.f32 %v10926_v14, %v4849_v12  ;;  %v4466_v63 = vadd.f32 %v10747_v11, %v10792_v41 }
 0x37c   : > { %v6099_v26 = vadd.f32 %v8076_v18, %v5601_v35  ;;  %v6194_v34 = vpack.c.bf16 %v6163_v13, %v6162_v54  ;;  %v6134_v25 = vadd.f32 %v10974_v40, %v6096_v53  ;;  %v6168_v3 = vmax.f32 %v6136_v39, 0.0  ;;  %v11031_v18 = vpop.f32.mrf.mxu0 }
 0x37d   : > { %v5984_v56 = vpop.f32.mrf.mxu1  ;;  %v4855_v54 = vadd.f32 %v10900_v31, %v4468_v57  ;;  %v4853_v33 = vadd.f32 %v10902_v5, %v4466_v63  ;;  %v5606_v31 = vadd.f32 %v10940_v62, %v10896_v16  ;;  %v4472_v5 = vadd.f32 %v10761_v49, %v10799_v6  ;;  %v11375_v6 = vld [vmem:[#allocation32_spill] sm:$0xff] }
 0x37e   : > { %v6137_v2 = vadd.f32 %v10974_v40, %v6099_v26  ;;  %v6097_v47 = vadd.f32 %v5984_v56, %v5599_v32  ;;  %8117 = vmatprep.mubr.bf16.mxu0 %v6194_v34  ;;  %v6166_v17 = vmax.f32 %v6134_v25, 0.0  ;;  %v11039_v56 = vpop.f32.mrf.mxu0 }
 0x37f   : > { %v8079_v23 = vpop.f32.mrf.mxu1  ;;  %8118 = vmatmul.mubr.bf16.vlgmr.msra.gmra.mxu0 %v6195_v10  ;;  %v5609_v34 = vadd.f32 %v10946_v50, %v4855_v54  ;;  %v11374_v50 = vld [vmem:[#allocation26_spill] sm:$0xff] }
 0x380   : > { %v6169_v60 = vmax.f32 %v6137_v2, 0.0  ;;  %v6135_v43 = vadd.f32 %v10974_v40, %v6097_v47  ;;  %v6102_v46 = vadd.f32 %v8079_v23, %v5604_v21  ;;  %v5607_v2 = vadd.f32 %v10954_v24, %v4853_v33  ;;  %v11379_v54 = vld [vmem:[#allocation30_spill] sm:$0xff] }
 0x381   : > { %v5997_v52 = vpop.f32.mrf.mxu1  ;;  %v4859_v21 = vadd.f32 %v10914_v30, %v4472_v5  ;;  %v4470_v12 = vadd.f32 %v11374_v50, %v10804_v36 }
 0x382   : > { %v6197_v9 = vpack.c.bf16 %v6169_v60, %v6168_v3  ;;  %v6167_v8 = vmax.f32 %v6135_v43, 0.0  ;;  %v6100_v15 = vadd.f32 %v5997_v52, %v5602_v59  ;;  %v6140_v0 = vadd.f32 %v10974_v40, %v6102_v46  ;;  %v11376_v43 = vld [vmem:[#allocation33_spill] sm:$0xff]  ;;  %v8047_v52 = vpop.f32.mrf.mxu0 }
 0x383   : > { %v8080_v22 = vpop.f32.mrf.mxu1  ;;  %v5612_v60 = vadd.f32 %v10966_v48, %v11375_v6  ;;  %v4857_v46 = vadd.f32 %v11376_v43, %v4470_v12  ;;  %v5613_v57 = vadd.f32 %v10991_v44, %v4859_v21 }
 0x384   : > { %v6103_v58 = vadd.f32 %v8080_v22, %v5605_v29  ;;  %v6196_v35 = vpack.c.bf16 %v6167_v8, %v6166_v17  ;;  %v6138_v13 = vadd.f32 %v10974_v40, %v6100_v15  ;;  %v6172_v11 = vmax.f32 %v6140_v0, 0.0  ;;  %v11377_v29 = vld [vmem:[#allocation34_spill] sm:$0xff] }
 0x385   : > { %v6000_v10 = vpop.f32.mrf.mxu1  ;;  %v5610_v30 = vadd.f32 %v10979_v38, %v11377_v29 }
 0x386   : > { %v6141_v53 = vadd.f32 %v10974_v40, %v6103_v58  ;;  %v6101_v37 = vadd.f32 %v6000_v10, %v5603_v20  ;;  %8121 = vmatprep.mubr.bf16.mxu0 %v6196_v35  ;;  %v6170_v7 = vmax.f32 %v6138_v13, 0.0  ;;  %v5563_v20 = vpop.f32.mrf.mxu0  ;;  %v11378_v35 = vld [vmem:[#allocation18_spill] sm:$0xff] }
 0x387   : > { %v8083_v14 = vpop.f32.mrf.mxu1  ;;  %8122 = vmatmul.mubr.bf16.gmra.mxu0 %v6197_v9  ;;  %v4476_v63 = vadd.f32 %v11379_v54, %v11378_v35 }
 0x388   : > { %v6173_v41 = vmax.f32 %v6141_v53, 0.0  ;;  %v6139_v39 = vadd.f32 %v10974_v40, %v6101_v37  ;;  %v6106_v26 = vadd.f32 %v8083_v14, %v5608_v55  ;;  %v5611_v53 = vadd.f32 %v10999_v19, %v4857_v46  ;;  %v11380_v55 = vld [vmem:[#allocation38_spill] sm:$0xff]  ;;  %v11381_v14 = vld [vmem:[#allocation41_spill] sm:$0xff] }
 0x389   : > { %v6013_v32 = vpop.f32.mrf.mxu1  ;;  %v4863_v33 = vadd.f32 %v11380_v55, %v4476_v63 }
 0x38a   : > { %v6199_v51 = vpack.c.bf16 %v6173_v41, %v6172_v11  ;;  %v6171_v42 = vmax.f32 %v6139_v39, 0.0  ;;  %v6104_v1 = vadd.f32 %v6013_v32, %v5606_v31  ;;  %v6144_v16 = vadd.f32 %v10974_v40, %v6106_v26  ;;  %v11382_v31 = vld [vmem:[#allocation17_spill] sm:$0xff]  ;;  %v11383_v32 = vld [vmem:[#allocation35_spill] sm:$0xff] }
 0x38b   : > { %v8084_v25 = vpop.f32.mrf.mxu1  ;;  %v4474_v44 = vadd.f32 %v11382_v31, %v11381_v14  ;;  %v5617_v21 = vadd.f32 %v11031_v18, %v4863_v33 }
 0x38c   : > { %v6107_v62 = vadd.f32 %v8084_v25, %v5609_v34  ;;  %v6198_v47 = vpack.c.bf16 %v6171_v42, %v6170_v7  ;;  %v6142_v59 = vadd.f32 %v10974_v40, %v6104_v1  ;;  %v6176_v17 = vmax.f32 %v6144_v16, 0.0  ;;  %v8048_v7 = vpop.f32.mrf.mxu0  ;;  %v11385_v1 = vld [vmem:[#allocation36_spill] sm:$0xff] }
 0x38d   : > { %v6016_v23 = vpop.f32.mrf.mxu1  ;;  %v5616_v34 = vadd.f32 %v11011_v45, %v11383_v32  ;;  %v5614_v5 = vadd.f32 %v11019_v4, %v11385_v1 }
 0x38e   : > { %v6145_v3 = vadd.f32 %v10974_v40, %v6107_v62  ;;  %v6105_v49 = vadd.f32 %v6016_v23, %v5607_v2  ;;  %8125 = vmatprep.mubr.bf16.mxu0 %v6198_v47  ;;  %v6174_v22 = vmax.f32 %v6142_v59, 0.0  ;;  %v5566_v59 = vpop.f32.mrf.mxu0 }
 0x38f   : > { %v8087_v24 = vpop.f32.mrf.mxu1  ;;  %8126 = vmatmul.mubr.bf16.gmra.mxu0 %v6199_v51  ;;  %v11384_v51 = vld [vmem:[#allocation40_spill] sm:$0xff] }
 0x390   : > { %v6177_v36 = vmax.f32 %v6145_v3, 0.0  ;;  %v6143_v9 = vadd.f32 %v10974_v40, %v6105_v49  ;;  %v6110_v8 = vadd.f32 %v8087_v24, %v5612_v60  ;;  %v4861_v42 = vadd.f32 %v11384_v51, %v4474_v44  ;;  %v11386_v3 = vld [vmem:[#allocation20_spill] sm:$0xff]  ;;  %v11387_v49 = vld [vmem:[#allocation31_spill] sm:$0xff]  ;;  %v11395_v51 = vld [vmem:[#allocation29_spill] sm:$0xff] }
 0x391   : > { %v6029_v15 = vpop.f32.mrf.mxu1  ;;  %v4480_v6 = vadd.f32 %v11387_v49, %v11386_v3  ;;  %v11393_v44 = vld [vmem:[#allocation27_spill] sm:$0xff] }
 0x392   : > { %v6201_v0 = vpack.c.bf16 %v6177_v36, %v6176_v17  ;;  %v6175_v58 = vmax.f32 %v6143_v9, 0.0  ;;  %v6108_v48 = vadd.f32 %v6029_v15, %v5610_v30  ;;  %v6148_v13 = vadd.f32 %v10974_v40, %v6110_v8  ;;  %v11388_v30 = vld [vmem:[#allocation21_spill] sm:$0xff]  ;;  %v11389_v17 = vld [vmem:[#allocation19_spill] sm:$0xff]  ;;  %v8051_v36 = vpop.f32.mrf.mxu0 }
 0x393   : > { %v8088_v10 = vpop.f32.mrf.mxu1  ;;  %v5615_v46 = vadd.f32 %v11039_v56, %v4861_v42  ;;  %v4867_v29 = vadd.f32 %v10942_v28, %v4480_v6  ;;  %v4478_v18 = vadd.f32 %v11389_v17, %v11388_v30  ;;  %v11392_v56 = vld [vmem:[#allocation39_spill] sm:$0xff]  ;;  %v11396_v42 = vld [vmem:[#allocation24_spill] sm:$0xff] }
 0x394   : > { %v6111_v38 = vadd.f32 %v8088_v10, %v5613_v57  ;;  %v6200_v37 = vpack.c.bf16 %v6175_v58, %v6174_v22  ;;  %v6146_v41 = vadd.f32 %v10974_v40, %v6108_v48  ;;  %v6180_v25 = vmax.f32 %v6148_v13, 0.0  ;;  %v11390_v22 = vld [vmem:[#allocation23_spill] sm:$0xff]  ;;  %v11391_v58 = vld [vmem:[#allocation42_spill] sm:$0xff] }
 0x395   : > { %v6032_v11 = vpop.f32.mrf.mxu1  ;;  %v4865_v48 = vadd.f32 %v11391_v58, %v4478_v18  ;;  %v5618_v54 = vadd.f32 %v5563_v20, %v11392_v56  ;;  %v11103_v56 = vld [vmem:[%s11229_s6] ss:$0 sm:$0xff] }
 0x396   : > { %v6149_v39 = vadd.f32 %v10974_v40, %v6111_v38  ;;  %v6109_v26 = vadd.f32 %v6032_v11, %v5611_v53  ;;  %8129 = vmatprep.mubr.bf16.mxu0 %v6200_v37  ;;  %v6178_v50 = vmax.f32 %v6146_v41, 0.0  ;;  %v5579_v38 = vpop.f32.mrf.mxu0  ;;  %v5621_v37 = vadd.f32 %v8048_v7, %v4867_v29 }
 0x397   : > { %v8091_v19 = vpop.f32.mrf.mxu1  ;;  %8130 = vmatmul.mubr.bf16.gmra.mxu0 %v6201_v0  ;;  %v5620_v0 = vadd.f32 %v8047_v52, %v11390_v22  ;;  %v11394_v52 = vld [vmem:[#allocation22_spill] sm:$0xff]  ;;  %v5619_v20 = vadd.f32 %v5566_v59, %v4865_v48 }
 0x398   : > { %v6181_v16 = vmax.f32 %v6149_v39, 0.0  ;;  %v6147_v62 = vadd.f32 %v10974_v40, %v6109_v26  ;;  %v6114_v2 = vadd.f32 %v8091_v19, %v5616_v34  ;;  %v4484_v11 = vadd.f32 %v11394_v52, %v11393_v44  ;;  %v8052_v1 = vpop.f32.mrf.mxu0 }
 0x399   : > { %v6045_v47 = vpop.f32.mrf.mxu1  ;;  %v4482_v19 = vadd.f32 %v11396_v42, %v11395_v51 }
 0x39a   : > { %v6203_v12 = vpack.c.bf16 %v6181_v16, %v6180_v25  ;;  %v6179_v23 = vmax.f32 %v6147_v62, 0.0  ;;  %v6112_v45 = vadd.f32 %v6045_v47, %v5614_v5  ;;  %v6152_v43 = vadd.f32 %v10974_v40, %v6114_v2  ;;  %v11397_v5 = vld [vmem:[#allocation28_spill] sm:$0xff]  ;;  %v11398_v47 = vld [vmem:[#allocation45_spill] sm:$0xff]  ;;  %v5582_v49 = vpop.f32.mrf.mxu0 }
 0x39b   : > { %v8092_v60 = vpop.f32.mrf.mxu1  ;;  %v4871_v34 = vadd.f32 %v10956_v27, %v4484_v11  ;;  %v5624_v25 = vadd.f32 %v8051_v36, %v11397_v5 }
 0x39c   : > { %v6115_v4 = vadd.f32 %v8092_v60, %v5617_v21  ;;  %v6202_v24 = vpack.c.bf16 %v6179_v23, %v6178_v50  ;;  %v6150_v8 = vadd.f32 %v10974_v40, %v6112_v45  ;;  %v6184_v28 = vmax.f32 %v6152_v43, 0.0 }
 0x39d   : > { %v6048_v9 = vpop.f32.mrf.mxu1  ;;  %v5622_v21 = vadd.f32 %v5579_v38, %v11398_v47  ;;  %v4869_v50 = vadd.f32 %v10960_v61, %v4482_v19  ;;  %v5625_v3 = vadd.f32 %v8052_v1, %v4871_v34  ;;  %v8424_v38 = vld [vmem:[%s8822_s12] sm:$0xff]   ;;  %v8426_v19 = vld [vmem:[%s8822_s12 + $0x10] sm:$0xff]  }
 0x39e   : > { %v6153_v15 = vadd.f32 %v10974_v40, %v6115_v4  ;;  %v6113_v57 = vadd.f32 %v6048_v9, %v5615_v46  ;;  %8133 = vmatprep.mubr.bf16.mxu0 %v6202_v24  ;;  %v6182_v55 = vmax.f32 %v6150_v8, 0.0  ;;  %v6230_v1 = vunpack.c.l.bf16 %v8426_v19 }
 0x39f   : > { %v8095_v35 = vpop.f32.mrf.mxu1  ;;  %8134 = vmatmul.mubr.bf16.gmra.mxu0 %v6203_v12  ;;  %v5623_v29 = vadd.f32 %v5582_v49, %v4869_v50  ;;  %v8427_v49 = vld [vmem:[%s8822_s12 + $0x28] sm:$0xff]  }
 0x3a0   : > { %v6185_v63 = vmax.f32 %v6153_v15, 0.0  ;;  %v6151_v10 = vadd.f32 %v10974_v40, %v6113_v57  ;;  %v6118_v13 = vadd.f32 %v8095_v35, %v5620_v0 }
 0x3a1   : > { %v6061_v53 = vpop.f32.mrf.mxu1 }
 0x3a2   : > { %v6205_v33 = vpack.c.bf16 %v6185_v63, %v6184_v28  ;;  %v6183_v14 = vmax.f32 %v6151_v10, 0.0  ;;  %v6116_v31 = vadd.f32 %v6061_v53, %v5618_v54  ;;  %v6156_v39 = vadd.f32 %v10974_v40, %v6118_v13  ;;  %v8423_v28 = vld [vmem:[%s8822_s12 + $0x8] sm:$0xff]  }
 0x3a3   : > { %v8096_v41 = vpop.f32.mrf.mxu1  ;;  %v6228_v63 = vunpack.c.l.bf16 %v8423_v28 }
 0x3a4   : > { %v6119_v26 = vadd.f32 %v8096_v41, %v5621_v37  ;;  %v6204_v32 = vpack.c.bf16 %v6183_v14, %v6182_v55  ;;  %v6154_v16 = vadd.f32 %v10974_v40, %v6116_v31  ;;  %v6188_v27 = vmax.f32 %v6156_v39, 0.0  ;;  %v8425_v39 = vld [vmem:[%s8822_s12 + $0x18] sm:$0xff]  }
 0x3a5   : > { %v6064_v7 = vpop.f32.mrf.mxu1  ;;  %v6229_v37 = vunpack.c.h.bf16 %v8423_v28  ;;  %v6233_v5 = vunpack.c.h.bf16 %v8425_v39 }
 0x3a6   : > { %v6157_v62 = vadd.f32 %v10974_v40, %v6119_v26  ;;  %v6117_v2 = vadd.f32 %v6064_v7, %v5619_v20  ;;  %8137 = vmatprep.mubr.bf16.mxu0 %v6204_v32  ;;  %v6186_v60 = vmax.f32 %v6154_v16, 0.0  ;;  %v6232_v26 = vunpack.c.l.bf16 %v8425_v39 }
 0x3a7   : > { %v8099_v12 = vpop.f32.mrf.mxu1  ;;  %8138 = vmatmul.mubr.bf16.gmra.mxu0 %v6205_v33  ;;  %v6227_v33 = vunpack.c.h.bf16 %v8424_v38 }
 0x3a8   : > { %v6189_v23 = vmax.f32 %v6157_v62, 0.0  ;;  %v6155_v45 = vadd.f32 %v10974_v40, %v6117_v2  ;;  %v6122_v59 = vadd.f32 %v8099_v12, %v5624_v25 }
 0x3a9   : > { %v6077_v6 = vpop.f32.mrf.mxu1 }
 0x3aa   : > { %v6207_v43 = vpack.c.bf16 %v6189_v23, %v6188_v27  ;;  %v6187_v4 = vmax.f32 %v6155_v45, 0.0  ;;  %v6120_v46 = vadd.f32 %v6077_v6, %v5622_v21  ;;  %v6160_v30 = vadd.f32 %v10974_v40, %v6122_v59 }
 0x3ab   : > { %v8100_v24 = vpop.f32.mrf.mxu1  ;;  %v6231_v27 = vunpack.c.h.bf16 %v8426_v19  ;;  %v6236_v6 = vunpack.c.l.bf16 %v8427_v49 }
 0x3ac   : > { %v6123_v17 = vadd.f32 %v8100_v24, %v5625_v3  ;;  %v6206_v61 = vpack.c.bf16 %v6187_v4, %v6186_v60  ;;  %v6158_v36 = vadd.f32 %v10974_v40, %v6120_v46  ;;  %v6192_v15 = vmax.f32 %v6160_v30, 0.0 }
 0x3ad   : > { %v6080_v18 = vpop.f32.mrf.mxu1 }
 0x3ae   : > { %v6161_v9 = vadd.f32 %v10974_v40, %v6123_v17  ;;  %v6121_v8 = vadd.f32 %v6080_v18, %v5623_v29  ;;  %8141 = vmatprep.mubr.bf16.mxu0 %v6206_v61  ;;  %v6190_v0 = vmax.f32 %v6158_v36, 0.0  ;;  %v8428_v29 = vld [vmem:[%s8822_s12 + $0x20] sm:$0xff]   ;;  %v6237_v61 = vunpack.c.h.bf16 %v8427_v49 }
 0x3af   : > { %8142 = vmatmul.mubr.bf16.gmra.mxu0 %v6207_v43  ;;  %v6234_v30 = vunpack.c.l.bf16 %v8428_v29 }
 0x3b0   : > { %v6193_v57 = vmax.f32 %v6161_v9, 0.0  ;;  %v6159_v22 = vadd.f32 %v10974_v40, %v6121_v8  ;;  %v6226_v40 = vunpack.c.l.bf16 %v8424_v38 }
 0x3b2   : > { %v6209_v58 = vpack.c.bf16 %v6193_v57, %v6192_v15  ;;  %v6191_v48 = vmax.f32 %v6159_v22, 0.0 }
 0x3b4   : > { %v6208_v35 = vpack.c.bf16 %v6191_v48, %v6190_v0 }
 0x3b6   : > { %8145 = vmatprep.mubr.bf16.mxu0 %v6208_v35 }
 0x3b7   : > { %8146 = vmatmul.mubr.bf16.gmra.mxu0 %v6209_v58  ;;  %v6235_v58 = vunpack.c.h.bf16 %v8428_v29 }
 0x43f   : > { %v8119_v54 = vpop.f32.mrf.mxu0 }
 0x440   : > { %v6355_v10 = vadd.f32 %v8119_v54, %v11103_v56 }
 0x441   : > { %v6346_v13 = vpop.f32.mrf.mxu0 }
 0x442   : > { %v6347_v53 = vadd.f32 %v11103_v56, %v6346_v13  ;;  %v6475_v14 = vadd.f32 %v6355_v10, %v6228_v63  ;;  %v8429_v63 = vld [vmem:[%s8822_s12 + $0x38] sm:$0xff]  }
 0x443   : > { %v8120_v55 = vpop.f32.mrf.mxu0  ;;  %v6240_v10 = vunpack.c.l.bf16 %v8429_v63 }
 0x444   : > { %v6358_v31 = vadd.f32 %v8120_v55, %v11103_v56  ;;  %v6473_v52 = vadd.f32 %v6347_v53, %v6226_v40  ;;  %v6507_v32 = vmax.f32 %v6475_v14, 0.0  ;;  %v8430_v55 = vld [vmem:[%s8822_s12 + $0x30] sm:$0xff]  }
 0x445   : > { %v6349_v44 = vpop.f32.mrf.mxu0 }
 0x446   : > { %v6476_v11 = vadd.f32 %v6358_v31, %v6229_v37  ;;  %v6350_v41 = vadd.f32 %v11103_v56, %v6349_v44  ;;  %v6505_v25 = vmax.f32 %v6473_v52, 0.0  ;;  %v6241_v31 = vunpack.c.h.bf16 %v8429_v63 }
 0x447   : > { %v8123_v20 = vpop.f32.mrf.mxu0 }
 0x448   : > { %v6508_v34 = vmax.f32 %v6476_v11, 0.0  ;;  %v6474_v51 = vadd.f32 %v6350_v41, %v6227_v33  ;;  %v6371_v42 = vadd.f32 %v8123_v20, %v11103_v56  ;;  %v6238_v33 = vunpack.c.l.bf16 %v8430_v55 }
 0x449   : > { %v6362_v7 = vpop.f32.mrf.mxu0 }
 0x44a   : > { %v7270_v16 = vpack.c.bf16 %v6508_v34, %v6507_v32  ;;  %v6506_v62 = vmax.f32 %v6474_v51, 0.0  ;;  %v6363_v2 = vadd.f32 %v11103_v56, %v6362_v7  ;;  %v6479_v50 = vadd.f32 %v6371_v42, %v6232_v26  ;;  %v8431_v7 = vld [vmem:[%s8822_s12 + $0x48] sm:$0xff]  }
 0x44b   : > { %v8124_v47 = vpop.f32.mrf.mxu0  ;;  %v6239_v34 = vunpack.c.h.bf16 %v8430_v55 }
 0x44c   : > { %7342 = vst [vmem:[%s11117_s22 + $0x8] sm:$0xff] %v7270_v16   ;;  %v7265_v21 = vpack.c.bf16 %v6506_v62, %v6505_v25  ;;  %v6374_v12 = vadd.f32 %v8124_v47, %v11103_v56  ;;  %v6477_v45 = vadd.f32 %v6363_v2, %v6230_v1  ;;  %v6511_v43 = vmax.f32 %v6479_v50, 0.0 }
 0x44d   : > { %v6365_v23 = vpop.f32.mrf.mxu0 }
 0x44e   : > { %7266 = vst [vmem:[%s11117_s22] sm:$0xff] %v7265_v21   ;;  %v6480_v59 = vadd.f32 %v6374_v12, %v6233_v5  ;;  %v6366_v3 = vadd.f32 %v11103_v56, %v6365_v23  ;;  %v6509_v18 = vmax.f32 %v6477_v45, 0.0  ;;  %v6244_v5 = vunpack.c.l.bf16 %v8431_v7  ;;  %v8432_v21 = vld [vmem:[%s8822_s12 + $0x40] sm:$0xff]  }
 0x44f   : > { %v8127_v60 = vpop.f32.mrf.mxu0  ;;  %v6242_v50 = vunpack.c.l.bf16 %v8432_v21 }
 0x450   : > { %v6512_v4 = vmax.f32 %v6480_v59, 0.0  ;;  %v6478_v46 = vadd.f32 %v6366_v3, %v6231_v27  ;;  %v6387_v24 = vadd.f32 %v8127_v60, %v11103_v56  ;;  %v6245_v27 = vunpack.c.h.bf16 %v8431_v7 }
 0x451   : > { %v6378_v17 = vpop.f32.mrf.mxu0 }
 0x452   : > { %v7280_v36 = vpack.c.bf16 %v6512_v4, %v6511_v43  ;;  %v6510_v9 = vmax.f32 %v6478_v46, 0.0  ;;  %v6379_v8 = vadd.f32 %v11103_v56, %v6378_v17  ;;  %v6483_v22 = vadd.f32 %v6387_v24, %v6236_v6  ;;  %v8433_v17 = vld [vmem:[%s8822_s12 + $0x58] sm:$0xff]  }
 0x453   : > { %v8128_v15 = vpop.f32.mrf.mxu0  ;;  %v6243_v6 = vunpack.c.h.bf16 %v8432_v21 }
 0x454   : > { %7344 = vst [vmem:[%s11117_s22 + $0x18] sm:$0xff] %v7280_v36   ;;  %v7275_v57 = vpack.c.bf16 %v6510_v9, %v6509_v18  ;;  %v6390_v0 = vadd.f32 %v8128_v15, %v11103_v56  ;;  %v6481_v35 = vadd.f32 %v6379_v8, %v6234_v30  ;;  %v6515_v38 = vmax.f32 %v6483_v22, 0.0 }
 0x455   : > { %v6381_v48 = vpop.f32.mrf.mxu0 }
 0x456   : > { %7343 = vst [vmem:[%s11117_s22 + $0x10] sm:$0xff] %v7275_v57   ;;  %v6484_v54 = vadd.f32 %v6390_v0, %v6237_v61  ;;  %v6382_v28 = vadd.f32 %v11103_v56, %v6381_v48  ;;  %v6513_v44 = vmax.f32 %v6481_v35, 0.0  ;;  %v6248_v61 = vunpack.c.l.bf16 %v8433_v17  ;;  %v8434_v57 = vld [vmem:[%s8822_s12 + $0x50] sm:$0xff]  }
 0x457   : > { %v8131_v13 = vpop.f32.mrf.mxu0  ;;  %v6246_v22 = vunpack.c.l.bf16 %v8434_v57 }
 0x458   : > { %v6516_v40 = vmax.f32 %v6484_v54, 0.0  ;;  %v6482_v53 = vadd.f32 %v6382_v28, %v6235_v58  ;;  %v6403_v37 = vadd.f32 %v8131_v13, %v11103_v56  ;;  %v6249_v58 = vunpack.c.h.bf16 %v8433_v17 }
 0x459   : > { %v6394_v14 = vpop.f32.mrf.mxu0 }
 0x45a   : > { %v7290_v52 = vpack.c.bf16 %v6516_v40, %v6515_v38  ;;  %v6514_v11 = vmax.f32 %v6482_v53, 0.0  ;;  %v6395_v41 = vadd.f32 %v11103_v56, %v6394_v14  ;;  %v6487_v20 = vadd.f32 %v6403_v37, %v6240_v10  ;;  %v8435_v14 = vld [vmem:[%s8822_s12 + $0x68] sm:$0xff]  }
 0x45b   : > { %v8132_v39 = vpop.f32.mrf.mxu0  ;;  %v6247_v40 = vunpack.c.h.bf16 %v8434_v57 }
 0x45c   : > { %7346 = vst [vmem:[%s11117_s22 + $0x28] sm:$0xff] %v7290_v52   ;;  %v7285_v26 = vpack.c.bf16 %v6514_v11, %v6513_v44  ;;  %v6406_v32 = vadd.f32 %v8132_v39, %v11103_v56  ;;  %v6485_v42 = vadd.f32 %v6395_v41, %v6238_v33  ;;  %v6519_v16 = vmax.f32 %v6487_v20, 0.0 }
 0x45d   : > { %v6397_v51 = vpop.f32.mrf.mxu0 }
 0x45e   : > { %7345 = vst [vmem:[%s11117_s22 + $0x20] sm:$0xff] %v7285_v26   ;;  %v6488_v19 = vadd.f32 %v6406_v32, %v6241_v31  ;;  %v6398_v1 = vadd.f32 %v11103_v56, %v6397_v51  ;;  %v6517_v23 = vmax.f32 %v6485_v42, 0.0  ;;  %v6252_v31 = vunpack.c.l.bf16 %v8435_v14  ;;  %v8436_v26 = vld [vmem:[%s8822_s12 + $0x60] sm:$0xff]  }
 0x45f   : > { %v8135_v25 = vpop.f32.mrf.mxu0  ;;  %v6250_v20 = vunpack.c.l.bf16 %v8436_v26 }
 0x460   : > { %v6520_v62 = vmax.f32 %v6488_v19, 0.0  ;;  %v6486_v2 = vadd.f32 %v6398_v1, %v6239_v34  ;;  %v6419_v47 = vadd.f32 %v8135_v25, %v11103_v56  ;;  %v6253_v34 = vunpack.c.h.bf16 %v8435_v14 }
 0x461   : > { %v6410_v12 = vpop.f32.mrf.mxu0 }
 0x462   : > { %v7300_v45 = vpack.c.bf16 %v6520_v62, %v6519_v16  ;;  %v6518_v59 = vmax.f32 %v6486_v2, 0.0  ;;  %v6411_v3 = vadd.f32 %v11103_v56, %v6410_v12  ;;  %v6491_v43 = vadd.f32 %v6419_v47, %v6244_v5  ;;  %v8437_v12 = vld [vmem:[%s8822_s12 + $0x78] sm:$0xff]  }
 0x463   : > { %v8136_v49 = vpop.f32.mrf.mxu0  ;;  %v6251_v62 = vunpack.c.h.bf16 %v8436_v26 }
 0x464   : > { %7348 = vst [vmem:[%s11117_s22 + $0x38] sm:$0xff] %v7300_v45   ;;  %v7295_v60 = vpack.c.bf16 %v6518_v59, %v6517_v23  ;;  %v6422_v4 = vadd.f32 %v8136_v49, %v11103_v56  ;;  %v6489_v24 = vadd.f32 %v6411_v3, %v6242_v50  ;;  %v6523_v36 = vmax.f32 %v6491_v43, 0.0 }
 0x465   : > { %v6413_v46 = vpop.f32.mrf.mxu0 }
 0x466   : > { %7347 = vst [vmem:[%s11117_s22 + $0x30] sm:$0xff] %v7295_v60   ;;  %v6492_v29 = vadd.f32 %v6422_v4, %v6245_v27  ;;  %v6414_v30 = vadd.f32 %v11103_v56, %v6413_v46  ;;  %v6521_v48 = vmax.f32 %v6489_v24, 0.0  ;;  %v6256_v27 = vunpack.c.l.bf16 %v8437_v12 }
 0x467   : > { %v8139_v18 = vpop.f32.mrf.mxu0  ;;  %v6257_v4 = vunpack.c.h.bf16 %v8437_v12 }
 0x468   : > { %v6524_v9 = vmax.f32 %v6492_v29, 0.0  ;;  %v6490_v8 = vadd.f32 %v6414_v30, %v6243_v6  ;;  %v6435_v15 = vadd.f32 %v8139_v18, %v11103_v56  ;;  %v8438_v6 = vld [vmem:[%s8822_s12 + $0x70] sm:$0xff]   ;;  %s11176_s12 = scalar_lea.hbm %s11230_s7, %s7261_s18 }
 0x469   : > { %v6426_v0 = vpop.f32.mrf.mxu0  ;;  %v6254_v60 = vunpack.c.l.bf16 %v8438_v6 }
 0x46a   : > { %v7310_v35 = vpack.c.bf16 %v6524_v9, %v6523_v36  ;;  %v6522_v54 = vmax.f32 %v6490_v8, 0.0  ;;  %v6427_v28 = vadd.f32 %v11103_v56, %v6426_v0  ;;  %v6495_v13 = vadd.f32 %v6435_v15, %v6248_v61 }
 0x46b   : > { %v8140_v63 = vpop.f32.mrf.mxu0  ;;  %v6255_v9 = vunpack.c.h.bf16 %v8438_v6 }
 0x46c   : > { %7350 = vst [vmem:[%s11117_s22 + $0x48] sm:$0xff] %v7310_v35   ;;  %v7305_v10 = vpack.c.bf16 %v6522_v54, %v6521_v48  ;;  %v6438_v38 = vadd.f32 %v8140_v63, %v11103_v56  ;;  %v6493_v37 = vadd.f32 %v6427_v28, %v6246_v22  ;;  %v6527_v52 = vmax.f32 %v6495_v13, 0.0 }
 0x46d   : > { %v6429_v53 = vpop.f32.mrf.mxu0 }
 0x46e   : > { %7349 = vst [vmem:[%s11117_s22 + $0x40] sm:$0xff] %v7305_v10   ;;  %v6496_v55 = vadd.f32 %v6438_v38, %v6249_v58  ;;  %v6430_v33 = vadd.f32 %v11103_v56, %v6429_v53  ;;  %v6525_v51 = vmax.f32 %v6493_v37, 0.0 }
 0x46f   : > { %v8143_v44 = vpop.f32.mrf.mxu0 }
 0x470   : > { %v6528_v11 = vmax.f32 %v6496_v55, 0.0  ;;  %v6494_v41 = vadd.f32 %v6430_v33, %v6247_v40  ;;  %v6451_v39 = vadd.f32 %v8143_v44, %v11103_v56 }
 0x471   : > { %v6442_v32 = vpop.f32.mrf.mxu0 }
 0x472   : > { %v7320_v42 = vpack.c.bf16 %v6528_v11, %v6527_v52  ;;  %v6526_v19 = vmax.f32 %v6494_v41, 0.0  ;;  %v6443_v1 = vadd.f32 %v11103_v56, %v6442_v32  ;;  %v6499_v25 = vadd.f32 %v6451_v39, %v6252_v31 }
 0x473   : > { %v8144_v7 = vpop.f32.mrf.mxu0 }
 0x474   : > { %7352 = vst [vmem:[%s11117_s22 + $0x58] sm:$0xff] %v7320_v42   ;;  %v7315_v5 = vpack.c.bf16 %v6526_v19, %v6525_v51  ;;  %v6454_v16 = vadd.f32 %v8144_v7, %v11103_v56  ;;  %v6497_v47 = vadd.f32 %v6443_v1, %v6250_v20  ;;  %v6531_v45 = vmax.f32 %v6499_v25, 0.0 }
 0x475   : > { %v6445_v2 = vpop.f32.mrf.mxu0 }
 0x476   : > { %7351 = vst [vmem:[%s11117_s22 + $0x50] sm:$0xff] %v7315_v5   ;;  %v6500_v21 = vadd.f32 %v6454_v16, %v6253_v34  ;;  %v6446_v50 = vadd.f32 %v11103_v56, %v6445_v2  ;;  %v6529_v46 = vmax.f32 %v6497_v47, 0.0 }
 0x477   : > { %v8147_v23 = vpop.f32.mrf.mxu0 }
 0x478   : > { %v6532_v59 = vmax.f32 %v6500_v21, 0.0  ;;  %v6498_v3 = vadd.f32 %v6446_v50, %v6251_v62  ;;  %v6467_v49 = vadd.f32 %v8147_v23, %v11103_v56 }
 0x479   : > { %v6458_v43 = vpop.f32.mrf.mxu0 }
 0x47a   : > { %v7330_v24 = vpack.c.bf16 %v6532_v59, %v6531_v45  ;;  %v6530_v29 = vmax.f32 %v6498_v3, 0.0  ;;  %v6459_v30 = vadd.f32 %v11103_v56, %v6458_v43  ;;  %v6503_v18 = vadd.f32 %v6467_v49, %v6256_v27 }
 0x47b   : > { %v8148_v17 = vpop.f32.mrf.mxu0 }
 0x47c   : > { %7354 = vst [vmem:[%s11117_s22 + $0x68] sm:$0xff] %v7330_v24   ;;  %v7325_v61 = vpack.c.bf16 %v6530_v29, %v6529_v46  ;;  %v6470_v36 = vadd.f32 %v8148_v17, %v11103_v56  ;;  %v6501_v15 = vadd.f32 %v6459_v30, %v6254_v60  ;;  %v6535_v0 = vmax.f32 %v6503_v18, 0.0 }
 0x47d   : > { %v6461_v8 = vpop.f32.mrf.mxu0 }
 0x47e   : > { %7353 = vst [vmem:[%s11117_s22 + $0x60] sm:$0xff] %v7325_v61   ;;  %v6504_v57 = vadd.f32 %v6470_v36, %v6257_v4  ;;  %v6462_v22 = vadd.f32 %v11103_v56, %v6461_v8  ;;  %v6533_v35 = vmax.f32 %v6501_v15, 0.0 }
 0x480   : > { %v6536_v58 = vmax.f32 %v6504_v57, 0.0  ;;  %v6502_v48 = vadd.f32 %v6462_v22, %v6255_v9 }
 0x482   : > { %v7340_v54 = vpack.c.bf16 %v6536_v58, %v6535_v0  ;;  %v6534_v28 = vmax.f32 %v6502_v48, 0.0 }
 0x484   : > { %7356 = vst [vmem:[%s11117_s22 + $0x78] sm:$0xff] %v7340_v54   ;;  %v7335_v56 = vpack.c.bf16 %v6534_v28, %v6533_v35 }
 0x486   : > { %7355 = vst [vmem:[%s11117_s22 + $0x70] sm:$0xff] %v7335_v56  }
 0x487   : > { %8558 = shalt.err (!%p8555_p10)
}
 0x488   : > { %s8559_s15 = scalar_lea.hbm %s11176_s12, 2048  ;;  %s8563_s21 = scalar_lea.hbm %s11230_s7, 4096 }
 0x489   : > { %p8560_p6 = scmp.ne.s32.totalorder %s11176_s12, %s8559_s15  ;;  %p8564_p3 = scmp.lt.s32.totalorder %s11176_s12, %s11230_s7 }
 0x48a   : > { %p8565_p11 = scmp.lt.s32.totalorder %s8563_s21, %s8559_s15 }
 0x48b   : > { %p8561_p4 = pnand %p8560_p6, %p11399_p1 }
 0x48c   : > { %p8566_p5 = por %p8565_p11, %p8564_p3 }
 0x48d   : > { %p8562_p8 = pneg %p8561_p4 }
 0x48f   : > { %p8567_p7 = pnand %p8566_p5, %p8562_p8 }
 0x491   : > { %8570 = shalt.err (!%p8567_p7)
}
 0x492   : > { %s8627_s1 = smov 64   ;;  %s8628_s16 = smov 4  }
 0x493   : > { %8179 = dma.vmem_to_hbm [thread:$0]  (%p11399_p1), %s11178_s23, 2048, %s11176_s12, %s6698_s30, %s8627_s1, %s8627_s1, %s8628_s16  }
 0x494 PF: > { %s6726_s9 = sand.u32 1, %s8605_s24   ;;  %p11400_p12 = scmp.ne.s32.totalorder %s11247_s8, 0 }
 0x495   : > { %p11401_p9 = scmp.ge.s32.totalorder %s8617_s27, 2  ;;  %s6727_s28 = scalar_lea.sflag [#allocation5], %s6726_s9 }
 0x497   : > { %p8196_p13 = pnand %p11401_p9, %p11400_p12 }
 0x499   : > { %p8197_p0 = pneg %p8196_p13 }
 0x49b   : > { %8600 = dma.done.wait (%p8197_p0), %s6727_s28, 2048  }
 0x49c   : > { %8602 = vsyncadd (%p8197_p0), %s6727_s28, 4294965248  ;;  %p22_p2 = scmp.ge.s32.totalorder %s8758_s14, 4   ;;  %s11402_s24 = smov %s8609_s25 }
 0x49d   : > { %s11403_s25 = smov %s8613_s26  ;;  %s11404_s26 = smov %s8768_s17 }
 0x49e   : > { %s11405_s27 = smov %s8758_s14  ;;  %24 = sbr.rel (!%p22_p2) target bundleno = 9 (0x9), region = 116 }
 0x4a3   :  { %6732 = vsyncpa [#allocation4], 1 }
 0x4a4   :  { %6734 = vsyncpa [#allocation4 + $0x1], 1 }
 0x4a5   :  { %6735 = vsyncpa [#allocation7], 1 }
 0x4a6   :  { %6736 = vsyncpa [#allocation10], 1 }
 0x4a7   :  { %6737 = vsyncpa [#allocation5], 1 }
 0x4a8   :  { %6739 = vsyncpa [#allocation5 + $0x1], 1 }

</bundles_post_ra>
